<compile_context>
chip_gen: v7x
topology: tpu7x:2x2x1
jax: 0.10.0
libtpu: 0.0.40
codegen_flags: <defaults>
</compile_context>

<pallas_src>
import numpy as np
import jax
import jax.numpy as jnp
from jax import lax
from jax.experimental import pallas as pl
from jax.experimental.pallas import tpu as pltpu

# ---------------- model hyper-parameters (small, consistent with __init__) ----
NUM_COMP_FEATURES = 16
COMP_L1 = 32
COMP_L2 = 16
VOCAB_SIZE = 32
OUTPUT_SIZE = 8
EMBEDDING_DIM = 16
HIDDEN_DIM = 32
N_LAYERS = 2
FC_L1 = 32
FC_L2 = 16
BIDIRECTIONAL = False
DROP_PROB = 0.5
BATCH = 4
SEQ = 8

BN_EPS = 1e-5
LANES = 128

_VMEM = pl.BlockSpec(memory_space=pltpu.MemorySpace.VMEM)
_SMEM = pl.BlockSpec(memory_space=pltpu.MemorySpace.SMEM)

# ------------------------- weight-slab layout (static) -------------------------
# Every piece starts at an 8-row (sublane-tile) aligned offset inside a single
# (rows, 128) f32 slab; lanes beyond each piece's width are zero padding.
_SLAB_LAYOUT = [
    # name        rows                        cols
    ('emb_w1',    VOCAB_SIZE,                 4 * HIDDEN_DIM),   # Emb @ Wih1^T
    ('whh1',      HIDDEN_DIM,                 4 * HIDDEN_DIM),
    ('wih2',      HIDDEN_DIM,                 4 * HIDDEN_DIM),
    ('whh2',      HIDDEN_DIM,                 4 * HIDDEN_DIM),
    ('bl1',       1,                          4 * HIDDEN_DIM),
    ('bl2',       1,                          4 * HIDDEN_DIM),
    ('cw1',       NUM_COMP_FEATURES,          COMP_L1),
    ('cb1',       1,                          COMP_L1),
    ('cw2',       COMP_L1,                    COMP_L2),
    ('cb2',       1,                          COMP_L2),
    ('fcw',       HIDDEN_DIM,                 OUTPUT_SIZE),
    ('fcb',       1,                          OUTPUT_SIZE),
    ('kw1a',      COMP_L2,                    FC_L1),
    ('kw1b',      OUTPUT_SIZE,                FC_L1),
    ('kb1',       1,                          FC_L1),
    ('kw2',       FC_L1,                      FC_L2),
    ('kb2',       1,                          FC_L2),
    ('ow',        FC_L2,                      1),
    ('ob',        1,                          1),
]


def _build_offsets():
    off, row = {}, 0
    for name, nr, nc in _SLAB_LAYOUT:
        off[name] = (row, nr, nc)
        row += -(-nr // 8) * 8           # round rows up to sublane tile (8)
    return off, row


_SLAB_OFF, _SLAB_ROWS = _build_offsets()


# ---------------------------- fused Pallas kernel ------------------------------
def fused_forward_kernel(x_comp_ref, tok_ref, len_ref, maxlen_ref, w_ref,
                         out_ref, x2_s, last_s):
    B, T, H = BATCH, SEQ, HIDDEN_DIM
    f32 = jnp.float32

    def W(name):                              # static slice into the weight slab
        r0, nr, nc = _SLAB_OFF[name]
        return w_ref[r0:r0 + nr, 0:nc]

    max_len = maxlen_ref[0]                   # scalar (SMEM), == max row length

    # ---- compound branch: relu(x@W1'+b1') -> relu(.@W2'+b2')  (BN pre-folded) --
    xc = x_comp_ref[...]
    hc = jnp.maximum(
        jnp.dot(xc, W('cw1'), preferred_element_type=f32) + W('cb1'), 0.0)
    out2_comp = jnp.maximum(
        jnp.dot(hc, W('cw2'), preferred_element_type=f32) + W('cb2'), 0.0)

    # ---- target branch: one-hot + fused embedding/layer-1 input projection ----
    tok = tok_ref[...]                        # (T*B, 1) int32, time-major
    onehot = (lax.broadcasted_iota(jnp.int32, (T * B, VOCAB_SIZE), 1)
              == tok).astype(f32)             # (T*B, V)
    gx1 = (jnp.dot(onehot, W('emb_w1'), preferred_element_type=f32)
           + W('bl1'))                        # (T*B, 4H) — one lane-dense matmul

    whh1 = W('whh1')
    wih2 = W('wih2')
    whh2 = W('whh2')
    bl2 = W('bl2')
    lengths = len_ref[...]                    # (B, 1) int32, sorted descending

    def lstm_cell(gates, c):                  # gate order i, f, g, o (torch)
        sg = jax.nn.sigmoid(gates)            # one EUP pass over the full (B,4H)
        th = jnp.tanh(gates)                  # one EUP pass over the full (B,4H)
        i_g = sg[:, 0:H]
        f_g = sg[:, H:2 * H]
        o_g = sg[:, 3 * H:4 * H]
        g_g = th[:, 2 * H:3 * H]
        c_new = f_g * c + i_g * g_g
        h_new = o_g * jnp.tanh(c_new)
        return h_new, c_new

    zero_bh = jnp.zeros((B, H), f32)

    # recurrence state lives directly in the packed output block:
    #   out[0]=h layer0, out[1]=h layer1, out[2]=c layer0, out[3]=c layer1, out[4]=y
    out_ref[0] = zero_bh
    out_ref[1] = zero_bh
    out_ref[2] = zero_bh
    out_ref[3] = zero_bh
    x2_s[...] = jnp.zeros((T * B, H), f32)    # pad_packed zero-fill for skipped t
    last_s[...] = zero_bh

    # ---- layer-1 recurrence: only h1 @ Whh1 on the serialized chain -----------
    for t in range(T):                        # statically unrolled (T = 8)
        @pl.when(t < max_len)                 # skip fully-padded timesteps
        def _():
            m = jnp.broadcast_to(lengths > t, (B, H))      # hoisted broadcast
            h1 = out_ref[0]
            c1 = out_ref[2]
            g1 = gx1[t * B:(t + 1) * B, :] + jnp.dot(
                h1, whh1, preferred_element_type=f32)
            h1n, c1n = lstm_cell(g1, c1)
            out_ref[0] = jnp.where(m, h1n, h1)
            out_ref[2] = jnp.where(m, c1n, c1)
            x2_s[t * B:(t + 1) * B, :] = jnp.where(m, h1n, zero_bh)

    # ---- layer-2 input projection hoisted to ONE (T*B,H)x(H,4H) matmul --------
    gx2 = jnp.dot(x2_s[...], wih2, preferred_element_type=f32) + bl2

    # ---- layer-2 recurrence: only h2 @ Whh2 on the serialized chain -----------
    for t in range(T):
        @pl.when(t < max_len)
        def _():
            m = jnp.broadcast_to(lengths > t, (B, H))
            h2 = out_ref[1]
            c2 = out_ref[3]
            g2 = gx2[t * B:(t + 1) * B, :] + jnp.dot(
                h2, whh2, preferred_element_type=f32)
            h2n, c2n = lstm_cell(g2, c2)
            out_ref[1] = jnp.where(m, h2n, h2)
            out_ref[3] = jnp.where(m, c2n, c2)

            @pl.when(t + 1 == max_len)        # lstm_out[:, max_len-1, :]
            def _():
                last_s[...] = jnp.where(m, h2n, zero_bh)   # pad_packed zero-fill

    # ---- fc: hidden -> output_size --------------------------------------------
    out_tar = (jnp.dot(last_s[...], W('fcw'), preferred_element_type=f32)
               + W('fcb'))                    # (B, OUTPUT_SIZE)

    # ---- combined FC_2_Layer on concat(out2_comp, out_tar) (split-weight) -----
    hh = jnp.maximum(
        jnp.dot(out2_comp, W('kw1a'), preferred_element_type=f32)
        + jnp.dot(out_tar, W('kw1b'), preferred_element_type=f32)
        + W('kb1'), 0.0)
    oc = jnp.maximum(
        jnp.dot(hh, W('kw2'), preferred_element_type=f32) + W('kb2'), 0.0)
    y = jnp.dot(oc, W('ow'), preferred_element_type=f32) + W('ob')   # (B, 1)

    # y stored broadcast across lanes into the packed output block (r_c == 'r')
    out_ref[2 * N_LAYERS] = jnp.broadcast_to(y, (B, H))


# ---------------------------- parameter init ----------------------------------
def _lin_init(kw, kb, fan_in, fan_out):
    bound = 1.0 / np.sqrt(fan_in)
    w = jax.random.uniform(kw, (fan_out, fan_in), jnp.float32, -bound, bound)
    b = jax.random.uniform(kb, (fan_out,), jnp.float32, -bound, bound)
    return w, b


def _fold_bn(w, b):
    # eval-mode BatchNorm1d with default params: gamma=1, beta=0, mean=0, var=1
    # BN(Wx+b) = (Wx+b)*scale  with scale = 1/sqrt(1+eps)
    # TODO(synk): for a trained checkpoint, fold the actual running stats/affine.
    scale = 1.0 / np.sqrt(1.0 + BN_EPS)
    return w * scale, b * scale


def _fc2_params(k, in_dim, l1, l2):
    ks = jax.random.split(k, 4)
    w1, b1 = _lin_init(ks[0], ks[1], in_dim, l1)
    w2, b2 = _lin_init(ks[2], ks[3], l1, l2)
    w1, b1 = _fold_bn(w1, b1)
    w2, b2 = _fold_bn(w2, b2)
    return w1.T, b1[None, :], w2.T, b2[None, :]


def init_params(key):
    keys = jax.random.split(key, 8)

    # comp FC_2_Layer (BN folded)
    cw1, cb1, cw2, cb2 = _fc2_params(keys[0], NUM_COMP_FEATURES, COMP_L1, COMP_L2)

    # embedding
    emb = jax.random.normal(keys[1], (VOCAB_SIZE, EMBEDDING_DIM), jnp.float32)

    # LSTM layers (unidirectional; gate order i,f,g,o as in torch.nn.LSTM)
    lkeys = jax.random.split(keys[2], N_LAYERS * 4)
    bound = 1.0 / np.sqrt(HIDDEN_DIM)
    lstm = []
    for layer in range(N_LAYERS):
        in_dim = EMBEDDING_DIM if layer == 0 else HIDDEN_DIM
        kk = lkeys[layer * 4:(layer + 1) * 4]
        w_ih = jax.random.uniform(kk[0], (4 * HIDDEN_DIM, in_dim), jnp.float32,
                                  -bound, bound)
        w_hh = jax.random.uniform(kk[1], (4 * HIDDEN_DIM, HIDDEN_DIM), jnp.float32,
                                  -bound, bound)
        b_ih = jax.random.uniform(kk[2], (4 * HIDDEN_DIM,), jnp.float32, -bound, bound)
        b_hh = jax.random.uniform(kk[3], (4 * HIDDEN_DIM,), jnp.float32, -bound, bound)
        lstm.append((w_ih, w_hh, b_ih + b_hh))

    # fold embedding into layer-1 input projection: (V, 4H)
    emb_w1 = emb @ lstm[0][0].T
    whh1 = lstm[0][1].T
    bl1 = lstm[0][2][None, :]
    wih2 = lstm[1][0].T
    whh2 = lstm[1][1].T
    bl2 = lstm[1][2][None, :]

    # fc: hidden_dim -> output_size
    fw, fb = _lin_init(*jax.random.split(keys[3], 2), HIDDEN_DIM, OUTPUT_SIZE)
    fcw, fcb = fw.T, fb[None, :]

    # combined FC_2_Layer: (comp_l2 + output_size) -> fc_l1 -> fc_l2; split W1 so
    # the in-kernel concat becomes two matmuls.
    kw1t, kb1, kw2t, kb2 = _fc2_params(keys[4], COMP_L2 + OUTPUT_SIZE, FC_L1, FC_L2)
    kw1a, kw1b = kw1t[:COMP_L2, :], kw1t[COMP_L2:, :]

    # output: fc_l2 -> 1
    ow, ob = _lin_init(*jax.random.split(keys[5], 2), FC_L2, 1)
    owt, obb = ow.T, ob[None, :]

    named = {
        'emb_w1': emb_w1, 'whh1': whh1, 'wih2': wih2, 'whh2': whh2,
        'bl1': bl1, 'bl2': bl2,
        'cw1': cw1, 'cb1': cb1, 'cw2': cw2, 'cb2': cb2,
        'fcw': fcw, 'fcb': fcb,
        'kw1a': kw1a, 'kw1b': kw1b, 'kb1': kb1, 'kw2': kw2t, 'kb2': kb2,
        'ow': owt, 'ob': obb,
    }

    # pack everything into one 128-lane slab (single HBM->VMEM DMA at run time)
    slab = np.zeros((_SLAB_ROWS, LANES), np.float32)
    for name, (r0, nr, nc) in _SLAB_OFF.items():
        a = np.asarray(named[name], np.float32)
        assert a.shape == (nr, nc), (name, a.shape, (nr, nc))
        slab[r0:r0 + nr, :nc] = a
    return jnp.asarray(slab)


# ---------------------------- full forward (jitted, single pallas_call) --------
@jax.jit
def comp_fcnn_tar_rnn_forward(weight_slab, x_comp, x_tar):
    B, T = x_tar.shape

    # sort rows by nonzero count descending (stable), emulating the torch code
    lengths = jnp.sum((x_tar != 0).astype(jnp.int32), axis=1)
    perm = jnp.argsort(-lengths, stable=True)
    x_tar_sorted = x_tar[perm].astype(jnp.int32)           # (B, T)
    lengths_sorted = lengths[perm].astype(jnp.int32)       # (B,) descending

    tok_tm = jnp.transpose(x_tar_sorted, (1, 0)).reshape(T * B, 1)  # time-major
    lengths_col = lengths_sorted[:, None]                           # (B, 1)
    max_len = lengths_sorted[0:1]                                   # (1,) scalar

    packed = pl.pallas_call(
        fused_forward_kernel,
        out_shape=jax.ShapeDtypeStruct((2 * N_LAYERS + 1, B, HIDDEN_DIM),
                                       jnp.float32),
        in_specs=[_VMEM, _VMEM, _VMEM, _SMEM, _VMEM],
        out_specs=_VMEM,
        scratch_shapes=[
            pltpu.VMEM((T * B, HIDDEN_DIM), jnp.float32),   # layer-1 outputs
            pltpu.VMEM((B, HIDDEN_DIM), jnp.float32),       # last-time output
        ],
    )(x_comp, tok_tm, lengths_col, max_len, weight_slab)

    h_n = packed[0:N_LAYERS]                                # (n_layers, B, H)
    c_n = packed[N_LAYERS:2 * N_LAYERS]                     # (n_layers, B, H)
    y_pred = packed[2 * N_LAYERS, :, 0:1]                   # (B, 1)
    return y_pred, (h_n, c_n)


# ---------------------------- main ---------------------------------------------
if __name__ == "__main__":
    key = jax.random.PRNGKey(0)
    kp, k1, k2 = jax.random.split(key, 3)
    weight_slab = init_params(kp)

    x_comp = jax.random.normal(k1, (BATCH, NUM_COMP_FEATURES), jnp.float32)

    tokens = jax.random.randint(k2, (BATCH, SEQ), 1, VOCAB_SIZE, dtype=jnp.int32)
    # variable-length sequences with trailing zero padding (all lengths >= 1)
    lens_np = np.array([SEQ, 5, 3, 6], dtype=np.int32)
    valid = jnp.asarray(np.arange(SEQ)[None, :] < lens_np[:, None])
    x_tar = jnp.where(valid, tokens, 0)

    y_pred, (h_n, c_n) = comp_fcnn_tar_rnn_forward(weight_slab, x_comp, x_tar)
    jax.block_until_ready(y_pred)
    jax.block_until_ready(h_n)
    jax.block_until_ready(c_n)

    assert y_pred.shape == (BATCH, 1)
    assert h_n.shape == (N_LAYERS, BATCH, HIDDEN_DIM)
    assert c_n.shape == (N_LAYERS, BATCH, HIDDEN_DIM)
    assert bool(jnp.all(jnp.isfinite(y_pred)))
    print("KERNEL_OK")
</pallas_src>

<mosaic_0001>
module attributes {stable_mosaic.version = 11 : i64} {
  func.func @fused_forward_kernel(%arg0: memref<4x16xf32, #tpu.memory_space<vmem>>, %arg1: memref<32x1xi32, #tpu.memory_space<vmem>>, %arg2: memref<4x1xi32, #tpu.memory_space<vmem>>, %arg3: memref<1xi32, #tpu.memory_space<smem>>, %arg4: memref<344x128xf32, #tpu.memory_space<vmem>>, %arg5: memref<5x4x32xf32, #tpu.memory_space<vmem>>, %arg6: memref<32x32xf32, #tpu.memory_space<vmem>>, %arg7: memref<4x32xf32, #tpu.memory_space<vmem>>) attributes {dimension_semantics = [], scalar_prefetch = 0 : i64, scratch_operands = 2 : i64, tpu.core_type = #tpu.core_type<tc>} {
    %c0 = arith.constant 0 : index
    %0 = memref.load %arg3[%c0] : memref<1xi32, #tpu.memory_space<smem>>
    %c0_0 = arith.constant 0 : index
    %c0_1 = arith.constant 0 : index
    %1 = vector.load %arg0[%c0_0, %c0_1] : memref<4x16xf32, #tpu.memory_space<vmem>>, vector<4x16xf32>
    %c144 = arith.constant 144 : index
    %c0_2 = arith.constant 0 : index
    %2 = vector.load %arg4[%c144, %c0_2] : memref<344x128xf32, #tpu.memory_space<vmem>>, vector<16x32xf32>
    %cst = arith.constant dense<0.000000e+00> : vector<4x32xf32>
    %3 = tpu.matmul %1, %2, %cst {dimension_numbers = #tpu.dot_dimension_numbers<[1], [0], [0], [1], [0, 0, 1, 1], [], []>} : vector<4x16xf32>, vector<16x32xf32>, vector<4x32xf32> -> vector<4x32xf32>
    %c160 = arith.constant 160 : index
    %c0_3 = arith.constant 0 : index
    %4 = vector.load %arg4[%c160, %c0_3] : memref<344x128xf32, #tpu.memory_space<vmem>>, vector<1x32xf32>
    %5 = vector.broadcast %4 : vector<1x32xf32> to vector<4x32xf32>
    %6 = arith.addf %3, %5 : vector<4x32xf32>
    %cst_4 = arith.constant 0.000000e+00 : f32
    %7 = vector.broadcast %cst_4 : f32 to vector<4x32xf32>
    %8 = arith.maximumf %6, %7 : vector<4x32xf32>
    %c168 = arith.constant 168 : index
    %c0_5 = arith.constant 0 : index
    %9 = vector.load %arg4[%c168, %c0_5] : memref<344x128xf32, #tpu.memory_space<vmem>>, vector<32x16xf32>
    %cst_6 = arith.constant dense<0.000000e+00> : vector<4x16xf32>
    %10 = tpu.matmul %8, %9, %cst_6 {dimension_numbers = #tpu.dot_dimension_numbers<[1], [0], [0], [1], [0, 0, 1, 1], [], []>} : vector<4x32xf32>, vector<32x16xf32>, vector<4x16xf32> -> vector<4x16xf32>
    %c200 = arith.constant 200 : index
    %c0_7 = arith.constant 0 : index
    %11 = vector.load %arg4[%c200, %c0_7] : memref<344x128xf32, #tpu.memory_space<vmem>>, vector<1x16xf32>
    %12 = vector.broadcast %11 : vector<1x16xf32> to vector<4x16xf32>
    %13 = arith.addf %10, %12 : vector<4x16xf32>
    %cst_8 = arith.constant 0.000000e+00 : f32
    %14 = vector.broadcast %cst_8 : f32 to vector<4x16xf32>
    %15 = arith.maximumf %13, %14 : vector<4x16xf32>
    %c0_9 = arith.constant 0 : index
    %c0_10 = arith.constant 0 : index
    %16 = vector.load %arg1[%c0_9, %c0_10] : memref<32x1xi32, #tpu.memory_space<vmem>>, vector<32x1xi32>
    %17 = tpu.iota {dimensions = array<i32: 1>} : vector<32x32xi32>
    %18 = vector.broadcast %16 : vector<32x1xi32> to vector<32x32xi32>
    %19 = arith.cmpi eq, %17, %18 : vector<32x32xi32>
    %20 = arith.extui %19 : vector<32x32xi1> to vector<32x32xi32>
    %21 = arith.sitofp %20 : vector<32x32xi32> to vector<32x32xf32>
    %c0_11 = arith.constant 0 : index
    %c0_12 = arith.constant 0 : index
    %22 = vector.load %arg4[%c0_11, %c0_12] : memref<344x128xf32, #tpu.memory_space<vmem>>, vector<32x128xf32>
    %cst_13 = arith.constant dense<0.000000e+00> : vector<32x128xf32>
    %23 = tpu.matmul %21, %22, %cst_13 {dimension_numbers = #tpu.dot_dimension_numbers<[1], [0], [0], [1], [0, 0, 1, 1], [], []>} : vector<32x32xf32>, vector<32x128xf32>, vector<32x128xf32> -> vector<32x128xf32>
    %c128 = arith.constant 128 : index
    %c0_14 = arith.constant 0 : index
    %24 = vector.load %arg4[%c128, %c0_14] : memref<344x128xf32, #tpu.memory_space<vmem>>, vector<1x128xf32>
    %25 = vector.broadcast %24 : vector<1x128xf32> to vector<32x128xf32>
    %26 = arith.addf %23, %25 : vector<32x128xf32>
    %c32 = arith.constant 32 : index
    %c0_15 = arith.constant 0 : index
    %27 = vector.load %arg4[%c32, %c0_15] : memref<344x128xf32, #tpu.memory_space<vmem>>, vector<32x128xf32>
    %c64 = arith.constant 64 : index
    %c0_16 = arith.constant 0 : index
    %28 = vector.load %arg4[%c64, %c0_16] : memref<344x128xf32, #tpu.memory_space<vmem>>, vector<32x128xf32>
    %c96 = arith.constant 96 : index
    %c0_17 = arith.constant 0 : index
    %29 = vector.load %arg4[%c96, %c0_17] : memref<344x128xf32, #tpu.memory_space<vmem>>, vector<32x128xf32>
    %c136 = arith.constant 136 : index
    %c0_18 = arith.constant 0 : index
    %30 = vector.load %arg4[%c136, %c0_18] : memref<344x128xf32, #tpu.memory_space<vmem>>, vector<1x128xf32>
    %c0_19 = arith.constant 0 : index
    %c0_20 = arith.constant 0 : index
    %31 = vector.load %arg2[%c0_19, %c0_20] : memref<4x1xi32, #tpu.memory_space<vmem>>, vector<4x1xi32>
    %cst_21 = arith.constant 0.000000e+00 : f32
    %32 = vector.broadcast %cst_21 : f32 to vector<4x32xf32>
    %c0_22 = arith.constant 0 : index
    %c0_23 = arith.constant 0 : index
    %c0_24 = arith.constant 0 : index
    %33 = vector.load %arg5[%c0_22, %c0_23, %c0_24] : memref<5x4x32xf32, #tpu.memory_space<vmem>>, vector<1x4x32xf32>
    %34 = vector.shape_cast %33 : vector<1x4x32xf32> to vector<4x32xf32>
    %35 = vector.shape_cast %32 : vector<4x32xf32> to vector<1x4x32xf32>
    tpu.vector_store %arg5[%c0_22, %c0_23, %c0_24], %35 {strides = array<i32>} : memref<5x4x32xf32, #tpu.memory_space<vmem>>, vector<1x4x32xf32>,
    %c1 = arith.constant 1 : index
    %c0_25 = arith.constant 0 : index
    %c0_26 = arith.constant 0 : index
    %36 = vector.load %arg5[%c1, %c0_25, %c0_26] : memref<5x4x32xf32, #tpu.memory_space<vmem>>, vector<1x4x32xf32>
    %37 = vector.shape_cast %36 : vector<1x4x32xf32> to vector<4x32xf32>
    %38 = vector.shape_cast %32 : vector<4x32xf32> to vector<1x4x32xf32>
    tpu.vector_store %arg5[%c1, %c0_25, %c0_26], %38 {strides = array<i32>} : memref<5x4x32xf32, #tpu.memory_space<vmem>>, vector<1x4x32xf32>,
    %c2 = arith.constant 2 : index
    %c0_27 = arith.constant 0 : index
    %c0_28 = arith.constant 0 : index
    %39 = vector.load %arg5[%c2, %c0_27, %c0_28] : memref<5x4x32xf32, #tpu.memory_space<vmem>>, vector<1x4x32xf32>
    %40 = vector.shape_cast %39 : vector<1x4x32xf32> to vector<4x32xf32>
    %41 = vector.shape_cast %32 : vector<4x32xf32> to vector<1x4x32xf32>
    tpu.vector_store %arg5[%c2, %c0_27, %c0_28], %41 {strides = array<i32>} : memref<5x4x32xf32, #tpu.memory_space<vmem>>, vector<1x4x32xf32>,
    %c3 = arith.constant 3 : index
    %c0_29 = arith.constant 0 : index
    %c0_30 = arith.constant 0 : index
    %42 = vector.load %arg5[%c3, %c0_29, %c0_30] : memref<5x4x32xf32, #tpu.memory_space<vmem>>, vector<1x4x32xf32>
    %43 = vector.shape_cast %42 : vector<1x4x32xf32> to vector<4x32xf32>
    %44 = vector.shape_cast %32 : vector<4x32xf32> to vector<1x4x32xf32>
    tpu.vector_store %arg5[%c3, %c0_29, %c0_30], %44 {strides = array<i32>} : memref<5x4x32xf32, #tpu.memory_space<vmem>>, vector<1x4x32xf32>,
    %cst_31 = arith.constant 0.000000e+00 : f32
    %45 = vector.broadcast %cst_31 : f32 to vector<32x32xf32>
    %c0_32 = arith.constant 0 : index
    %c0_33 = arith.constant 0 : index
    %46 = vector.load %arg6[%c0_32, %c0_33] : memref<32x32xf32, #tpu.memory_space<vmem>>, vector<32x32xf32>
    tpu.vector_store %arg6[%c0_32, %c0_33], %45 {strides = array<i32>} : memref<32x32xf32, #tpu.memory_space<vmem>>, vector<32x32xf32>,
    %c0_34 = arith.constant 0 : index
    %c0_35 = arith.constant 0 : index
    %47 = vector.load %arg7[%c0_34, %c0_35] : memref<4x32xf32, #tpu.memory_space<vmem>>, vector<4x32xf32>
    tpu.vector_store %arg7[%c0_34, %c0_35], %32 {strides = array<i32>} : memref<4x32xf32, #tpu.memory_space<vmem>>, vector<4x32xf32>,
    %c0_i32 = arith.constant 0 : i32
    %48 = arith.cmpi sgt, %0, %c0_i32 : i32
    %49 = arith.extui %48 : i1 to i32
    %c0_i32_36 = arith.constant 0 : i32
    %50 = arith.cmpi ne, %49, %c0_i32_36 : i32
    scf.if %50 {
      %c0_i32_83 = arith.constant 0 : i32
      %133 = vector.broadcast %c0_i32_83 : i32 to vector<4x1xi32>
      %134 = arith.cmpi sgt, %31, %133 : vector<4x1xi32>
      %135 = vector.shape_cast %134 : vector<4x1xi1> to vector<4x1xi1>
      %136 = vector.broadcast %135 : vector<4x1xi1> to vector<4x32xi1>
      %c0_84 = arith.constant 0 : index
      %c0_85 = arith.constant 0 : index
      %c0_86 = arith.constant 0 : index
      %137 = vector.load %arg5[%c0_84, %c0_85, %c0_86] : memref<5x4x32xf32, #tpu.memory_space<vmem>>, vector<1x4x32xf32>
      %138 = vector.shape_cast %137 : vector<1x4x32xf32> to vector<4x32xf32>
      %c2_87 = arith.constant 2 : index
      %c0_88 = arith.constant 0 : index
      %c0_89 = arith.constant 0 : index
      %139 = vector.load %arg5[%c2_87, %c0_88, %c0_89] : memref<5x4x32xf32, #tpu.memory_space<vmem>>, vector<1x4x32xf32>
      %140 = vector.shape_cast %139 : vector<1x4x32xf32> to vector<4x32xf32>
      %141 = vector.extract_strided_slice %26 {offsets = [0, 0], sizes = [4, 128], strides = [1, 1]} : vector<32x128xf32> to vector<4x128xf32>
      %cst_90 = arith.constant dense<0.000000e+00> : vector<4x128xf32>
      %142 = tpu.matmul %138, %27, %cst_90 {dimension_numbers = #tpu.dot_dimension_numbers<[1], [0], [0], [1], [0, 0, 1, 1], [], []>} : vector<4x32xf32>, vector<32x128xf32>, vector<4x128xf32> -> vector<4x128xf32>
      %143 = arith.addf %141, %142 : vector<4x128xf32>
      %144 = arith.negf %143 : vector<4x128xf32>
      %145 = math.exp %144 : vector<4x128xf32>
      %cst_91 = arith.constant 1.000000e+00 : f32
      %146 = vector.broadcast %cst_91 : f32 to vector<4x128xf32>
      %147 = arith.addf %146, %145 : vector<4x128xf32>
      %148 = arith.divf %146, %147 : vector<4x128xf32>
      %149 = math.tanh %143 : vector<4x128xf32>
      %150 = vector.extract_strided_slice %148 {offsets = [0, 0], sizes = [4, 32], strides = [1, 1]} : vector<4x128xf32> to vector<4x32xf32>
      %151 = vector.extract_strided_slice %148 {offsets = [0, 32], sizes = [4, 32], strides = [1, 1]} : vector<4x128xf32> to vector<4x32xf32>
      %152 = vector.extract_strided_slice %148 {offsets = [0, 96], sizes = [4, 32], strides = [1, 1]} : vector<4x128xf32> to vector<4x32xf32>
      %153 = vector.extract_strided_slice %149 {offsets = [0, 64], sizes = [4, 32], strides = [1, 1]} : vector<4x128xf32> to vector<4x32xf32>
      %154 = arith.mulf %151, %140 : vector<4x32xf32>
      %155 = arith.mulf %150, %153 : vector<4x32xf32>
      %156 = arith.addf %154, %155 : vector<4x32xf32>
      %157 = math.tanh %156 : vector<4x32xf32>
      %158 = arith.mulf %152, %157 : vector<4x32xf32>
      %159 = arith.select %136, %158, %138 : vector<4x32xi1>, vector<4x32xf32>
      %c0_92 = arith.constant 0 : index
      %c0_93 = arith.constant 0 : index
      %c0_94 = arith.constant 0 : index
      %160 = vector.load %arg5[%c0_92, %c0_93, %c0_94] : memref<5x4x32xf32, #tpu.memory_space<vmem>>, vector<1x4x32xf32>
      %161 = vector.shape_cast %160 : vector<1x4x32xf32> to vector<4x32xf32>
      %162 = vector.shape_cast %159 : vector<4x32xf32> to vector<1x4x32xf32>
      tpu.vector_store %arg5[%c0_92, %c0_93, %c0_94], %162 {strides = array<i32>} : memref<5x4x32xf32, #tpu.memory_space<vmem>>, vector<1x4x32xf32>,
      %163 = arith.select %136, %156, %140 : vector<4x32xi1>, vector<4x32xf32>
      %c2_95 = arith.constant 2 : index
      %c0_96 = arith.constant 0 : index
      %c0_97 = arith.constant 0 : index
      %164 = vector.load %arg5[%c2_95, %c0_96, %c0_97] : memref<5x4x32xf32, #tpu.memory_space<vmem>>, vector<1x4x32xf32>
      %165 = vector.shape_cast %164 : vector<1x4x32xf32> to vector<4x32xf32>
      %166 = vector.shape_cast %163 : vector<4x32xf32> to vector<1x4x32xf32>
      tpu.vector_store %arg5[%c2_95, %c0_96, %c0_97], %166 {strides = array<i32>} : memref<5x4x32xf32, #tpu.memory_space<vmem>>, vector<1x4x32xf32>,
      %167 = arith.select %136, %158, %32 : vector<4x32xi1>, vector<4x32xf32>
      %c0_98 = arith.constant 0 : index
      %c0_99 = arith.constant 0 : index
      %168 = vector.load %arg6[%c0_98, %c0_99] : memref<32x32xf32, #tpu.memory_space<vmem>>, vector<4x32xf32>
      tpu.vector_store %arg6[%c0_98, %c0_99], %167 {strides = array<i32>} : memref<32x32xf32, #tpu.memory_space<vmem>>, vector<4x32xf32>,
    } else {
    }
    %c1_i32 = arith.constant 1 : i32
    %51 = arith.cmpi sgt, %0, %c1_i32 : i32
    %52 = arith.extui %51 : i1 to i32
    %c0_i32_37 = arith.constant 0 : i32
    %53 = arith.cmpi ne, %52, %c0_i32_37 : i32
    scf.if %53 {
      %c1_i32_83 = arith.constant 1 : i32
      %133 = vector.broadcast %c1_i32_83 : i32 to vector<4x1xi32>
      %134 = arith.cmpi sgt, %31, %133 : vector<4x1xi32>
      %135 = vector.shape_cast %134 : vector<4x1xi1> to vector<4x1xi1>
      %136 = vector.broadcast %135 : vector<4x1xi1> to vector<4x32xi1>
      %c0_84 = arith.constant 0 : index
      %c0_85 = arith.constant 0 : index
      %c0_86 = arith.constant 0 : index
      %137 = vector.load %arg5[%c0_84, %c0_85, %c0_86] : memref<5x4x32xf32, #tpu.memory_space<vmem>>, vector<1x4x32xf32>
      %138 = vector.shape_cast %137 : vector<1x4x32xf32> to vector<4x32xf32>
      %c2_87 = arith.constant 2 : index
      %c0_88 = arith.constant 0 : index
      %c0_89 = arith.constant 0 : index
      %139 = vector.load %arg5[%c2_87, %c0_88, %c0_89] : memref<5x4x32xf32, #tpu.memory_space<vmem>>, vector<1x4x32xf32>
      %140 = vector.shape_cast %139 : vector<1x4x32xf32> to vector<4x32xf32>
      %141 = vector.extract_strided_slice %26 {offsets = [4, 0], sizes = [4, 128], strides = [1, 1]} : vector<32x128xf32> to vector<4x128xf32>
      %cst_90 = arith.constant dense<0.000000e+00> : vector<4x128xf32>
      %142 = tpu.matmul %138, %27, %cst_90 {dimension_numbers = #tpu.dot_dimension_numbers<[1], [0], [0], [1], [0, 0, 1, 1], [], []>} : vector<4x32xf32>, vector<32x128xf32>, vector<4x128xf32> -> vector<4x128xf32>
      %143 = arith.addf %141, %142 : vector<4x128xf32>
      %144 = arith.negf %143 : vector<4x128xf32>
      %145 = math.exp %144 : vector<4x128xf32>
      %cst_91 = arith.constant 1.000000e+00 : f32
      %146 = vector.broadcast %cst_91 : f32 to vector<4x128xf32>
      %147 = arith.addf %146, %145 : vector<4x128xf32>
      %148 = arith.divf %146, %147 : vector<4x128xf32>
      %149 = math.tanh %143 : vector<4x128xf32>
      %150 = vector.extract_strided_slice %148 {offsets = [0, 0], sizes = [4, 32], strides = [1, 1]} : vector<4x128xf32> to vector<4x32xf32>
      %151 = vector.extract_strided_slice %148 {offsets = [0, 32], sizes = [4, 32], strides = [1, 1]} : vector<4x128xf32> to vector<4x32xf32>
      %152 = vector.extract_strided_slice %148 {offsets = [0, 96], sizes = [4, 32], strides = [1, 1]} : vector<4x128xf32> to vector<4x32xf32>
      %153 = vector.extract_strided_slice %149 {offsets = [0, 64], sizes = [4, 32], strides = [1, 1]} : vector<4x128xf32> to vector<4x32xf32>
      %154 = arith.mulf %151, %140 : vector<4x32xf32>
      %155 = arith.mulf %150, %153 : vector<4x32xf32>
      %156 = arith.addf %154, %155 : vector<4x32xf32>
      %157 = math.tanh %156 : vector<4x32xf32>
      %158 = arith.mulf %152, %157 : vector<4x32xf32>
      %159 = arith.select %136, %158, %138 : vector<4x32xi1>, vector<4x32xf32>
      %c0_92 = arith.constant 0 : index
      %c0_93 = arith.constant 0 : index
      %c0_94 = arith.constant 0 : index
      %160 = vector.load %arg5[%c0_92, %c0_93, %c0_94] : memref<5x4x32xf32, #tpu.memory_space<vmem>>, vector<1x4x32xf32>
      %161 = vector.shape_cast %160 : vector<1x4x32xf32> to vector<4x32xf32>
      %162 = vector.shape_cast %159 : vector<4x32xf32> to vector<1x4x32xf32>
      tpu.vector_store %arg5[%c0_92, %c0_93, %c0_94], %162 {strides = array<i32>} : memref<5x4x32xf32, #tpu.memory_space<vmem>>, vector<1x4x32xf32>,
      %163 = arith.select %136, %156, %140 : vector<4x32xi1>, vector<4x32xf32>
      %c2_95 = arith.constant 2 : index
      %c0_96 = arith.constant 0 : index
      %c0_97 = arith.constant 0 : index
      %164 = vector.load %arg5[%c2_95, %c0_96, %c0_97] : memref<5x4x32xf32, #tpu.memory_space<vmem>>, vector<1x4x32xf32>
      %165 = vector.shape_cast %164 : vector<1x4x32xf32> to vector<4x32xf32>
      %166 = vector.shape_cast %163 : vector<4x32xf32> to vector<1x4x32xf32>
      tpu.vector_store %arg5[%c2_95, %c0_96, %c0_97], %166 {strides = array<i32>} : memref<5x4x32xf32, #tpu.memory_space<vmem>>, vector<1x4x32xf32>,
      %167 = arith.select %136, %158, %32 : vector<4x32xi1>, vector<4x32xf32>
      %c4_98 = arith.constant 4 : index
      %c0_99 = arith.constant 0 : index
      %168 = vector.load %arg6[%c4_98, %c0_99] : memref<32x32xf32, #tpu.memory_space<vmem>>, vector<4x32xf32>
      tpu.vector_store %arg6[%c4_98, %c0_99], %167 {strides = array<i32>} : memref<32x32xf32, #tpu.memory_space<vmem>>, vector<4x32xf32>,
    } else {
    }
    %c2_i32 = arith.constant 2 : i32
    %54 = arith.cmpi sgt, %0, %c2_i32 : i32
    %55 = arith.extui %54 : i1 to i32
    %c0_i32_38 = arith.constant 0 : i32
    %56 = arith.cmpi ne, %55, %c0_i32_38 : i32
    scf.if %56 {
      %c2_i32_83 = arith.constant 2 : i32
      %133 = vector.broadcast %c2_i32_83 : i32 to vector<4x1xi32>
      %134 = arith.cmpi sgt, %31, %133 : vector<4x1xi32>
      %135 = vector.shape_cast %134 : vector<4x1xi1> to vector<4x1xi1>
      %136 = vector.broadcast %135 : vector<4x1xi1> to vector<4x32xi1>
      %c0_84 = arith.constant 0 : index
      %c0_85 = arith.constant 0 : index
      %c0_86 = arith.constant 0 : index
      %137 = vector.load %arg5[%c0_84, %c0_85, %c0_86] : memref<5x4x32xf32, #tpu.memory_space<vmem>>, vector<1x4x32xf32>
      %138 = vector.shape_cast %137 : vector<1x4x32xf32> to vector<4x32xf32>
      %c2_87 = arith.constant 2 : index
      %c0_88 = arith.constant 0 : index
      %c0_89 = arith.constant 0 : index
      %139 = vector.load %arg5[%c2_87, %c0_88, %c0_89] : memref<5x4x32xf32, #tpu.memory_space<vmem>>, vector<1x4x32xf32>
      %140 = vector.shape_cast %139 : vector<1x4x32xf32> to vector<4x32xf32>
      %141 = vector.extract_strided_slice %26 {offsets = [8, 0], sizes = [4, 128], strides = [1, 1]} : vector<32x128xf32> to vector<4x128xf32>
      %cst_90 = arith.constant dense<0.000000e+00> : vector<4x128xf32>
      %142 = tpu.matmul %138, %27, %cst_90 {dimension_numbers = #tpu.dot_dimension_numbers<[1], [0], [0], [1], [0, 0, 1, 1], [], []>} : vector<4x32xf32>, vector<32x128xf32>, vector<4x128xf32> -> vector<4x128xf32>
      %143 = arith.addf %141, %142 : vector<4x128xf32>
      %144 = arith.negf %143 : vector<4x128xf32>
      %145 = math.exp %144 : vector<4x128xf32>
      %cst_91 = arith.constant 1.000000e+00 : f32
      %146 = vector.broadcast %cst_91 : f32 to vector<4x128xf32>
      %147 = arith.addf %146, %145 : vector<4x128xf32>
      %148 = arith.divf %146, %147 : vector<4x128xf32>
      %149 = math.tanh %143 : vector<4x128xf32>
      %150 = vector.extract_strided_slice %148 {offsets = [0, 0], sizes = [4, 32], strides = [1, 1]} : vector<4x128xf32> to vector<4x32xf32>
      %151 = vector.extract_strided_slice %148 {offsets = [0, 32], sizes = [4, 32], strides = [1, 1]} : vector<4x128xf32> to vector<4x32xf32>
      %152 = vector.extract_strided_slice %148 {offsets = [0, 96], sizes = [4, 32], strides = [1, 1]} : vector<4x128xf32> to vector<4x32xf32>
      %153 = vector.extract_strided_slice %149 {offsets = [0, 64], sizes = [4, 32], strides = [1, 1]} : vector<4x128xf32> to vector<4x32xf32>
      %154 = arith.mulf %151, %140 : vector<4x32xf32>
      %155 = arith.mulf %150, %153 : vector<4x32xf32>
      %156 = arith.addf %154, %155 : vector<4x32xf32>
      %157 = math.tanh %156 : vector<4x32xf32>
      %158 = arith.mulf %152, %157 : vector<4x32xf32>
      %159 = arith.select %136, %158, %138 : vector<4x32xi1>, vector<4x32xf32>
      %c0_92 = arith.constant 0 : index
      %c0_93 = arith.constant 0 : index
      %c0_94 = arith.constant 0 : index
      %160 = vector.load %arg5[%c0_92, %c0_93, %c0_94] : memref<5x4x32xf32, #tpu.memory_space<vmem>>, vector<1x4x32xf32>
      %161 = vector.shape_cast %160 : vector<1x4x32xf32> to vector<4x32xf32>
      %162 = vector.shape_cast %159 : vector<4x32xf32> to vector<1x4x32xf32>
      tpu.vector_store %arg5[%c0_92, %c0_93, %c0_94], %162 {strides = array<i32>} : memref<5x4x32xf32, #tpu.memory_space<vmem>>, vector<1x4x32xf32>,
      %163 = arith.select %136, %156, %140 : vector<4x32xi1>, vector<4x32xf32>
      %c2_95 = arith.constant 2 : index
      %c0_96 = arith.constant 0 : index
      %c0_97 = arith.constant 0 : index
      %164 = vector.load %arg5[%c2_95, %c0_96, %c0_97] : memref<5x4x32xf32, #tpu.memory_space<vmem>>, vector<1x4x32xf32>
      %165 = vector.shape_cast %164 : vector<1x4x32xf32> to vector<4x32xf32>
      %166 = vector.shape_cast %163 : vector<4x32xf32> to vector<1x4x32xf32>
      tpu.vector_store %arg5[%c2_95, %c0_96, %c0_97], %166 {strides = array<i32>} : memref<5x4x32xf32, #tpu.memory_space<vmem>>, vector<1x4x32xf32>,
      %167 = arith.select %136, %158, %32 : vector<4x32xi1>, vector<4x32xf32>
      %c8 = arith.constant 8 : index
      %c0_98 = arith.constant 0 : index
      %168 = vector.load %arg6[%c8, %c0_98] : memref<32x32xf32, #tpu.memory_space<vmem>>, vector<4x32xf32>
      tpu.vector_store %arg6[%c8, %c0_98], %167 {strides = array<i32>} : memref<32x32xf32, #tpu.memory_space<vmem>>, vector<4x32xf32>,
    } else {
    }
    %c3_i32 = arith.constant 3 : i32
    %57 = arith.cmpi sgt, %0, %c3_i32 : i32
    %58 = arith.extui %57 : i1 to i32
    %c0_i32_39 = arith.constant 0 : i32
    %59 = arith.cmpi ne, %58, %c0_i32_39 : i32
    scf.if %59 {
      %c3_i32_83 = arith.constant 3 : i32
      %133 = vector.broadcast %c3_i32_83 : i32 to vector<4x1xi32>
      %134 = arith.cmpi sgt, %31, %133 : vector<4x1xi32>
      %135 = vector.shape_cast %134 : vector<4x1xi1> to vector<4x1xi1>
      %136 = vector.broadcast %135 : vector<4x1xi1> to vector<4x32xi1>
      %c0_84 = arith.constant 0 : index
      %c0_85 = arith.constant 0 : index
      %c0_86 = arith.constant 0 : index
      %137 = vector.load %arg5[%c0_84, %c0_85, %c0_86] : memref<5x4x32xf32, #tpu.memory_space<vmem>>, vector<1x4x32xf32>
      %138 = vector.shape_cast %137 : vector<1x4x32xf32> to vector<4x32xf32>
      %c2_87 = arith.constant 2 : index
      %c0_88 = arith.constant 0 : index
      %c0_89 = arith.constant 0 : index
      %139 = vector.load %arg5[%c2_87, %c0_88, %c0_89] : memref<5x4x32xf32, #tpu.memory_space<vmem>>, vector<1x4x32xf32>
      %140 = vector.shape_cast %139 : vector<1x4x32xf32> to vector<4x32xf32>
      %141 = vector.extract_strided_slice %26 {offsets = [12, 0], sizes = [4, 128], strides = [1, 1]} : vector<32x128xf32> to vector<4x128xf32>
      %cst_90 = arith.constant dense<0.000000e+00> : vector<4x128xf32>
      %142 = tpu.matmul %138, %27, %cst_90 {dimension_numbers = #tpu.dot_dimension_numbers<[1], [0], [0], [1], [0, 0, 1, 1], [], []>} : vector<4x32xf32>, vector<32x128xf32>, vector<4x128xf32> -> vector<4x128xf32>
      %143 = arith.addf %141, %142 : vector<4x128xf32>
      %144 = arith.negf %143 : vector<4x128xf32>
      %145 = math.exp %144 : vector<4x128xf32>
      %cst_91 = arith.constant 1.000000e+00 : f32
      %146 = vector.broadcast %cst_91 : f32 to vector<4x128xf32>
      %147 = arith.addf %146, %145 : vector<4x128xf32>
      %148 = arith.divf %146, %147 : vector<4x128xf32>
      %149 = math.tanh %143 : vector<4x128xf32>
      %150 = vector.extract_strided_slice %148 {offsets = [0, 0], sizes = [4, 32], strides = [1, 1]} : vector<4x128xf32> to vector<4x32xf32>
      %151 = vector.extract_strided_slice %148 {offsets = [0, 32], sizes = [4, 32], strides = [1, 1]} : vector<4x128xf32> to vector<4x32xf32>
      %152 = vector.extract_strided_slice %148 {offsets = [0, 96], sizes = [4, 32], strides = [1, 1]} : vector<4x128xf32> to vector<4x32xf32>
      %153 = vector.extract_strided_slice %149 {offsets = [0, 64], sizes = [4, 32], strides = [1, 1]} : vector<4x128xf32> to vector<4x32xf32>
      %154 = arith.mulf %151, %140 : vector<4x32xf32>
      %155 = arith.mulf %150, %153 : vector<4x32xf32>
      %156 = arith.addf %154, %155 : vector<4x32xf32>
      %157 = math.tanh %156 : vector<4x32xf32>
      %158 = arith.mulf %152, %157 : vector<4x32xf32>
      %159 = arith.select %136, %158, %138 : vector<4x32xi1>, vector<4x32xf32>
      %c0_92 = arith.constant 0 : index
      %c0_93 = arith.constant 0 : index
      %c0_94 = arith.constant 0 : index
      %160 = vector.load %arg5[%c0_92, %c0_93, %c0_94] : memref<5x4x32xf32, #tpu.memory_space<vmem>>, vector<1x4x32xf32>
      %161 = vector.shape_cast %160 : vector<1x4x32xf32> to vector<4x32xf32>
      %162 = vector.shape_cast %159 : vector<4x32xf32> to vector<1x4x32xf32>
      tpu.vector_store %arg5[%c0_92, %c0_93, %c0_94], %162 {strides = array<i32>} : memref<5x4x32xf32, #tpu.memory_space<vmem>>, vector<1x4x32xf32>,
      %163 = arith.select %136, %156, %140 : vector<4x32xi1>, vector<4x32xf32>
      %c2_95 = arith.constant 2 : index
      %c0_96 = arith.constant 0 : index
      %c0_97 = arith.constant 0 : index
      %164 = vector.load %arg5[%c2_95, %c0_96, %c0_97] : memref<5x4x32xf32, #tpu.memory_space<vmem>>, vector<1x4x32xf32>
      %165 = vector.shape_cast %164 : vector<1x4x32xf32> to vector<4x32xf32>
      %166 = vector.shape_cast %163 : vector<4x32xf32> to vector<1x4x32xf32>
      tpu.vector_store %arg5[%c2_95, %c0_96, %c0_97], %166 {strides = array<i32>} : memref<5x4x32xf32, #tpu.memory_space<vmem>>, vector<1x4x32xf32>,
      %167 = arith.select %136, %158, %32 : vector<4x32xi1>, vector<4x32xf32>
      %c12 = arith.constant 12 : index
      %c0_98 = arith.constant 0 : index
      %168 = vector.load %arg6[%c12, %c0_98] : memref<32x32xf32, #tpu.memory_space<vmem>>, vector<4x32xf32>
      tpu.vector_store %arg6[%c12, %c0_98], %167 {strides = array<i32>} : memref<32x32xf32, #tpu.memory_space<vmem>>, vector<4x32xf32>,
    } else {
    }
    %c4_i32 = arith.constant 4 : i32
    %60 = arith.cmpi sgt, %0, %c4_i32 : i32
    %61 = arith.extui %60 : i1 to i32
    %c0_i32_40 = arith.constant 0 : i32
    %62 = arith.cmpi ne, %61, %c0_i32_40 : i32
    scf.if %62 {
      %c4_i32_83 = arith.constant 4 : i32
      %133 = vector.broadcast %c4_i32_83 : i32 to vector<4x1xi32>
      %134 = arith.cmpi sgt, %31, %133 : vector<4x1xi32>
      %135 = vector.shape_cast %134 : vector<4x1xi1> to vector<4x1xi1>
      %136 = vector.broadcast %135 : vector<4x1xi1> to vector<4x32xi1>
      %c0_84 = arith.constant 0 : index
      %c0_85 = arith.constant 0 : index
      %c0_86 = arith.constant 0 : index
      %137 = vector.load %arg5[%c0_84, %c0_85, %c0_86] : memref<5x4x32xf32, #tpu.memory_space<vmem>>, vector<1x4x32xf32>
      %138 = vector.shape_cast %137 : vector<1x4x32xf32> to vector<4x32xf32>
      %c2_87 = arith.constant 2 : index
      %c0_88 = arith.constant 0 : index
      %c0_89 = arith.constant 0 : index
      %139 = vector.load %arg5[%c2_87, %c0_88, %c0_89] : memref<5x4x32xf32, #tpu.memory_space<vmem>>, vector<1x4x32xf32>
      %140 = vector.shape_cast %139 : vector<1x4x32xf32> to vector<4x32xf32>
      %141 = vector.extract_strided_slice %26 {offsets = [16, 0], sizes = [4, 128], strides = [1, 1]} : vector<32x128xf32> to vector<4x128xf32>
      %cst_90 = arith.constant dense<0.000000e+00> : vector<4x128xf32>
      %142 = tpu.matmul %138, %27, %cst_90 {dimension_numbers = #tpu.dot_dimension_numbers<[1], [0], [0], [1], [0, 0, 1, 1], [], []>} : vector<4x32xf32>, vector<32x128xf32>, vector<4x128xf32> -> vector<4x128xf32>
      %143 = arith.addf %141, %142 : vector<4x128xf32>
      %144 = arith.negf %143 : vector<4x128xf32>
      %145 = math.exp %144 : vector<4x128xf32>
      %cst_91 = arith.constant 1.000000e+00 : f32
      %146 = vector.broadcast %cst_91 : f32 to vector<4x128xf32>
      %147 = arith.addf %146, %145 : vector<4x128xf32>
      %148 = arith.divf %146, %147 : vector<4x128xf32>
      %149 = math.tanh %143 : vector<4x128xf32>
      %150 = vector.extract_strided_slice %148 {offsets = [0, 0], sizes = [4, 32], strides = [1, 1]} : vector<4x128xf32> to vector<4x32xf32>
      %151 = vector.extract_strided_slice %148 {offsets = [0, 32], sizes = [4, 32], strides = [1, 1]} : vector<4x128xf32> to vector<4x32xf32>
      %152 = vector.extract_strided_slice %148 {offsets = [0, 96], sizes = [4, 32], strides = [1, 1]} : vector<4x128xf32> to vector<4x32xf32>
      %153 = vector.extract_strided_slice %149 {offsets = [0, 64], sizes = [4, 32], strides = [1, 1]} : vector<4x128xf32> to vector<4x32xf32>
      %154 = arith.mulf %151, %140 : vector<4x32xf32>
      %155 = arith.mulf %150, %153 : vector<4x32xf32>
      %156 = arith.addf %154, %155 : vector<4x32xf32>
      %157 = math.tanh %156 : vector<4x32xf32>
      %158 = arith.mulf %152, %157 : vector<4x32xf32>
      %159 = arith.select %136, %158, %138 : vector<4x32xi1>, vector<4x32xf32>
      %c0_92 = arith.constant 0 : index
      %c0_93 = arith.constant 0 : index
      %c0_94 = arith.constant 0 : index
      %160 = vector.load %arg5[%c0_92, %c0_93, %c0_94] : memref<5x4x32xf32, #tpu.memory_space<vmem>>, vector<1x4x32xf32>
      %161 = vector.shape_cast %160 : vector<1x4x32xf32> to vector<4x32xf32>
      %162 = vector.shape_cast %159 : vector<4x32xf32> to vector<1x4x32xf32>
      tpu.vector_store %arg5[%c0_92, %c0_93, %c0_94], %162 {strides = array<i32>} : memref<5x4x32xf32, #tpu.memory_space<vmem>>, vector<1x4x32xf32>,
      %163 = arith.select %136, %156, %140 : vector<4x32xi1>, vector<4x32xf32>
      %c2_95 = arith.constant 2 : index
      %c0_96 = arith.constant 0 : index
      %c0_97 = arith.constant 0 : index
      %164 = vector.load %arg5[%c2_95, %c0_96, %c0_97] : memref<5x4x32xf32, #tpu.memory_space<vmem>>, vector<1x4x32xf32>
      %165 = vector.shape_cast %164 : vector<1x4x32xf32> to vector<4x32xf32>
      %166 = vector.shape_cast %163 : vector<4x32xf32> to vector<1x4x32xf32>
      tpu.vector_store %arg5[%c2_95, %c0_96, %c0_97], %166 {strides = array<i32>} : memref<5x4x32xf32, #tpu.memory_space<vmem>>, vector<1x4x32xf32>,
      %167 = arith.select %136, %158, %32 : vector<4x32xi1>, vector<4x32xf32>
      %c16 = arith.constant 16 : index
      %c0_98 = arith.constant 0 : index
      %168 = vector.load %arg6[%c16, %c0_98] : memref<32x32xf32, #tpu.memory_space<vmem>>, vector<4x32xf32>
      tpu.vector_store %arg6[%c16, %c0_98], %167 {strides = array<i32>} : memref<32x32xf32, #tpu.memory_space<vmem>>, vector<4x32xf32>,
    } else {
    }
    %c5_i32 = arith.constant 5 : i32
    %63 = arith.cmpi sgt, %0, %c5_i32 : i32
    %64 = arith.extui %63 : i1 to i32
    %c0_i32_41 = arith.constant 0 : i32
    %65 = arith.cmpi ne, %64, %c0_i32_41 : i32
    scf.if %65 {
      %c5_i32_83 = arith.constant 5 : i32
      %133 = vector.broadcast %c5_i32_83 : i32 to vector<4x1xi32>
      %134 = arith.cmpi sgt, %31, %133 : vector<4x1xi32>
      %135 = vector.shape_cast %134 : vector<4x1xi1> to vector<4x1xi1>
      %136 = vector.broadcast %135 : vector<4x1xi1> to vector<4x32xi1>
      %c0_84 = arith.constant 0 : index
      %c0_85 = arith.constant 0 : index
      %c0_86 = arith.constant 0 : index
      %137 = vector.load %arg5[%c0_84, %c0_85, %c0_86] : memref<5x4x32xf32, #tpu.memory_space<vmem>>, vector<1x4x32xf32>
      %138 = vector.shape_cast %137 : vector<1x4x32xf32> to vector<4x32xf32>
      %c2_87 = arith.constant 2 : index
      %c0_88 = arith.constant 0 : index
      %c0_89 = arith.constant 0 : index
      %139 = vector.load %arg5[%c2_87, %c0_88, %c0_89] : memref<5x4x32xf32, #tpu.memory_space<vmem>>, vector<1x4x32xf32>
      %140 = vector.shape_cast %139 : vector<1x4x32xf32> to vector<4x32xf32>
      %141 = vector.extract_strided_slice %26 {offsets = [20, 0], sizes = [4, 128], strides = [1, 1]} : vector<32x128xf32> to vector<4x128xf32>
      %cst_90 = arith.constant dense<0.000000e+00> : vector<4x128xf32>
      %142 = tpu.matmul %138, %27, %cst_90 {dimension_numbers = #tpu.dot_dimension_numbers<[1], [0], [0], [1], [0, 0, 1, 1], [], []>} : vector<4x32xf32>, vector<32x128xf32>, vector<4x128xf32> -> vector<4x128xf32>
      %143 = arith.addf %141, %142 : vector<4x128xf32>
      %144 = arith.negf %143 : vector<4x128xf32>
      %145 = math.exp %144 : vector<4x128xf32>
      %cst_91 = arith.constant 1.000000e+00 : f32
      %146 = vector.broadcast %cst_91 : f32 to vector<4x128xf32>
      %147 = arith.addf %146, %145 : vector<4x128xf32>
      %148 = arith.divf %146, %147 : vector<4x128xf32>
      %149 = math.tanh %143 : vector<4x128xf32>
      %150 = vector.extract_strided_slice %148 {offsets = [0, 0], sizes = [4, 32], strides = [1, 1]} : vector<4x128xf32> to vector<4x32xf32>
      %151 = vector.extract_strided_slice %148 {offsets = [0, 32], sizes = [4, 32], strides = [1, 1]} : vector<4x128xf32> to vector<4x32xf32>
      %152 = vector.extract_strided_slice %148 {offsets = [0, 96], sizes = [4, 32], strides = [1, 1]} : vector<4x128xf32> to vector<4x32xf32>
      %153 = vector.extract_strided_slice %149 {offsets = [0, 64], sizes = [4, 32], strides = [1, 1]} : vector<4x128xf32> to vector<4x32xf32>
      %154 = arith.mulf %151, %140 : vector<4x32xf32>
      %155 = arith.mulf %150, %153 : vector<4x32xf32>
      %156 = arith.addf %154, %155 : vector<4x32xf32>
      %157 = math.tanh %156 : vector<4x32xf32>
      %158 = arith.mulf %152, %157 : vector<4x32xf32>
      %159 = arith.select %136, %158, %138 : vector<4x32xi1>, vector<4x32xf32>
      %c0_92 = arith.constant 0 : index
      %c0_93 = arith.constant 0 : index
      %c0_94 = arith.constant 0 : index
      %160 = vector.load %arg5[%c0_92, %c0_93, %c0_94] : memref<5x4x32xf32, #tpu.memory_space<vmem>>, vector<1x4x32xf32>
      %161 = vector.shape_cast %160 : vector<1x4x32xf32> to vector<4x32xf32>
      %162 = vector.shape_cast %159 : vector<4x32xf32> to vector<1x4x32xf32>
      tpu.vector_store %arg5[%c0_92, %c0_93, %c0_94], %162 {strides = array<i32>} : memref<5x4x32xf32, #tpu.memory_space<vmem>>, vector<1x4x32xf32>,
      %163 = arith.select %136, %156, %140 : vector<4x32xi1>, vector<4x32xf32>
      %c2_95 = arith.constant 2 : index
      %c0_96 = arith.constant 0 : index
      %c0_97 = arith.constant 0 : index
      %164 = vector.load %arg5[%c2_95, %c0_96, %c0_97] : memref<5x4x32xf32, #tpu.memory_space<vmem>>, vector<1x4x32xf32>
      %165 = vector.shape_cast %164 : vector<1x4x32xf32> to vector<4x32xf32>
      %166 = vector.shape_cast %163 : vector<4x32xf32> to vector<1x4x32xf32>
      tpu.vector_store %arg5[%c2_95, %c0_96, %c0_97], %166 {strides = array<i32>} : memref<5x4x32xf32, #tpu.memory_space<vmem>>, vector<1x4x32xf32>,
      %167 = arith.select %136, %158, %32 : vector<4x32xi1>, vector<4x32xf32>
      %c20 = arith.constant 20 : index
      %c0_98 = arith.constant 0 : index
      %168 = vector.load %arg6[%c20, %c0_98] : memref<32x32xf32, #tpu.memory_space<vmem>>, vector<4x32xf32>
      tpu.vector_store %arg6[%c20, %c0_98], %167 {strides = array<i32>} : memref<32x32xf32, #tpu.memory_space<vmem>>, vector<4x32xf32>,
    } else {
    }
    %c6_i32 = arith.constant 6 : i32
    %66 = arith.cmpi sgt, %0, %c6_i32 : i32
    %67 = arith.extui %66 : i1 to i32
    %c0_i32_42 = arith.constant 0 : i32
    %68 = arith.cmpi ne, %67, %c0_i32_42 : i32
    scf.if %68 {
      %c6_i32_83 = arith.constant 6 : i32
      %133 = vector.broadcast %c6_i32_83 : i32 to vector<4x1xi32>
      %134 = arith.cmpi sgt, %31, %133 : vector<4x1xi32>
      %135 = vector.shape_cast %134 : vector<4x1xi1> to vector<4x1xi1>
      %136 = vector.broadcast %135 : vector<4x1xi1> to vector<4x32xi1>
      %c0_84 = arith.constant 0 : index
      %c0_85 = arith.constant 0 : index
      %c0_86 = arith.constant 0 : index
      %137 = vector.load %arg5[%c0_84, %c0_85, %c0_86] : memref<5x4x32xf32, #tpu.memory_space<vmem>>, vector<1x4x32xf32>
      %138 = vector.shape_cast %137 : vector<1x4x32xf32> to vector<4x32xf32>
      %c2_87 = arith.constant 2 : index
      %c0_88 = arith.constant 0 : index
      %c0_89 = arith.constant 0 : index
      %139 = vector.load %arg5[%c2_87, %c0_88, %c0_89] : memref<5x4x32xf32, #tpu.memory_space<vmem>>, vector<1x4x32xf32>
      %140 = vector.shape_cast %139 : vector<1x4x32xf32> to vector<4x32xf32>
      %141 = vector.extract_strided_slice %26 {offsets = [24, 0], sizes = [4, 128], strides = [1, 1]} : vector<32x128xf32> to vector<4x128xf32>
      %cst_90 = arith.constant dense<0.000000e+00> : vector<4x128xf32>
      %142 = tpu.matmul %138, %27, %cst_90 {dimension_numbers = #tpu.dot_dimension_numbers<[1], [0], [0], [1], [0, 0, 1, 1], [], []>} : vector<4x32xf32>, vector<32x128xf32>, vector<4x128xf32> -> vector<4x128xf32>
      %143 = arith.addf %141, %142 : vector<4x128xf32>
      %144 = arith.negf %143 : vector<4x128xf32>
      %145 = math.exp %144 : vector<4x128xf32>
      %cst_91 = arith.constant 1.000000e+00 : f32
      %146 = vector.broadcast %cst_91 : f32 to vector<4x128xf32>
      %147 = arith.addf %146, %145 : vector<4x128xf32>
      %148 = arith.divf %146, %147 : vector<4x128xf32>
      %149 = math.tanh %143 : vector<4x128xf32>
      %150 = vector.extract_strided_slice %148 {offsets = [0, 0], sizes = [4, 32], strides = [1, 1]} : vector<4x128xf32> to vector<4x32xf32>
      %151 = vector.extract_strided_slice %148 {offsets = [0, 32], sizes = [4, 32], strides = [1, 1]} : vector<4x128xf32> to vector<4x32xf32>
      %152 = vector.extract_strided_slice %148 {offsets = [0, 96], sizes = [4, 32], strides = [1, 1]} : vector<4x128xf32> to vector<4x32xf32>
      %153 = vector.extract_strided_slice %149 {offsets = [0, 64], sizes = [4, 32], strides = [1, 1]} : vector<4x128xf32> to vector<4x32xf32>
      %154 = arith.mulf %151, %140 : vector<4x32xf32>
      %155 = arith.mulf %150, %153 : vector<4x32xf32>
      %156 = arith.addf %154, %155 : vector<4x32xf32>
      %157 = math.tanh %156 : vector<4x32xf32>
      %158 = arith.mulf %152, %157 : vector<4x32xf32>
      %159 = arith.select %136, %158, %138 : vector<4x32xi1>, vector<4x32xf32>
      %c0_92 = arith.constant 0 : index
      %c0_93 = arith.constant 0 : index
      %c0_94 = arith.constant 0 : index
      %160 = vector.load %arg5[%c0_92, %c0_93, %c0_94] : memref<5x4x32xf32, #tpu.memory_space<vmem>>, vector<1x4x32xf32>
      %161 = vector.shape_cast %160 : vector<1x4x32xf32> to vector<4x32xf32>
      %162 = vector.shape_cast %159 : vector<4x32xf32> to vector<1x4x32xf32>
      tpu.vector_store %arg5[%c0_92, %c0_93, %c0_94], %162 {strides = array<i32>} : memref<5x4x32xf32, #tpu.memory_space<vmem>>, vector<1x4x32xf32>,
      %163 = arith.select %136, %156, %140 : vector<4x32xi1>, vector<4x32xf32>
      %c2_95 = arith.constant 2 : index
      %c0_96 = arith.constant 0 : index
      %c0_97 = arith.constant 0 : index
      %164 = vector.load %arg5[%c2_95, %c0_96, %c0_97] : memref<5x4x32xf32, #tpu.memory_space<vmem>>, vector<1x4x32xf32>
      %165 = vector.shape_cast %164 : vector<1x4x32xf32> to vector<4x32xf32>
      %166 = vector.shape_cast %163 : vector<4x32xf32> to vector<1x4x32xf32>
      tpu.vector_store %arg5[%c2_95, %c0_96, %c0_97], %166 {strides = array<i32>} : memref<5x4x32xf32, #tpu.memory_space<vmem>>, vector<1x4x32xf32>,
      %167 = arith.select %136, %158, %32 : vector<4x32xi1>, vector<4x32xf32>
      %c24 = arith.constant 24 : index
      %c0_98 = arith.constant 0 : index
      %168 = vector.load %arg6[%c24, %c0_98] : memref<32x32xf32, #tpu.memory_space<vmem>>, vector<4x32xf32>
      tpu.vector_store %arg6[%c24, %c0_98], %167 {strides = array<i32>} : memref<32x32xf32, #tpu.memory_space<vmem>>, vector<4x32xf32>,
    } else {
    }
    %c7_i32 = arith.constant 7 : i32
    %69 = arith.cmpi sgt, %0, %c7_i32 : i32
    %70 = arith.extui %69 : i1 to i32
    %c0_i32_43 = arith.constant 0 : i32
    %71 = arith.cmpi ne, %70, %c0_i32_43 : i32
    scf.if %71 {
      %c7_i32_83 = arith.constant 7 : i32
      %133 = vector.broadcast %c7_i32_83 : i32 to vector<4x1xi32>
      %134 = arith.cmpi sgt, %31, %133 : vector<4x1xi32>
      %135 = vector.shape_cast %134 : vector<4x1xi1> to vector<4x1xi1>
      %136 = vector.broadcast %135 : vector<4x1xi1> to vector<4x32xi1>
      %c0_84 = arith.constant 0 : index
      %c0_85 = arith.constant 0 : index
      %c0_86 = arith.constant 0 : index
      %137 = vector.load %arg5[%c0_84, %c0_85, %c0_86] : memref<5x4x32xf32, #tpu.memory_space<vmem>>, vector<1x4x32xf32>
      %138 = vector.shape_cast %137 : vector<1x4x32xf32> to vector<4x32xf32>
      %c2_87 = arith.constant 2 : index
      %c0_88 = arith.constant 0 : index
      %c0_89 = arith.constant 0 : index
      %139 = vector.load %arg5[%c2_87, %c0_88, %c0_89] : memref<5x4x32xf32, #tpu.memory_space<vmem>>, vector<1x4x32xf32>
      %140 = vector.shape_cast %139 : vector<1x4x32xf32> to vector<4x32xf32>
      %141 = vector.extract_strided_slice %26 {offsets = [28, 0], sizes = [4, 128], strides = [1, 1]} : vector<32x128xf32> to vector<4x128xf32>
      %cst_90 = arith.constant dense<0.000000e+00> : vector<4x128xf32>
      %142 = tpu.matmul %138, %27, %cst_90 {dimension_numbers = #tpu.dot_dimension_numbers<[1], [0], [0], [1], [0, 0, 1, 1], [], []>} : vector<4x32xf32>, vector<32x128xf32>, vector<4x128xf32> -> vector<4x128xf32>
      %143 = arith.addf %141, %142 : vector<4x128xf32>
      %144 = arith.negf %143 : vector<4x128xf32>
      %145 = math.exp %144 : vector<4x128xf32>
      %cst_91 = arith.constant 1.000000e+00 : f32
      %146 = vector.broadcast %cst_91 : f32 to vector<4x128xf32>
      %147 = arith.addf %146, %145 : vector<4x128xf32>
      %148 = arith.divf %146, %147 : vector<4x128xf32>
      %149 = math.tanh %143 : vector<4x128xf32>
      %150 = vector.extract_strided_slice %148 {offsets = [0, 0], sizes = [4, 32], strides = [1, 1]} : vector<4x128xf32> to vector<4x32xf32>
      %151 = vector.extract_strided_slice %148 {offsets = [0, 32], sizes = [4, 32], strides = [1, 1]} : vector<4x128xf32> to vector<4x32xf32>
      %152 = vector.extract_strided_slice %148 {offsets = [0, 96], sizes = [4, 32], strides = [1, 1]} : vector<4x128xf32> to vector<4x32xf32>
      %153 = vector.extract_strided_slice %149 {offsets = [0, 64], sizes = [4, 32], strides = [1, 1]} : vector<4x128xf32> to vector<4x32xf32>
      %154 = arith.mulf %151, %140 : vector<4x32xf32>
      %155 = arith.mulf %150, %153 : vector<4x32xf32>
      %156 = arith.addf %154, %155 : vector<4x32xf32>
      %157 = math.tanh %156 : vector<4x32xf32>
      %158 = arith.mulf %152, %157 : vector<4x32xf32>
      %159 = arith.select %136, %158, %138 : vector<4x32xi1>, vector<4x32xf32>
      %c0_92 = arith.constant 0 : index
      %c0_93 = arith.constant 0 : index
      %c0_94 = arith.constant 0 : index
      %160 = vector.load %arg5[%c0_92, %c0_93, %c0_94] : memref<5x4x32xf32, #tpu.memory_space<vmem>>, vector<1x4x32xf32>
      %161 = vector.shape_cast %160 : vector<1x4x32xf32> to vector<4x32xf32>
      %162 = vector.shape_cast %159 : vector<4x32xf32> to vector<1x4x32xf32>
      tpu.vector_store %arg5[%c0_92, %c0_93, %c0_94], %162 {strides = array<i32>} : memref<5x4x32xf32, #tpu.memory_space<vmem>>, vector<1x4x32xf32>,
      %163 = arith.select %136, %156, %140 : vector<4x32xi1>, vector<4x32xf32>
      %c2_95 = arith.constant 2 : index
      %c0_96 = arith.constant 0 : index
      %c0_97 = arith.constant 0 : index
      %164 = vector.load %arg5[%c2_95, %c0_96, %c0_97] : memref<5x4x32xf32, #tpu.memory_space<vmem>>, vector<1x4x32xf32>
      %165 = vector.shape_cast %164 : vector<1x4x32xf32> to vector<4x32xf32>
      %166 = vector.shape_cast %163 : vector<4x32xf32> to vector<1x4x32xf32>
      tpu.vector_store %arg5[%c2_95, %c0_96, %c0_97], %166 {strides = array<i32>} : memref<5x4x32xf32, #tpu.memory_space<vmem>>, vector<1x4x32xf32>,
      %167 = arith.select %136, %158, %32 : vector<4x32xi1>, vector<4x32xf32>
      %c28 = arith.constant 28 : index
      %c0_98 = arith.constant 0 : index
      %168 = vector.load %arg6[%c28, %c0_98] : memref<32x32xf32, #tpu.memory_space<vmem>>, vector<4x32xf32>
      tpu.vector_store %arg6[%c28, %c0_98], %167 {strides = array<i32>} : memref<32x32xf32, #tpu.memory_space<vmem>>, vector<4x32xf32>,
    } else {
    }
    %c0_44 = arith.constant 0 : index
    %c0_45 = arith.constant 0 : index
    %72 = vector.load %arg6[%c0_44, %c0_45] : memref<32x32xf32, #tpu.memory_space<vmem>>, vector<32x32xf32>
    %cst_46 = arith.constant dense<0.000000e+00> : vector<32x128xf32>
    %73 = tpu.matmul %72, %28, %cst_46 {dimension_numbers = #tpu.dot_dimension_numbers<[1], [0], [0], [1], [0, 0, 1, 1], [], []>} : vector<32x32xf32>, vector<32x128xf32>, vector<32x128xf32> -> vector<32x128xf32>
    %74 = vector.broadcast %30 : vector<1x128xf32> to vector<32x128xf32>
    %75 = arith.addf %73, %74 : vector<32x128xf32>
    %c0_i32_47 = arith.constant 0 : i32
    %76 = arith.cmpi sgt, %0, %c0_i32_47 : i32
    %77 = arith.extui %76 : i1 to i32
    %c0_i32_48 = arith.constant 0 : i32
    %78 = arith.cmpi ne, %77, %c0_i32_48 : i32
    scf.if %78 {
      %c0_i32_83 = arith.constant 0 : i32
      %133 = vector.broadcast %c0_i32_83 : i32 to vector<4x1xi32>
      %134 = arith.cmpi sgt, %31, %133 : vector<4x1xi32>
      %135 = vector.shape_cast %134 : vector<4x1xi1> to vector<4x1xi1>
      %136 = vector.broadcast %135 : vector<4x1xi1> to vector<4x32xi1>
      %c1_84 = arith.constant 1 : index
      %c0_85 = arith.constant 0 : index
      %c0_86 = arith.constant 0 : index
      %137 = vector.load %arg5[%c1_84, %c0_85, %c0_86] : memref<5x4x32xf32, #tpu.memory_space<vmem>>, vector<1x4x32xf32>
      %138 = vector.shape_cast %137 : vector<1x4x32xf32> to vector<4x32xf32>
      %c3_87 = arith.constant 3 : index
      %c0_88 = arith.constant 0 : index
      %c0_89 = arith.constant 0 : index
      %139 = vector.load %arg5[%c3_87, %c0_88, %c0_89] : memref<5x4x32xf32, #tpu.memory_space<vmem>>, vector<1x4x32xf32>
      %140 = vector.shape_cast %139 : vector<1x4x32xf32> to vector<4x32xf32>
      %141 = vector.extract_strided_slice %75 {offsets = [0, 0], sizes = [4, 128], strides = [1, 1]} : vector<32x128xf32> to vector<4x128xf32>
      %cst_90 = arith.constant dense<0.000000e+00> : vector<4x128xf32>
      %142 = tpu.matmul %138, %29, %cst_90 {dimension_numbers = #tpu.dot_dimension_numbers<[1], [0], [0], [1], [0, 0, 1, 1], [], []>} : vector<4x32xf32>, vector<32x128xf32>, vector<4x128xf32> -> vector<4x128xf32>
      %143 = arith.addf %141, %142 : vector<4x128xf32>
      %144 = arith.negf %143 : vector<4x128xf32>
      %145 = math.exp %144 : vector<4x128xf32>
      %cst_91 = arith.constant 1.000000e+00 : f32
      %146 = vector.broadcast %cst_91 : f32 to vector<4x128xf32>
      %147 = arith.addf %146, %145 : vector<4x128xf32>
      %148 = arith.divf %146, %147 : vector<4x128xf32>
      %149 = math.tanh %143 : vector<4x128xf32>
      %150 = vector.extract_strided_slice %148 {offsets = [0, 0], sizes = [4, 32], strides = [1, 1]} : vector<4x128xf32> to vector<4x32xf32>
      %151 = vector.extract_strided_slice %148 {offsets = [0, 32], sizes = [4, 32], strides = [1, 1]} : vector<4x128xf32> to vector<4x32xf32>
      %152 = vector.extract_strided_slice %148 {offsets = [0, 96], sizes = [4, 32], strides = [1, 1]} : vector<4x128xf32> to vector<4x32xf32>
      %153 = vector.extract_strided_slice %149 {offsets = [0, 64], sizes = [4, 32], strides = [1, 1]} : vector<4x128xf32> to vector<4x32xf32>
      %154 = arith.mulf %151, %140 : vector<4x32xf32>
      %155 = arith.mulf %150, %153 : vector<4x32xf32>
      %156 = arith.addf %154, %155 : vector<4x32xf32>
      %157 = math.tanh %156 : vector<4x32xf32>
      %158 = arith.mulf %152, %157 : vector<4x32xf32>
      %159 = arith.select %136, %158, %138 : vector<4x32xi1>, vector<4x32xf32>
      %c1_92 = arith.constant 1 : index
      %c0_93 = arith.constant 0 : index
      %c0_94 = arith.constant 0 : index
      %160 = vector.load %arg5[%c1_92, %c0_93, %c0_94] : memref<5x4x32xf32, #tpu.memory_space<vmem>>, vector<1x4x32xf32>
      %161 = vector.shape_cast %160 : vector<1x4x32xf32> to vector<4x32xf32>
      %162 = vector.shape_cast %159 : vector<4x32xf32> to vector<1x4x32xf32>
      tpu.vector_store %arg5[%c1_92, %c0_93, %c0_94], %162 {strides = array<i32>} : memref<5x4x32xf32, #tpu.memory_space<vmem>>, vector<1x4x32xf32>,
      %163 = arith.select %136, %156, %140 : vector<4x32xi1>, vector<4x32xf32>
      %c3_95 = arith.constant 3 : index
      %c0_96 = arith.constant 0 : index
      %c0_97 = arith.constant 0 : index
      %164 = vector.load %arg5[%c3_95, %c0_96, %c0_97] : memref<5x4x32xf32, #tpu.memory_space<vmem>>, vector<1x4x32xf32>
      %165 = vector.shape_cast %164 : vector<1x4x32xf32> to vector<4x32xf32>
      %166 = vector.shape_cast %163 : vector<4x32xf32> to vector<1x4x32xf32>
      tpu.vector_store %arg5[%c3_95, %c0_96, %c0_97], %166 {strides = array<i32>} : memref<5x4x32xf32, #tpu.memory_space<vmem>>, vector<1x4x32xf32>,
      %c1_i32_98 = arith.constant 1 : i32
      %167 = arith.cmpi eq, %0, %c1_i32_98 : i32
      %168 = arith.extui %167 : i1 to i32
      %c0_i32_99 = arith.constant 0 : i32
      %169 = arith.cmpi ne, %168, %c0_i32_99 : i32
      scf.if %169 {
        %170 = arith.select %136, %158, %32 : vector<4x32xi1>, vector<4x32xf32>
        %c0_100 = arith.constant 0 : index
        %c0_101 = arith.constant 0 : index
        %171 = vector.load %arg7[%c0_100, %c0_101] : memref<4x32xf32, #tpu.memory_space<vmem>>, vector<4x32xf32>
        tpu.vector_store %arg7[%c0_100, %c0_101], %170 {strides = array<i32>} : memref<4x32xf32, #tpu.memory_space<vmem>>, vector<4x32xf32>,
      } else {
      }
    } else {
    }
    %c1_i32_49 = arith.constant 1 : i32
    %79 = arith.cmpi sgt, %0, %c1_i32_49 : i32
    %80 = arith.extui %79 : i1 to i32
    %c0_i32_50 = arith.constant 0 : i32
    %81 = arith.cmpi ne, %80, %c0_i32_50 : i32
    scf.if %81 {
      %c1_i32_83 = arith.constant 1 : i32
      %133 = vector.broadcast %c1_i32_83 : i32 to vector<4x1xi32>
      %134 = arith.cmpi sgt, %31, %133 : vector<4x1xi32>
      %135 = vector.shape_cast %134 : vector<4x1xi1> to vector<4x1xi1>
      %136 = vector.broadcast %135 : vector<4x1xi1> to vector<4x32xi1>
      %c1_84 = arith.constant 1 : index
      %c0_85 = arith.constant 0 : index
      %c0_86 = arith.constant 0 : index
      %137 = vector.load %arg5[%c1_84, %c0_85, %c0_86] : memref<5x4x32xf32, #tpu.memory_space<vmem>>, vector<1x4x32xf32>
      %138 = vector.shape_cast %137 : vector<1x4x32xf32> to vector<4x32xf32>
      %c3_87 = arith.constant 3 : index
      %c0_88 = arith.constant 0 : index
      %c0_89 = arith.constant 0 : index
      %139 = vector.load %arg5[%c3_87, %c0_88, %c0_89] : memref<5x4x32xf32, #tpu.memory_space<vmem>>, vector<1x4x32xf32>
      %140 = vector.shape_cast %139 : vector<1x4x32xf32> to vector<4x32xf32>
      %141 = vector.extract_strided_slice %75 {offsets = [4, 0], sizes = [4, 128], strides = [1, 1]} : vector<32x128xf32> to vector<4x128xf32>
      %cst_90 = arith.constant dense<0.000000e+00> : vector<4x128xf32>
      %142 = tpu.matmul %138, %29, %cst_90 {dimension_numbers = #tpu.dot_dimension_numbers<[1], [0], [0], [1], [0, 0, 1, 1], [], []>} : vector<4x32xf32>, vector<32x128xf32>, vector<4x128xf32> -> vector<4x128xf32>
      %143 = arith.addf %141, %142 : vector<4x128xf32>
      %144 = arith.negf %143 : vector<4x128xf32>
      %145 = math.exp %144 : vector<4x128xf32>
      %cst_91 = arith.constant 1.000000e+00 : f32
      %146 = vector.broadcast %cst_91 : f32 to vector<4x128xf32>
      %147 = arith.addf %146, %145 : vector<4x128xf32>
      %148 = arith.divf %146, %147 : vector<4x128xf32>
      %149 = math.tanh %143 : vector<4x128xf32>
      %150 = vector.extract_strided_slice %148 {offsets = [0, 0], sizes = [4, 32], strides = [1, 1]} : vector<4x128xf32> to vector<4x32xf32>
      %151 = vector.extract_strided_slice %148 {offsets = [0, 32], sizes = [4, 32], strides = [1, 1]} : vector<4x128xf32> to vector<4x32xf32>
      %152 = vector.extract_strided_slice %148 {offsets = [0, 96], sizes = [4, 32], strides = [1, 1]} : vector<4x128xf32> to vector<4x32xf32>
      %153 = vector.extract_strided_slice %149 {offsets = [0, 64], sizes = [4, 32], strides = [1, 1]} : vector<4x128xf32> to vector<4x32xf32>
      %154 = arith.mulf %151, %140 : vector<4x32xf32>
      %155 = arith.mulf %150, %153 : vector<4x32xf32>
      %156 = arith.addf %154, %155 : vector<4x32xf32>
      %157 = math.tanh %156 : vector<4x32xf32>
      %158 = arith.mulf %152, %157 : vector<4x32xf32>
      %159 = arith.select %136, %158, %138 : vector<4x32xi1>, vector<4x32xf32>
      %c1_92 = arith.constant 1 : index
      %c0_93 = arith.constant 0 : index
      %c0_94 = arith.constant 0 : index
      %160 = vector.load %arg5[%c1_92, %c0_93, %c0_94] : memref<5x4x32xf32, #tpu.memory_space<vmem>>, vector<1x4x32xf32>
      %161 = vector.shape_cast %160 : vector<1x4x32xf32> to vector<4x32xf32>
      %162 = vector.shape_cast %159 : vector<4x32xf32> to vector<1x4x32xf32>
      tpu.vector_store %arg5[%c1_92, %c0_93, %c0_94], %162 {strides = array<i32>} : memref<5x4x32xf32, #tpu.memory_space<vmem>>, vector<1x4x32xf32>,
      %163 = arith.select %136, %156, %140 : vector<4x32xi1>, vector<4x32xf32>
      %c3_95 = arith.constant 3 : index
      %c0_96 = arith.constant 0 : index
      %c0_97 = arith.constant 0 : index
      %164 = vector.load %arg5[%c3_95, %c0_96, %c0_97] : memref<5x4x32xf32, #tpu.memory_space<vmem>>, vector<1x4x32xf32>
      %165 = vector.shape_cast %164 : vector<1x4x32xf32> to vector<4x32xf32>
      %166 = vector.shape_cast %163 : vector<4x32xf32> to vector<1x4x32xf32>
      tpu.vector_store %arg5[%c3_95, %c0_96, %c0_97], %166 {strides = array<i32>} : memref<5x4x32xf32, #tpu.memory_space<vmem>>, vector<1x4x32xf32>,
      %c2_i32_98 = arith.constant 2 : i32
      %167 = arith.cmpi eq, %0, %c2_i32_98 : i32
      %168 = arith.extui %167 : i1 to i32
      %c0_i32_99 = arith.constant 0 : i32
      %169 = arith.cmpi ne, %168, %c0_i32_99 : i32
      scf.if %169 {
        %170 = arith.select %136, %158, %32 : vector<4x32xi1>, vector<4x32xf32>
        %c0_100 = arith.constant 0 : index
        %c0_101 = arith.constant 0 : index
        %171 = vector.load %arg7[%c0_100, %c0_101] : memref<4x32xf32, #tpu.memory_space<vmem>>, vector<4x32xf32>
        tpu.vector_store %arg7[%c0_100, %c0_101], %170 {strides = array<i32>} : memref<4x32xf32, #tpu.memory_space<vmem>>, vector<4x32xf32>,
      } else {
      }
    } else {
    }
    %c2_i32_51 = arith.constant 2 : i32
    %82 = arith.cmpi sgt, %0, %c2_i32_51 : i32
    %83 = arith.extui %82 : i1 to i32
    %c0_i32_52 = arith.constant 0 : i32
    %84 = arith.cmpi ne, %83, %c0_i32_52 : i32
    scf.if %84 {
      %c2_i32_83 = arith.constant 2 : i32
      %133 = vector.broadcast %c2_i32_83 : i32 to vector<4x1xi32>
      %134 = arith.cmpi sgt, %31, %133 : vector<4x1xi32>
      %135 = vector.shape_cast %134 : vector<4x1xi1> to vector<4x1xi1>
      %136 = vector.broadcast %135 : vector<4x1xi1> to vector<4x32xi1>
      %c1_84 = arith.constant 1 : index
      %c0_85 = arith.constant 0 : index
      %c0_86 = arith.constant 0 : index
      %137 = vector.load %arg5[%c1_84, %c0_85, %c0_86] : memref<5x4x32xf32, #tpu.memory_space<vmem>>, vector<1x4x32xf32>
      %138 = vector.shape_cast %137 : vector<1x4x32xf32> to vector<4x32xf32>
      %c3_87 = arith.constant 3 : index
      %c0_88 = arith.constant 0 : index
      %c0_89 = arith.constant 0 : index
      %139 = vector.load %arg5[%c3_87, %c0_88, %c0_89] : memref<5x4x32xf32, #tpu.memory_space<vmem>>, vector<1x4x32xf32>
      %140 = vector.shape_cast %139 : vector<1x4x32xf32> to vector<4x32xf32>
      %141 = vector.extract_strided_slice %75 {offsets = [8, 0], sizes = [4, 128], strides = [1, 1]} : vector<32x128xf32> to vector<4x128xf32>
      %cst_90 = arith.constant dense<0.000000e+00> : vector<4x128xf32>
      %142 = tpu.matmul %138, %29, %cst_90 {dimension_numbers = #tpu.dot_dimension_numbers<[1], [0], [0], [1], [0, 0, 1, 1], [], []>} : vector<4x32xf32>, vector<32x128xf32>, vector<4x128xf32> -> vector<4x128xf32>
      %143 = arith.addf %141, %142 : vector<4x128xf32>
      %144 = arith.negf %143 : vector<4x128xf32>
      %145 = math.exp %144 : vector<4x128xf32>
      %cst_91 = arith.constant 1.000000e+00 : f32
      %146 = vector.broadcast %cst_91 : f32 to vector<4x128xf32>
      %147 = arith.addf %146, %145 : vector<4x128xf32>
      %148 = arith.divf %146, %147 : vector<4x128xf32>
      %149 = math.tanh %143 : vector<4x128xf32>
      %150 = vector.extract_strided_slice %148 {offsets = [0, 0], sizes = [4, 32], strides = [1, 1]} : vector<4x128xf32> to vector<4x32xf32>
      %151 = vector.extract_strided_slice %148 {offsets = [0, 32], sizes = [4, 32], strides = [1, 1]} : vector<4x128xf32> to vector<4x32xf32>
      %152 = vector.extract_strided_slice %148 {offsets = [0, 96], sizes = [4, 32], strides = [1, 1]} : vector<4x128xf32> to vector<4x32xf32>
      %153 = vector.extract_strided_slice %149 {offsets = [0, 64], sizes = [4, 32], strides = [1, 1]} : vector<4x128xf32> to vector<4x32xf32>
      %154 = arith.mulf %151, %140 : vector<4x32xf32>
      %155 = arith.mulf %150, %153 : vector<4x32xf32>
      %156 = arith.addf %154, %155 : vector<4x32xf32>
      %157 = math.tanh %156 : vector<4x32xf32>
      %158 = arith.mulf %152, %157 : vector<4x32xf32>
      %159 = arith.select %136, %158, %138 : vector<4x32xi1>, vector<4x32xf32>
      %c1_92 = arith.constant 1 : index
      %c0_93 = arith.constant 0 : index
      %c0_94 = arith.constant 0 : index
      %160 = vector.load %arg5[%c1_92, %c0_93, %c0_94] : memref<5x4x32xf32, #tpu.memory_space<vmem>>, vector<1x4x32xf32>
      %161 = vector.shape_cast %160 : vector<1x4x32xf32> to vector<4x32xf32>
      %162 = vector.shape_cast %159 : vector<4x32xf32> to vector<1x4x32xf32>
      tpu.vector_store %arg5[%c1_92, %c0_93, %c0_94], %162 {strides = array<i32>} : memref<5x4x32xf32, #tpu.memory_space<vmem>>, vector<1x4x32xf32>,
      %163 = arith.select %136, %156, %140 : vector<4x32xi1>, vector<4x32xf32>
      %c3_95 = arith.constant 3 : index
      %c0_96 = arith.constant 0 : index
      %c0_97 = arith.constant 0 : index
      %164 = vector.load %arg5[%c3_95, %c0_96, %c0_97] : memref<5x4x32xf32, #tpu.memory_space<vmem>>, vector<1x4x32xf32>
      %165 = vector.shape_cast %164 : vector<1x4x32xf32> to vector<4x32xf32>
      %166 = vector.shape_cast %163 : vector<4x32xf32> to vector<1x4x32xf32>
      tpu.vector_store %arg5[%c3_95, %c0_96, %c0_97], %166 {strides = array<i32>} : memref<5x4x32xf32, #tpu.memory_space<vmem>>, vector<1x4x32xf32>,
      %c3_i32_98 = arith.constant 3 : i32
      %167 = arith.cmpi eq, %0, %c3_i32_98 : i32
      %168 = arith.extui %167 : i1 to i32
      %c0_i32_99 = arith.constant 0 : i32
      %169 = arith.cmpi ne, %168, %c0_i32_99 : i32
      scf.if %169 {
        %170 = arith.select %136, %158, %32 : vector<4x32xi1>, vector<4x32xf32>
        %c0_100 = arith.constant 0 : index
        %c0_101 = arith.constant 0 : index
        %171 = vector.load %arg7[%c0_100, %c0_101] : memref<4x32xf32, #tpu.memory_space<vmem>>, vector<4x32xf32>
        tpu.vector_store %arg7[%c0_100, %c0_101], %170 {strides = array<i32>} : memref<4x32xf32, #tpu.memory_space<vmem>>, vector<4x32xf32>,
      } else {
      }
    } else {
    }
    %c3_i32_53 = arith.constant 3 : i32
    %85 = arith.cmpi sgt, %0, %c3_i32_53 : i32
    %86 = arith.extui %85 : i1 to i32
    %c0_i32_54 = arith.constant 0 : i32
    %87 = arith.cmpi ne, %86, %c0_i32_54 : i32
    scf.if %87 {
      %c3_i32_83 = arith.constant 3 : i32
      %133 = vector.broadcast %c3_i32_83 : i32 to vector<4x1xi32>
      %134 = arith.cmpi sgt, %31, %133 : vector<4x1xi32>
      %135 = vector.shape_cast %134 : vector<4x1xi1> to vector<4x1xi1>
      %136 = vector.broadcast %135 : vector<4x1xi1> to vector<4x32xi1>
      %c1_84 = arith.constant 1 : index
      %c0_85 = arith.constant 0 : index
      %c0_86 = arith.constant 0 : index
      %137 = vector.load %arg5[%c1_84, %c0_85, %c0_86] : memref<5x4x32xf32, #tpu.memory_space<vmem>>, vector<1x4x32xf32>
      %138 = vector.shape_cast %137 : vector<1x4x32xf32> to vector<4x32xf32>
      %c3_87 = arith.constant 3 : index
      %c0_88 = arith.constant 0 : index
      %c0_89 = arith.constant 0 : index
      %139 = vector.load %arg5[%c3_87, %c0_88, %c0_89] : memref<5x4x32xf32, #tpu.memory_space<vmem>>, vector<1x4x32xf32>
      %140 = vector.shape_cast %139 : vector<1x4x32xf32> to vector<4x32xf32>
      %141 = vector.extract_strided_slice %75 {offsets = [12, 0], sizes = [4, 128], strides = [1, 1]} : vector<32x128xf32> to vector<4x128xf32>
      %cst_90 = arith.constant dense<0.000000e+00> : vector<4x128xf32>
      %142 = tpu.matmul %138, %29, %cst_90 {dimension_numbers = #tpu.dot_dimension_numbers<[1], [0], [0], [1], [0, 0, 1, 1], [], []>} : vector<4x32xf32>, vector<32x128xf32>, vector<4x128xf32> -> vector<4x128xf32>
      %143 = arith.addf %141, %142 : vector<4x128xf32>
      %144 = arith.negf %143 : vector<4x128xf32>
      %145 = math.exp %144 : vector<4x128xf32>
      %cst_91 = arith.constant 1.000000e+00 : f32
      %146 = vector.broadcast %cst_91 : f32 to vector<4x128xf32>
      %147 = arith.addf %146, %145 : vector<4x128xf32>
      %148 = arith.divf %146, %147 : vector<4x128xf32>
      %149 = math.tanh %143 : vector<4x128xf32>
      %150 = vector.extract_strided_slice %148 {offsets = [0, 0], sizes = [4, 32], strides = [1, 1]} : vector<4x128xf32> to vector<4x32xf32>
      %151 = vector.extract_strided_slice %148 {offsets = [0, 32], sizes = [4, 32], strides = [1, 1]} : vector<4x128xf32> to vector<4x32xf32>
      %152 = vector.extract_strided_slice %148 {offsets = [0, 96], sizes = [4, 32], strides = [1, 1]} : vector<4x128xf32> to vector<4x32xf32>
      %153 = vector.extract_strided_slice %149 {offsets = [0, 64], sizes = [4, 32], strides = [1, 1]} : vector<4x128xf32> to vector<4x32xf32>
      %154 = arith.mulf %151, %140 : vector<4x32xf32>
      %155 = arith.mulf %150, %153 : vector<4x32xf32>
      %156 = arith.addf %154, %155 : vector<4x32xf32>
      %157 = math.tanh %156 : vector<4x32xf32>
      %158 = arith.mulf %152, %157 : vector<4x32xf32>
      %159 = arith.select %136, %158, %138 : vector<4x32xi1>, vector<4x32xf32>
      %c1_92 = arith.constant 1 : index
      %c0_93 = arith.constant 0 : index
      %c0_94 = arith.constant 0 : index
      %160 = vector.load %arg5[%c1_92, %c0_93, %c0_94] : memref<5x4x32xf32, #tpu.memory_space<vmem>>, vector<1x4x32xf32>
      %161 = vector.shape_cast %160 : vector<1x4x32xf32> to vector<4x32xf32>
      %162 = vector.shape_cast %159 : vector<4x32xf32> to vector<1x4x32xf32>
      tpu.vector_store %arg5[%c1_92, %c0_93, %c0_94], %162 {strides = array<i32>} : memref<5x4x32xf32, #tpu.memory_space<vmem>>, vector<1x4x32xf32>,
      %163 = arith.select %136, %156, %140 : vector<4x32xi1>, vector<4x32xf32>
      %c3_95 = arith.constant 3 : index
      %c0_96 = arith.constant 0 : index
      %c0_97 = arith.constant 0 : index
      %164 = vector.load %arg5[%c3_95, %c0_96, %c0_97] : memref<5x4x32xf32, #tpu.memory_space<vmem>>, vector<1x4x32xf32>
      %165 = vector.shape_cast %164 : vector<1x4x32xf32> to vector<4x32xf32>
      %166 = vector.shape_cast %163 : vector<4x32xf32> to vector<1x4x32xf32>
      tpu.vector_store %arg5[%c3_95, %c0_96, %c0_97], %166 {strides = array<i32>} : memref<5x4x32xf32, #tpu.memory_space<vmem>>, vector<1x4x32xf32>,
      %c4_i32_98 = arith.constant 4 : i32
      %167 = arith.cmpi eq, %0, %c4_i32_98 : i32
      %168 = arith.extui %167 : i1 to i32
      %c0_i32_99 = arith.constant 0 : i32
      %169 = arith.cmpi ne, %168, %c0_i32_99 : i32
      scf.if %169 {
        %170 = arith.select %136, %158, %32 : vector<4x32xi1>, vector<4x32xf32>
        %c0_100 = arith.constant 0 : index
        %c0_101 = arith.constant 0 : index
        %171 = vector.load %arg7[%c0_100, %c0_101] : memref<4x32xf32, #tpu.memory_space<vmem>>, vector<4x32xf32>
        tpu.vector_store %arg7[%c0_100, %c0_101], %170 {strides = array<i32>} : memref<4x32xf32, #tpu.memory_space<vmem>>, vector<4x32xf32>,
      } else {
      }
    } else {
    }
    %c4_i32_55 = arith.constant 4 : i32
    %88 = arith.cmpi sgt, %0, %c4_i32_55 : i32
    %89 = arith.extui %88 : i1 to i32
    %c0_i32_56 = arith.constant 0 : i32
    %90 = arith.cmpi ne, %89, %c0_i32_56 : i32
    scf.if %90 {
      %c4_i32_83 = arith.constant 4 : i32
      %133 = vector.broadcast %c4_i32_83 : i32 to vector<4x1xi32>
      %134 = arith.cmpi sgt, %31, %133 : vector<4x1xi32>
      %135 = vector.shape_cast %134 : vector<4x1xi1> to vector<4x1xi1>
      %136 = vector.broadcast %135 : vector<4x1xi1> to vector<4x32xi1>
      %c1_84 = arith.constant 1 : index
      %c0_85 = arith.constant 0 : index
      %c0_86 = arith.constant 0 : index
      %137 = vector.load %arg5[%c1_84, %c0_85, %c0_86] : memref<5x4x32xf32, #tpu.memory_space<vmem>>, vector<1x4x32xf32>
      %138 = vector.shape_cast %137 : vector<1x4x32xf32> to vector<4x32xf32>
      %c3_87 = arith.constant 3 : index
      %c0_88 = arith.constant 0 : index
      %c0_89 = arith.constant 0 : index
      %139 = vector.load %arg5[%c3_87, %c0_88, %c0_89] : memref<5x4x32xf32, #tpu.memory_space<vmem>>, vector<1x4x32xf32>
      %140 = vector.shape_cast %139 : vector<1x4x32xf32> to vector<4x32xf32>
      %141 = vector.extract_strided_slice %75 {offsets = [16, 0], sizes = [4, 128], strides = [1, 1]} : vector<32x128xf32> to vector<4x128xf32>
      %cst_90 = arith.constant dense<0.000000e+00> : vector<4x128xf32>
      %142 = tpu.matmul %138, %29, %cst_90 {dimension_numbers = #tpu.dot_dimension_numbers<[1], [0], [0], [1], [0, 0, 1, 1], [], []>} : vector<4x32xf32>, vector<32x128xf32>, vector<4x128xf32> -> vector<4x128xf32>
      %143 = arith.addf %141, %142 : vector<4x128xf32>
      %144 = arith.negf %143 : vector<4x128xf32>
      %145 = math.exp %144 : vector<4x128xf32>
      %cst_91 = arith.constant 1.000000e+00 : f32
      %146 = vector.broadcast %cst_91 : f32 to vector<4x128xf32>
      %147 = arith.addf %146, %145 : vector<4x128xf32>
      %148 = arith.divf %146, %147 : vector<4x128xf32>
      %149 = math.tanh %143 : vector<4x128xf32>
      %150 = vector.extract_strided_slice %148 {offsets = [0, 0], sizes = [4, 32], strides = [1, 1]} : vector<4x128xf32> to vector<4x32xf32>
      %151 = vector.extract_strided_slice %148 {offsets = [0, 32], sizes = [4, 32], strides = [1, 1]} : vector<4x128xf32> to vector<4x32xf32>
      %152 = vector.extract_strided_slice %148 {offsets = [0, 96], sizes = [4, 32], strides = [1, 1]} : vector<4x128xf32> to vector<4x32xf32>
      %153 = vector.extract_strided_slice %149 {offsets = [0, 64], sizes = [4, 32], strides = [1, 1]} : vector<4x128xf32> to vector<4x32xf32>
      %154 = arith.mulf %151, %140 : vector<4x32xf32>
      %155 = arith.mulf %150, %153 : vector<4x32xf32>
      %156 = arith.addf %154, %155 : vector<4x32xf32>
      %157 = math.tanh %156 : vector<4x32xf32>
      %158 = arith.mulf %152, %157 : vector<4x32xf32>
      %159 = arith.select %136, %158, %138 : vector<4x32xi1>, vector<4x32xf32>
      %c1_92 = arith.constant 1 : index
      %c0_93 = arith.constant 0 : index
      %c0_94 = arith.constant 0 : index
      %160 = vector.load %arg5[%c1_92, %c0_93, %c0_94] : memref<5x4x32xf32, #tpu.memory_space<vmem>>, vector<1x4x32xf32>
      %161 = vector.shape_cast %160 : vector<1x4x32xf32> to vector<4x32xf32>
      %162 = vector.shape_cast %159 : vector<4x32xf32> to vector<1x4x32xf32>
      tpu.vector_store %arg5[%c1_92, %c0_93, %c0_94], %162 {strides = array<i32>} : memref<5x4x32xf32, #tpu.memory_space<vmem>>, vector<1x4x32xf32>,
      %163 = arith.select %136, %156, %140 : vector<4x32xi1>, vector<4x32xf32>
      %c3_95 = arith.constant 3 : index
      %c0_96 = arith.constant 0 : index
      %c0_97 = arith.constant 0 : index
      %164 = vector.load %arg5[%c3_95, %c0_96, %c0_97] : memref<5x4x32xf32, #tpu.memory_space<vmem>>, vector<1x4x32xf32>
      %165 = vector.shape_cast %164 : vector<1x4x32xf32> to vector<4x32xf32>
      %166 = vector.shape_cast %163 : vector<4x32xf32> to vector<1x4x32xf32>
      tpu.vector_store %arg5[%c3_95, %c0_96, %c0_97], %166 {strides = array<i32>} : memref<5x4x32xf32, #tpu.memory_space<vmem>>, vector<1x4x32xf32>,
      %c5_i32_98 = arith.constant 5 : i32
      %167 = arith.cmpi eq, %0, %c5_i32_98 : i32
      %168 = arith.extui %167 : i1 to i32
      %c0_i32_99 = arith.constant 0 : i32
      %169 = arith.cmpi ne, %168, %c0_i32_99 : i32
      scf.if %169 {
        %170 = arith.select %136, %158, %32 : vector<4x32xi1>, vector<4x32xf32>
        %c0_100 = arith.constant 0 : index
        %c0_101 = arith.constant 0 : index
        %171 = vector.load %arg7[%c0_100, %c0_101] : memref<4x32xf32, #tpu.memory_space<vmem>>, vector<4x32xf32>
        tpu.vector_store %arg7[%c0_100, %c0_101], %170 {strides = array<i32>} : memref<4x32xf32, #tpu.memory_space<vmem>>, vector<4x32xf32>,
      } else {
      }
    } else {
    }
    %c5_i32_57 = arith.constant 5 : i32
    %91 = arith.cmpi sgt, %0, %c5_i32_57 : i32
    %92 = arith.extui %91 : i1 to i32
    %c0_i32_58 = arith.constant 0 : i32
    %93 = arith.cmpi ne, %92, %c0_i32_58 : i32
    scf.if %93 {
      %c5_i32_83 = arith.constant 5 : i32
      %133 = vector.broadcast %c5_i32_83 : i32 to vector<4x1xi32>
      %134 = arith.cmpi sgt, %31, %133 : vector<4x1xi32>
      %135 = vector.shape_cast %134 : vector<4x1xi1> to vector<4x1xi1>
      %136 = vector.broadcast %135 : vector<4x1xi1> to vector<4x32xi1>
      %c1_84 = arith.constant 1 : index
      %c0_85 = arith.constant 0 : index
      %c0_86 = arith.constant 0 : index
      %137 = vector.load %arg5[%c1_84, %c0_85, %c0_86] : memref<5x4x32xf32, #tpu.memory_space<vmem>>, vector<1x4x32xf32>
      %138 = vector.shape_cast %137 : vector<1x4x32xf32> to vector<4x32xf32>
      %c3_87 = arith.constant 3 : index
      %c0_88 = arith.constant 0 : index
      %c0_89 = arith.constant 0 : index
      %139 = vector.load %arg5[%c3_87, %c0_88, %c0_89] : memref<5x4x32xf32, #tpu.memory_space<vmem>>, vector<1x4x32xf32>
      %140 = vector.shape_cast %139 : vector<1x4x32xf32> to vector<4x32xf32>
      %141 = vector.extract_strided_slice %75 {offsets = [20, 0], sizes = [4, 128], strides = [1, 1]} : vector<32x128xf32> to vector<4x128xf32>
      %cst_90 = arith.constant dense<0.000000e+00> : vector<4x128xf32>
      %142 = tpu.matmul %138, %29, %cst_90 {dimension_numbers = #tpu.dot_dimension_numbers<[1], [0], [0], [1], [0, 0, 1, 1], [], []>} : vector<4x32xf32>, vector<32x128xf32>, vector<4x128xf32> -> vector<4x128xf32>
      %143 = arith.addf %141, %142 : vector<4x128xf32>
      %144 = arith.negf %143 : vector<4x128xf32>
      %145 = math.exp %144 : vector<4x128xf32>
      %cst_91 = arith.constant 1.000000e+00 : f32
      %146 = vector.broadcast %cst_91 : f32 to vector<4x128xf32>
      %147 = arith.addf %146, %145 : vector<4x128xf32>
      %148 = arith.divf %146, %147 : vector<4x128xf32>
      %149 = math.tanh %143 : vector<4x128xf32>
      %150 = vector.extract_strided_slice %148 {offsets = [0, 0], sizes = [4, 32], strides = [1, 1]} : vector<4x128xf32> to vector<4x32xf32>
      %151 = vector.extract_strided_slice %148 {offsets = [0, 32], sizes = [4, 32], strides = [1, 1]} : vector<4x128xf32> to vector<4x32xf32>
      %152 = vector.extract_strided_slice %148 {offsets = [0, 96], sizes = [4, 32], strides = [1, 1]} : vector<4x128xf32> to vector<4x32xf32>
      %153 = vector.extract_strided_slice %149 {offsets = [0, 64], sizes = [4, 32], strides = [1, 1]} : vector<4x128xf32> to vector<4x32xf32>
      %154 = arith.mulf %151, %140 : vector<4x32xf32>
      %155 = arith.mulf %150, %153 : vector<4x32xf32>
      %156 = arith.addf %154, %155 : vector<4x32xf32>
      %157 = math.tanh %156 : vector<4x32xf32>
      %158 = arith.mulf %152, %157 : vector<4x32xf32>
      %159 = arith.select %136, %158, %138 : vector<4x32xi1>, vector<4x32xf32>
      %c1_92 = arith.constant 1 : index
      %c0_93 = arith.constant 0 : index
      %c0_94 = arith.constant 0 : index
      %160 = vector.load %arg5[%c1_92, %c0_93, %c0_94] : memref<5x4x32xf32, #tpu.memory_space<vmem>>, vector<1x4x32xf32>
      %161 = vector.shape_cast %160 : vector<1x4x32xf32> to vector<4x32xf32>
      %162 = vector.shape_cast %159 : vector<4x32xf32> to vector<1x4x32xf32>
      tpu.vector_store %arg5[%c1_92, %c0_93, %c0_94], %162 {strides = array<i32>} : memref<5x4x32xf32, #tpu.memory_space<vmem>>, vector<1x4x32xf32>,
      %163 = arith.select %136, %156, %140 : vector<4x32xi1>, vector<4x32xf32>
      %c3_95 = arith.constant 3 : index
      %c0_96 = arith.constant 0 : index
      %c0_97 = arith.constant 0 : index
      %164 = vector.load %arg5[%c3_95, %c0_96, %c0_97] : memref<5x4x32xf32, #tpu.memory_space<vmem>>, vector<1x4x32xf32>
      %165 = vector.shape_cast %164 : vector<1x4x32xf32> to vector<4x32xf32>
      %166 = vector.shape_cast %163 : vector<4x32xf32> to vector<1x4x32xf32>
      tpu.vector_store %arg5[%c3_95, %c0_96, %c0_97], %166 {strides = array<i32>} : memref<5x4x32xf32, #tpu.memory_space<vmem>>, vector<1x4x32xf32>,
      %c6_i32_98 = arith.constant 6 : i32
      %167 = arith.cmpi eq, %0, %c6_i32_98 : i32
      %168 = arith.extui %167 : i1 to i32
      %c0_i32_99 = arith.constant 0 : i32
      %169 = arith.cmpi ne, %168, %c0_i32_99 : i32
      scf.if %169 {
        %170 = arith.select %136, %158, %32 : vector<4x32xi1>, vector<4x32xf32>
        %c0_100 = arith.constant 0 : index
        %c0_101 = arith.constant 0 : index
        %171 = vector.load %arg7[%c0_100, %c0_101] : memref<4x32xf32, #tpu.memory_space<vmem>>, vector<4x32xf32>
        tpu.vector_store %arg7[%c0_100, %c0_101], %170 {strides = array<i32>} : memref<4x32xf32, #tpu.memory_space<vmem>>, vector<4x32xf32>,
      } else {
      }
    } else {
    }
    %c6_i32_59 = arith.constant 6 : i32
    %94 = arith.cmpi sgt, %0, %c6_i32_59 : i32
    %95 = arith.extui %94 : i1 to i32
    %c0_i32_60 = arith.constant 0 : i32
    %96 = arith.cmpi ne, %95, %c0_i32_60 : i32
    scf.if %96 {
      %c6_i32_83 = arith.constant 6 : i32
      %133 = vector.broadcast %c6_i32_83 : i32 to vector<4x1xi32>
      %134 = arith.cmpi sgt, %31, %133 : vector<4x1xi32>
      %135 = vector.shape_cast %134 : vector<4x1xi1> to vector<4x1xi1>
      %136 = vector.broadcast %135 : vector<4x1xi1> to vector<4x32xi1>
      %c1_84 = arith.constant 1 : index
      %c0_85 = arith.constant 0 : index
      %c0_86 = arith.constant 0 : index
      %137 = vector.load %arg5[%c1_84, %c0_85, %c0_86] : memref<5x4x32xf32, #tpu.memory_space<vmem>>, vector<1x4x32xf32>
      %138 = vector.shape_cast %137 : vector<1x4x32xf32> to vector<4x32xf32>
      %c3_87 = arith.constant 3 : index
      %c0_88 = arith.constant 0 : index
      %c0_89 = arith.constant 0 : index
      %139 = vector.load %arg5[%c3_87, %c0_88, %c0_89] : memref<5x4x32xf32, #tpu.memory_space<vmem>>, vector<1x4x32xf32>
      %140 = vector.shape_cast %139 : vector<1x4x32xf32> to vector<4x32xf32>
      %141 = vector.extract_strided_slice %75 {offsets = [24, 0], sizes = [4, 128], strides = [1, 1]} : vector<32x128xf32> to vector<4x128xf32>
      %cst_90 = arith.constant dense<0.000000e+00> : vector<4x128xf32>
      %142 = tpu.matmul %138, %29, %cst_90 {dimension_numbers = #tpu.dot_dimension_numbers<[1], [0], [0], [1], [0, 0, 1, 1], [], []>} : vector<4x32xf32>, vector<32x128xf32>, vector<4x128xf32> -> vector<4x128xf32>
      %143 = arith.addf %141, %142 : vector<4x128xf32>
      %144 = arith.negf %143 : vector<4x128xf32>
      %145 = math.exp %144 : vector<4x128xf32>
      %cst_91 = arith.constant 1.000000e+00 : f32
      %146 = vector.broadcast %cst_91 : f32 to vector<4x128xf32>
      %147 = arith.addf %146, %145 : vector<4x128xf32>
      %148 = arith.divf %146, %147 : vector<4x128xf32>
      %149 = math.tanh %143 : vector<4x128xf32>
      %150 = vector.extract_strided_slice %148 {offsets = [0, 0], sizes = [4, 32], strides = [1, 1]} : vector<4x128xf32> to vector<4x32xf32>
      %151 = vector.extract_strided_slice %148 {offsets = [0, 32], sizes = [4, 32], strides = [1, 1]} : vector<4x128xf32> to vector<4x32xf32>
      %152 = vector.extract_strided_slice %148 {offsets = [0, 96], sizes = [4, 32], strides = [1, 1]} : vector<4x128xf32> to vector<4x32xf32>
      %153 = vector.extract_strided_slice %149 {offsets = [0, 64], sizes = [4, 32], strides = [1, 1]} : vector<4x128xf32> to vector<4x32xf32>
      %154 = arith.mulf %151, %140 : vector<4x32xf32>
      %155 = arith.mulf %150, %153 : vector<4x32xf32>
      %156 = arith.addf %154, %155 : vector<4x32xf32>
      %157 = math.tanh %156 : vector<4x32xf32>
      %158 = arith.mulf %152, %157 : vector<4x32xf32>
      %159 = arith.select %136, %158, %138 : vector<4x32xi1>, vector<4x32xf32>
      %c1_92 = arith.constant 1 : index
      %c0_93 = arith.constant 0 : index
      %c0_94 = arith.constant 0 : index
      %160 = vector.load %arg5[%c1_92, %c0_93, %c0_94] : memref<5x4x32xf32, #tpu.memory_space<vmem>>, vector<1x4x32xf32>
      %161 = vector.shape_cast %160 : vector<1x4x32xf32> to vector<4x32xf32>
      %162 = vector.shape_cast %159 : vector<4x32xf32> to vector<1x4x32xf32>
      tpu.vector_store %arg5[%c1_92, %c0_93, %c0_94], %162 {strides = array<i32>} : memref<5x4x32xf32, #tpu.memory_space<vmem>>, vector<1x4x32xf32>,
      %163 = arith.select %136, %156, %140 : vector<4x32xi1>, vector<4x32xf32>
      %c3_95 = arith.constant 3 : index
      %c0_96 = arith.constant 0 : index
      %c0_97 = arith.constant 0 : index
      %164 = vector.load %arg5[%c3_95, %c0_96, %c0_97] : memref<5x4x32xf32, #tpu.memory_space<vmem>>, vector<1x4x32xf32>
      %165 = vector.shape_cast %164 : vector<1x4x32xf32> to vector<4x32xf32>
      %166 = vector.shape_cast %163 : vector<4x32xf32> to vector<1x4x32xf32>
      tpu.vector_store %arg5[%c3_95, %c0_96, %c0_97], %166 {strides = array<i32>} : memref<5x4x32xf32, #tpu.memory_space<vmem>>, vector<1x4x32xf32>,
      %c7_i32_98 = arith.constant 7 : i32
      %167 = arith.cmpi eq, %0, %c7_i32_98 : i32
      %168 = arith.extui %167 : i1 to i32
      %c0_i32_99 = arith.constant 0 : i32
      %169 = arith.cmpi ne, %168, %c0_i32_99 : i32
      scf.if %169 {
        %170 = arith.select %136, %158, %32 : vector<4x32xi1>, vector<4x32xf32>
        %c0_100 = arith.constant 0 : index
        %c0_101 = arith.constant 0 : index
        %171 = vector.load %arg7[%c0_100, %c0_101] : memref<4x32xf32, #tpu.memory_space<vmem>>, vector<4x32xf32>
        tpu.vector_store %arg7[%c0_100, %c0_101], %170 {strides = array<i32>} : memref<4x32xf32, #tpu.memory_space<vmem>>, vector<4x32xf32>,
      } else {
      }
    } else {
    }
    %c7_i32_61 = arith.constant 7 : i32
    %97 = arith.cmpi sgt, %0, %c7_i32_61 : i32
    %98 = arith.extui %97 : i1 to i32
    %c0_i32_62 = arith.constant 0 : i32
    %99 = arith.cmpi ne, %98, %c0_i32_62 : i32
    scf.if %99 {
      %c7_i32_83 = arith.constant 7 : i32
      %133 = vector.broadcast %c7_i32_83 : i32 to vector<4x1xi32>
      %134 = arith.cmpi sgt, %31, %133 : vector<4x1xi32>
      %135 = vector.shape_cast %134 : vector<4x1xi1> to vector<4x1xi1>
      %136 = vector.broadcast %135 : vector<4x1xi1> to vector<4x32xi1>
      %c1_84 = arith.constant 1 : index
      %c0_85 = arith.constant 0 : index
      %c0_86 = arith.constant 0 : index
      %137 = vector.load %arg5[%c1_84, %c0_85, %c0_86] : memref<5x4x32xf32, #tpu.memory_space<vmem>>, vector<1x4x32xf32>
      %138 = vector.shape_cast %137 : vector<1x4x32xf32> to vector<4x32xf32>
      %c3_87 = arith.constant 3 : index
      %c0_88 = arith.constant 0 : index
      %c0_89 = arith.constant 0 : index
      %139 = vector.load %arg5[%c3_87, %c0_88, %c0_89] : memref<5x4x32xf32, #tpu.memory_space<vmem>>, vector<1x4x32xf32>
      %140 = vector.shape_cast %139 : vector<1x4x32xf32> to vector<4x32xf32>
      %141 = vector.extract_strided_slice %75 {offsets = [28, 0], sizes = [4, 128], strides = [1, 1]} : vector<32x128xf32> to vector<4x128xf32>
      %cst_90 = arith.constant dense<0.000000e+00> : vector<4x128xf32>
      %142 = tpu.matmul %138, %29, %cst_90 {dimension_numbers = #tpu.dot_dimension_numbers<[1], [0], [0], [1], [0, 0, 1, 1], [], []>} : vector<4x32xf32>, vector<32x128xf32>, vector<4x128xf32> -> vector<4x128xf32>
      %143 = arith.addf %141, %142 : vector<4x128xf32>
      %144 = arith.negf %143 : vector<4x128xf32>
      %145 = math.exp %144 : vector<4x128xf32>
      %cst_91 = arith.constant 1.000000e+00 : f32
      %146 = vector.broadcast %cst_91 : f32 to vector<4x128xf32>
      %147 = arith.addf %146, %145 : vector<4x128xf32>
      %148 = arith.divf %146, %147 : vector<4x128xf32>
      %149 = math.tanh %143 : vector<4x128xf32>
      %150 = vector.extract_strided_slice %148 {offsets = [0, 0], sizes = [4, 32], strides = [1, 1]} : vector<4x128xf32> to vector<4x32xf32>
      %151 = vector.extract_strided_slice %148 {offsets = [0, 32], sizes = [4, 32], strides = [1, 1]} : vector<4x128xf32> to vector<4x32xf32>
      %152 = vector.extract_strided_slice %148 {offsets = [0, 96], sizes = [4, 32], strides = [1, 1]} : vector<4x128xf32> to vector<4x32xf32>
      %153 = vector.extract_strided_slice %149 {offsets = [0, 64], sizes = [4, 32], strides = [1, 1]} : vector<4x128xf32> to vector<4x32xf32>
      %154 = arith.mulf %151, %140 : vector<4x32xf32>
      %155 = arith.mulf %150, %153 : vector<4x32xf32>
      %156 = arith.addf %154, %155 : vector<4x32xf32>
      %157 = math.tanh %156 : vector<4x32xf32>
      %158 = arith.mulf %152, %157 : vector<4x32xf32>
      %159 = arith.select %136, %158, %138 : vector<4x32xi1>, vector<4x32xf32>
      %c1_92 = arith.constant 1 : index
      %c0_93 = arith.constant 0 : index
      %c0_94 = arith.constant 0 : index
      %160 = vector.load %arg5[%c1_92, %c0_93, %c0_94] : memref<5x4x32xf32, #tpu.memory_space<vmem>>, vector<1x4x32xf32>
      %161 = vector.shape_cast %160 : vector<1x4x32xf32> to vector<4x32xf32>
      %162 = vector.shape_cast %159 : vector<4x32xf32> to vector<1x4x32xf32>
      tpu.vector_store %arg5[%c1_92, %c0_93, %c0_94], %162 {strides = array<i32>} : memref<5x4x32xf32, #tpu.memory_space<vmem>>, vector<1x4x32xf32>,
      %163 = arith.select %136, %156, %140 : vector<4x32xi1>, vector<4x32xf32>
      %c3_95 = arith.constant 3 : index
      %c0_96 = arith.constant 0 : index
      %c0_97 = arith.constant 0 : index
      %164 = vector.load %arg5[%c3_95, %c0_96, %c0_97] : memref<5x4x32xf32, #tpu.memory_space<vmem>>, vector<1x4x32xf32>
      %165 = vector.shape_cast %164 : vector<1x4x32xf32> to vector<4x32xf32>
      %166 = vector.shape_cast %163 : vector<4x32xf32> to vector<1x4x32xf32>
      tpu.vector_store %arg5[%c3_95, %c0_96, %c0_97], %166 {strides = array<i32>} : memref<5x4x32xf32, #tpu.memory_space<vmem>>, vector<1x4x32xf32>,
      %c8_i32 = arith.constant 8 : i32
      %167 = arith.cmpi eq, %0, %c8_i32 : i32
      %168 = arith.extui %167 : i1 to i32
      %c0_i32_98 = arith.constant 0 : i32
      %169 = arith.cmpi ne, %168, %c0_i32_98 : i32
      scf.if %169 {
        %170 = arith.select %136, %158, %32 : vector<4x32xi1>, vector<4x32xf32>
        %c0_99 = arith.constant 0 : index
        %c0_100 = arith.constant 0 : index
        %171 = vector.load %arg7[%c0_99, %c0_100] : memref<4x32xf32, #tpu.memory_space<vmem>>, vector<4x32xf32>
        tpu.vector_store %arg7[%c0_99, %c0_100], %170 {strides = array<i32>} : memref<4x32xf32, #tpu.memory_space<vmem>>, vector<4x32xf32>,
      } else {
      }
    } else {
    }
    %c0_63 = arith.constant 0 : index
    %c0_64 = arith.constant 0 : index
    %100 = vector.load %arg7[%c0_63, %c0_64] : memref<4x32xf32, #tpu.memory_space<vmem>>, vector<4x32xf32>
    %c208 = arith.constant 208 : index
    %c0_65 = arith.constant 0 : index
    %101 = vector.load %arg4[%c208, %c0_65] : memref<344x128xf32, #tpu.memory_space<vmem>>, vector<32x8xf32>
    %cst_66 = arith.constant dense<0.000000e+00> : vector<4x8xf32>
    %102 = tpu.matmul %100, %101, %cst_66 {dimension_numbers = #tpu.dot_dimension_numbers<[1], [0], [0], [1], [0, 0, 1, 1], [], []>} : vector<4x32xf32>, vector<32x8xf32>, vector<4x8xf32> -> vector<4x8xf32>
    %c240 = arith.constant 240 : index
    %c0_67 = arith.constant 0 : index
    %103 = vector.load %arg4[%c240, %c0_67] : memref<344x128xf32, #tpu.memory_space<vmem>>, vector<1x8xf32>
    %104 = vector.broadcast %103 : vector<1x8xf32> to vector<4x8xf32>
    %105 = arith.addf %102, %104 : vector<4x8xf32>
    %c248 = arith.constant 248 : index
    %c0_68 = arith.constant 0 : index
    %106 = vector.load %arg4[%c248, %c0_68] : memref<344x128xf32, #tpu.memory_space<vmem>>, vector<16x32xf32>
    %cst_69 = arith.constant dense<0.000000e+00> : vector<4x32xf32>
    %107 = tpu.matmul %15, %106, %cst_69 {dimension_numbers = #tpu.dot_dimension_numbers<[1], [0], [0], [1], [0, 0, 1, 1], [], []>} : vector<4x16xf32>, vector<16x32xf32>, vector<4x32xf32> -> vector<4x32xf32>
    %c264 = arith.constant 264 : index
    %c0_70 = arith.constant 0 : index
    %108 = vector.load %arg4[%c264, %c0_70] : memref<344x128xf32, #tpu.memory_space<vmem>>, vector<8x32xf32>
    %cst_71 = arith.constant dense<0.000000e+00> : vector<4x32xf32>
    %109 = tpu.matmul %105, %108, %cst_71 {dimension_numbers = #tpu.dot_dimension_numbers<[1], [0], [0], [1], [0, 0, 1, 1], [], []>} : vector<4x8xf32>, vector<8x32xf32>, vector<4x32xf32> -> vector<4x32xf32>
    %110 = arith.addf %107, %109 : vector<4x32xf32>
    %c272 = arith.constant 272 : index
    %c0_72 = arith.constant 0 : index
    %111 = vector.load %arg4[%c272, %c0_72] : memref<344x128xf32, #tpu.memory_space<vmem>>, vector<1x32xf32>
    %112 = vector.broadcast %111 : vector<1x32xf32> to vector<4x32xf32>
    %113 = arith.addf %110, %112 : vector<4x32xf32>
    %cst_73 = arith.constant 0.000000e+00 : f32
    %114 = vector.broadcast %cst_73 : f32 to vector<4x32xf32>
    %115 = arith.maximumf %113, %114 : vector<4x32xf32>
    %c280 = arith.constant 280 : index
    %c0_74 = arith.constant 0 : index
    %116 = vector.load %arg4[%c280, %c0_74] : memref<344x128xf32, #tpu.memory_space<vmem>>, vector<32x16xf32>
    %cst_75 = arith.constant dense<0.000000e+00> : vector<4x16xf32>
    %117 = tpu.matmul %115, %116, %cst_75 {dimension_numbers = #tpu.dot_dimension_numbers<[1], [0], [0], [1], [0, 0, 1, 1], [], []>} : vector<4x32xf32>, vector<32x16xf32>, vector<4x16xf32> -> vector<4x16xf32>
    %c312 = arith.constant 312 : index
    %c0_76 = arith.constant 0 : index
    %118 = vector.load %arg4[%c312, %c0_76] : memref<344x128xf32, #tpu.memory_space<vmem>>, vector<1x16xf32>
    %119 = vector.broadcast %118 : vector<1x16xf32> to vector<4x16xf32>
    %120 = arith.addf %117, %119 : vector<4x16xf32>
    %cst_77 = arith.constant 0.000000e+00 : f32
    %121 = vector.broadcast %cst_77 : f32 to vector<4x16xf32>
    %122 = arith.maximumf %120, %121 : vector<4x16xf32>
    %c320 = arith.constant 320 : index
    %c0_78 = arith.constant 0 : index
    %123 = vector.load %arg4[%c320, %c0_78] : memref<344x128xf32, #tpu.memory_space<vmem>>, vector<16x1xf32>
    %cst_79 = arith.constant dense<0.000000e+00> : vector<4x1xf32>
    %124 = tpu.matmul %122, %123, %cst_79 {dimension_numbers = #tpu.dot_dimension_numbers<[1], [0], [0], [1], [0, 0, 1, 1], [], []>} : vector<4x16xf32>, vector<16x1xf32>, vector<4x1xf32> -> vector<4x1xf32>
    %c336 = arith.constant 336 : index
    %c0_80 = arith.constant 0 : index
    %125 = vector.load %arg4[%c336, %c0_80] : memref<344x128xf32, #tpu.memory_space<vmem>>, vector<1x1xf32>
    %126 = vector.broadcast %125 : vector<1x1xf32> to vector<4x1xf32>
    %127 = arith.addf %124, %126 : vector<4x1xf32>
    %128 = vector.shape_cast %127 : vector<4x1xf32> to vector<4x1xf32>
    %129 = vector.broadcast %128 : vector<4x1xf32> to vector<4x32xf32>
    %c4 = arith.constant 4 : index
    %c0_81 = arith.constant 0 : index
    %c0_82 = arith.constant 0 : index
    %130 = vector.load %arg5[%c4, %c0_81, %c0_82] : memref<5x4x32xf32, #tpu.memory_space<vmem>>, vector<1x4x32xf32>
    %131 = vector.shape_cast %130 : vector<1x4x32xf32> to vector<4x32xf32>
    %132 = vector.shape_cast %129 : vector<4x32xf32> to vector<1x4x32xf32>
    tpu.vector_store %arg5[%c4, %c0_81, %c0_82], %132 {strides = array<i32>} : memref<5x4x32xf32, #tpu.memory_space<vmem>>, vector<1x4x32xf32>,
    return
  }
}

</mosaic_0001>

<bundles_post_ra>
// kernel: neg.1
= control target key start
LH: loop header
LB: loop body
LE: loop exit
PB: predicated region body
PF: predicated region fallthrough
CT: control target
= control target key end

     0   :  { %s24_s0 = inlined_call_operand.vmem [shape: s32[4], index: 0, kind: input, shape index: {}]   ;;  %s25_s1 = inlined_call_operand.vmem [shape: s32[4], index: 1, kind: output, shape index: {}]  }
   0x1   :  { %v2_v0 = vld [vmem:[%s24_s0] sm:$0x1] }
   0x2   :  { %v5_v1 = vsub.s32 0, %v2_v0 }
   0x4   :  { %7 = vst [vmem:[%s25_s1] sm:$0x1] %v5_v1 }

// kernel: comp_fcnn_tar_rnn_forward.1
= control target key start
LH: loop header
LB: loop body
LE: loop exit
PB: predicated region body
PF: predicated region fallthrough
CT: control target
= control target key end

     0   :  { %vm339_vm0 = vcmask 257024   ;;  %v3985_v0 = vmov 0.0|0.0   ;;  %vm3986_vm1 = vmmov 0   ;;  %v3987_v4 = vmov 0.0   ;;  %s4910_s3 = inlined_call_operand.<no memory space> [shape: s32[1], index: 3, kind: input, shape index: {}]   ;;  %s4911_s4 = inlined_call_operand.vmem [shape: f32[344,128], index: 4, kind: input, shape index: {}]   ;;  %s4912_s5 = inlined_call_operand.vmem [shape: f32[5,4,32], index: 5, kind: output, shape index: {}]   ;;  %s4913_s0 = inlined_call_operand.vmem [shape: f32[4,16], index: 0, kind: input, shape index: {}]   ;;  %s4914_s1 = inlined_call_operand.vmem [shape: s32[32,1], index: 1, kind: input, shape index: {}]   ;;  %s4915_s2 = inlined_call_operand.vmem [shape: s32[4,1], index: 2, kind: input, shape index: {}]  }
   0x1   :  { %3567 = vmatprep.subr.bf16.mxu1 %v3985_v0  ;;  %v23_v1 = vld [vmem:[%s4911_s4 + $0x90] sm:$0xff]  ;;  %v24_v2 = vld [vmem:[%s4911_s4 + $0x98] sm:$0xff]  ;;  %v4145_v3 = vld [vmem:[%s4911_s4 + $0x20] sm:$0xff]  ;;  %3308 = vmatprep.mubr.msk.f32.mxu1 %vm3986_vm1, %v3987_v4  ;;  %340 = vst.msk [vmem:[%s4912_s5] sm:$0xf] %vm339_vm0, %v3987_v4  ;;  %v3988_v9 = vmov 0   ;;  %v193_v36 = vlaneseq }
   0x2   :  { %3060 = vst.msk [vmem:[%s4912_s5 + $0x4] sm:$0xf] %vm339_vm0, %v3987_v4  ;;  %3061 = vst.msk [vmem:[%s4912_s5 + $0x8] sm:$0xf] %vm339_vm0, %v3987_v4  ;;  %v3568_v5 = vpack.c.bf16 %v24_v2, %v23_v1  ;;  %v4174_v6 = vld [vmem:[%s4911_s4 + $0x28] sm:$0xff]  ;;  %v4179_v7 = vld [vmem:[%s4911_s4 + $0x30] sm:$0xff]  ;;  %3830 = vset.pattern.permute.xlu0 %v3988_v9  ;;  %3831 = vset.pattern.permute.xlu1 %v3988_v9 }
   0x3   :  { %3062 = vst.msk [vmem:[%s4912_s5 + $0xc] sm:$0xf] %vm339_vm0, %v3987_v4  ;;  %351 = vst.msk [vmem:[#allocation3] sm:$0xf] %vm339_vm0, %v3987_v4  ;;  %v4184_v8 = vld [vmem:[%s4911_s4 + $0x38] sm:$0xff]  ;;  %v4191_v10 = vld [vmem:[%s4911_s4 + $0x40] sm:$0xff] }
   0x4   :  { %v4196_v11 = vld [vmem:[%s4911_s4 + $0x48] sm:$0xff]  ;;  %v4201_v12 = vld [vmem:[%s4911_s4 + $0x50] sm:$0xff]  ;;  %3569 = vmatpush3.bf16.msra.mxu1 %v3568_v5  ;;  %v4206_v13 = vld [vmem:[%s4911_s4 + $0x58] sm:$0xff]  ;;  %vm30_vm2 = vcmask 130048   ;;  %vm114_vm3 = vcmask 261120   ;;  %v194_v37 = vand.u32 127, %v193_v36 }
   0x5   :  { %v4211_v14 = vld [vmem:[%s4911_s4 + $0x60] sm:$0xff]  ;;  %v4216_v15 = vld [vmem:[%s4911_s4 + $0x68] sm:$0xff]  ;;  %v4221_v16 = vld [vmem:[%s4911_s4 + $0x70] sm:$0xff]  ;;  %3570 = vmatprep.subr.bf16.mxu1 %v3985_v0  ;;  %347 = vst.msk [vmem:[#allocation2] sm:$0xff] %vm114_vm3, %v3987_v4  ;;  %p3063_p0 = scmp.le.s32.totalorder %s4910_s3, 0 }
   0x6   :  { %v4226_v17 = vld [vmem:[%s4911_s4 + $0x78] sm:$0xff]  ;;  %v4231_v18 = vld [vmem:[%s4911_s4 + $0x88] ss:$0 sm:$0xff]  ;;  %v22_v19 = vld [vmem:[%s4913_s0] sm:$0xf]  ;;  %348 = vst.msk [vmem:[#allocation2 + $0x8] sm:$0xff] %vm114_vm3, %v3987_v4  ;;  %v3585_v5 = vpack.c.bf16 (!%p3063_p0), %v4174_v6, %v4145_v3 }
   0x7   :  { %v189_v20 = vld [vmem:[%s4914_s1] sm:$0xff]  ;;  %v191_v21 = vld [vmem:[%s4914_s1 + $0x10] sm:$0xff]  ;;  %3309 = vmatmul.mubr.msk.f32.vlgmr.msra.gmra.mrb[0].mxu1 %vm30_vm2, %v22_v19  ;;  %v190_v22 = vld [vmem:[%s4914_s1 + $0x8] sm:$0xff]  ;;  %349 = vst.msk [vmem:[#allocation2 + $0x10] sm:$0xff] %vm114_vm3, %v3987_v4  ;;  %v3989_v19 = vmov (!%p3063_p0), 0.0|0.0   ;;  %vm3990_vm8 = vmmov (!%p3063_p0), 0  }
   0x8   :  { %196 = vperm.xlu0 %3830, %v189_v20   ;;  %v219_v23 = vld [vmem:[%s4911_s4] sm:$0xff]  ;;  %202 = vperm.xlu1 %3831, %v191_v21   ;;  %v220_v24 = vld [vmem:[%s4911_s4 + $0x8] sm:$0xff]  ;;  %v221_v25 = vld [vmem:[%s4911_s4 + $0x10] sm:$0xff]  ;;  %350 = vst.msk [vmem:[#allocation2 + $0x18] sm:$0xff] %vm114_vm3, %v3987_v4  ;;  %v3588_v20 = vpack.c.bf16 (!%p3063_p0), %v4184_v8, %v4179_v7  ;;  %v3991_v21 = vmov (!%p3063_p0), 0.0   ;;  %s3993_s17 = smov (!%p3063_p0), 64  }
   0x9   :  { %v222_v26 = vld [vmem:[%s4911_s4 + $0x18] sm:$0xff]  ;;  %3319 = vmatprep.mubr.msk.f32.mxu1 %vm3986_vm1, %v3987_v4  ;;  %v3576_v28 = vpack.c.bf16 %v220_v24, %v219_v23  ;;  %v105_v30 = vld [vmem:[%s4911_s4 + $0xa8] sm:$0xff]  ;;  %v106_v31 = vld [vmem:[%s4911_s4 + $0xb0] sm:$0xff]  ;;  %s3994_s20 = smov (!%p3063_p0), 32   ;;  %s3995_s21 = smov (!%p3063_p0), 96  }
   0xa   :  { %v192_v27 = vld [vmem:[%s4914_s1 + $0x18] sm:$0xff]  ;;  %v3580_v29 = vpack.c.bf16 %v222_v26, %v221_v25  ;;  %v3571_v32 = vpack.c.bf16 %v106_v31, %v105_v30  ;;  %v108_v34 = vld [vmem:[%s4911_s4 + $0xc0] sm:$0xff]  ;;  %v3049_v61 = vld [vmem:[%s4911_s4 + $0xc8] ss:$0 sm:$0xff]  ;;  %v3992_v26 = vmov (!%p3063_p0), 0  }
   0xb   :  { %3577 = vmatprep.subr.bf16.mxu0 %v3576_v28  ;;  %v107_v33 = vld [vmem:[%s4911_s4 + $0xb8] sm:$0xff]  ;;  %v3047_v46 = vld [vmem:[%s4911_s4 + $0xa0] ss:$0 sm:$0xff] }
   0xc   :  { %199 = vperm.xlu0 %3830, %v190_v22   ;;  %205 = vperm.xlu1 %3831, %v192_v27   ;;  %v3574_v35 = vpack.c.bf16 %v108_v34, %v107_v33  ;;  %v4300_v51 = vld [vmem:[%s4915_s2] sm:$0xf] }
   0xd   :  { %3579 = vmatpush3.bf16.msra.mxu0 %v3576_v28  ;;  %3572 = vmatpush3.bf16.msra.mxu1 %v3571_v32  ;;  %v3055_v52 = vld [vmem:[%s4911_s4 + $0x80] ss:$0 sm:$0xff]  ;;  %v3064_v28 = vld [vmem:[%s4912_s5 + $0x8] sm:$0xf] (!%p3063_p0)  ;;  %vm356_vm9 = vcmp.gt.s32.totalorder (!%p3063_p0), %v4300_v51, 0 }
   0xe   :  { %3581 = vmatprep.subr.bf16.mxu0 %v3580_v29  ;;  %3573 = vmatprep.subr.bf16.mxu1 %v3985_v0  ;;  %v362_v22 = vld [vmem:[%s4912_s5] sm:$0xf] (!%p3063_p0) }
  0x10   :  { %3832 = vset.pattern.permute.xlu1 (!%p3063_p0), %v3992_v26  ;;  %3833 = vset.pattern.permute.xlu0 (!%p3063_p0), %v3992_v26 }
  0x11   :  { %3583 = vmatpush3.bf16.msra.mxu0 %v3580_v29  ;;  %3575 = vmatpush3.bf16.msra.mxu1 %v3574_v35  ;;  %v357_v35 = vsel (!%p3063_p0), %vm356_vm9, 1, %v3992_v26 }
  0x12   :  { %3584 = vmatprep.subr.bf16.mxu0 (!%p3063_p0), %v3989_v19 }
  0x87   :  { %v197_v38 = vpop.permute.xlu0 %196  ;;  %v203_v39 = vpop.permute.xlu1 %202 }
  0x88   :  { %vm207_vm4 = vcmp.eq.s32.totalorder %v194_v37, %v197_v38  ;;  %vm209_vm5 = vcmp.eq.s32.totalorder %v194_v37, %v203_v39 }
  0x89   :  { %v3051_v40 = vsel %vm207_vm4, 1.0, %v3987_v4  ;;  %v3053_v42 = vsel %vm209_vm5, 1.0, %v3987_v4 }
  0x8a   :  { %3330 = vmatprep.mubr.msk.f32.mxu0 %vm114_vm3, %v3051_v40 }
  0x8b   :  { %v200_v41 = vpop.permute.xlu0 %199  ;;  %v206_v43 = vpop.permute.xlu1 %205 }
  0x8c   :  { %vm208_vm6 = vcmp.eq.s32.totalorder %v194_v37, %v200_v41  ;;  %vm210_vm7 = vcmp.eq.s32.totalorder %v194_v37, %v206_v43 }
  0x8d   :  { %v3052_v44 = vsel %vm208_vm6, 1.0, %v3987_v4  ;;  %v3054_v45 = vsel %vm210_vm7, 1.0, %v3987_v4 }
  0x8e   :  { %3331 = vmatmul.mubr.msk.f32.vlgmr.msra.gmra.mrb[0].mxu0 %vm114_vm3, %v3052_v44 }
  0x8f   :  { %3333 = vmatprep.mubr.msk.f32.mxu0 %vm114_vm3, %v3053_v42  ;;  %3586 = vmatpush3.bf16.msra.mxu0 (!%p3063_p0), %v3585_v5 }
  0x90   :  { %3587 = vmatprep.subr.bf16.mxu0 (!%p3063_p0), %v3989_v19 }
  0x92   :  { %3334 = vmatmul.mubr.msk.f32.gmra.mrb[2].mxu0 %vm114_vm3, %v3054_v45 }
  0x93   :  { %3344 = vmatprep.mubr.msk.f32.mxu0 (!%p3063_p0), %vm3990_vm8, %v3991_v21  ;;  %3589 = vmatpush3.bf16.msra.mxu0 (!%p3063_p0), %v3588_v20 }
  0xda   :  { %v100_v47 = vpop.f32.mrb[0].mxu1 }
  0xdb   :  { %v101_v48 = vadd.f32 %v3047_v46, %v100_v47  ;;  %v3310_v49 = vpop.f32.mrb[1].mxu1 }
  0xdd   :  { %v104_v50 = vmax.f32 %v101_v48, 0.0 }
  0xdf   :  { %3320 = vmatmul.mubr.msk.f32.vlgmr.msra.gmra.mrb[2].mxu1 %vm114_vm3, %v104_v50 }
 0x161   :  { %v3332_v53 = vpop.f32.mrb[0].mxu0 }
 0x162   :  { %v4305_v54 = vadd.f32 %v3332_v53, %v3055_v52  ;;  %v306_v55 = vpop.f32.mrb[1].mxu0  ;;  %3345 = vmatmul.mubr.msk.f32.vlgmr.msra.gmra.mrb[0].mxu0 (!%p3063_p0), %vm114_vm3, %v362_v22 }
 0x163   :  { %v4307_v56 = vadd.f32 %v3055_v52, %v306_v55 }
 0x165   :  { %v3335_v57 = vpop.f32.mrb[2].mxu0 }
 0x166   :  { %v4309_v58 = vadd.f32 %v3335_v57, %v3055_v52  ;;  %v316_v59 = vpop.f32.mrb[3].mxu0 }
 0x167   :  { %v4311_v60 = vadd.f32 %v3055_v52, %v316_v59 }
 0x1af   :  { %355 = sbr.rel (%p3063_p0) target bundleno = 1062 (0x426), region = 25 }
 0x1b2   :  { %v184_v62 = vpop.f32.mrb[2].mxu1 }
 0x1b3   :  { %v4316_v63 = vadd.f32 %v3049_v61, %v184_v62  ;;  %v3321_v1 = vpop.f32.mrb[3].mxu1 }
 0x1b5   :  { %v188_v2 = vmax.f32 %v4316_v63, 0.0 }
 0x235   :  { %v433_v23 = vpop.f32.mrb[0].mxu0 }
 0x236   :  { %v437_v24 = vadd.f32 %v433_v23, %v4307_v56  ;;  %v3346_v25 = vpop.f32.mrb[1].mxu0 }
 0x238   :  { %3834 = vtanh.f32 %v437_v24  ;;  %v3066_v29 = vmul.f32 -1.442695, %v437_v24 }
 0x23a   :  { %3836 = vpow2.f32 %v3066_v29 }
 0x242   :  { %v3835_v27 = vpop.eup %3834 }
 0x243   :  { %451 = vrot.lane.b32.xlu0 %v3835_v27, %s3993_s17 }
 0x244   :  { %v3837_v30 = vpop.eup %3836 }
 0x245   :  { %v441_v31 = vadd.f32 1.0, %v3837_v30 }
 0x247   :  { %446 = vrot.lane.b32.xlu0 %v3064_v28, %s3994_s20  ;;  %3838 = vrcp.f32 %v441_v31 }
 0x251   :  { %v3839_v32 = vpop.eup %3838 }
 0x2b5   :  { %v452_v33 = vpop.permute.xlu0 %451 }
 0x2b6   :  { %v454_v34 = vmul.f32 %v3839_v32, %v452_v33 }
 0x2b8   :  { %456 = vrot.lane.b32.xlu1 %v454_v34, %s3994_s20 }
 0x2b9   :  { %v447_v36 = vpop.permute.xlu0 %446 }
 0x2ba   :  { %v449_v37 = vmul.f32 %v3839_v32, %v447_v36 }
 0x2bc   :  { %359 = vperm.xlu1 %3832, %v357_v35  }
 0x2c0   :  { %466 = vrot.lane.b32.xlu1 %v362_v22, %s3995_s21 }
 0x32a   :  { %v457_v38 = vpop.permute.xlu1 %456 }
 0x32b   :  { %v459_v39 = vadd.f32 %v457_v38, %v449_v37 }
 0x32d   :  { %3840 = vtanh.f32 %v459_v39 }
 0x337   :  { %v3841_v40 = vpop.eup %3840 }
 0x338   :  { %462 = vrot.lane.b32.xlu0 %v3841_v40, %s3993_s17 }
 0x33b   :  { %v360_v41 = vpop.permute.xlu1 %359 }
 0x33c   :  { %vm361_vm10 = vcmp.eq.s32.totalorder %v360_v41, 1 }
 0x33d   :  { %v475_v42 = vsel %vm361_vm10, %v459_v39, %v447_v36 }
 0x33e   :  { %477 = vrot.lane.b32.xlu1 %v475_v42, %s3995_s21 }
 0x33f   :  { %v467_v44 = vpop.permute.xlu1 %466 }
 0x3aa   :  { %v463_v43 = vpop.permute.xlu0 %462 }
 0x3ab   :  { %v465_v45 = vmul.f32 %v3839_v32, %v463_v43 }
 0x3ad   :  { %v469_v46 = vsel %vm361_vm10, %v465_v45, %v467_v44  ;;  %v481_v48 = vsel %vm361_vm10, %v465_v45, 0.0 }
 0x3ae   :  { %471 = vrot.lane.b32.xlu0 %v469_v46, %s3994_s20 }
 0x3b0   :  { %v478_v47 = vpop.permute.xlu1 %477 }
 0x3b1   :  { %3067 = vst.msk [vmem:[%s4912_s5 + $0x8] sm:$0xf] %vm339_vm0, %v478_v47 }
 0x3b2   :  { %483 = vrot.lane.b32.xlu0 %v481_v48, %s3994_s20 }
 0x420   :  { %v472_v49 = vpop.permute.xlu0 %471 }
 0x421   :  { %474 = vst.msk [vmem:[%s4912_s5] sm:$0xf] %vm339_vm0, %v472_v49 }
 0x424   :  { %v484_v50 = vpop.permute.xlu0 %483 }
 0x425   :  { %486 = vst.msk [vmem:[#allocation2] sm:$0xf] %vm339_vm0, %v484_v50 }
 0x426 PF:  { %p3068_p1 = scmp.le.s32.totalorder %s4910_s3, 1 }
 0x427   :  { %v3591_v52 = vpack.c.bf16 (!%p3068_p1), %v4174_v6, %v4145_v3  ;;  %v3996_v53 = vmov (!%p3068_p1), 0.0|0.0   ;;  %v3594_v55 = vpack.c.bf16 (!%p3068_p1), %v4184_v8, %v4179_v7  ;;  %vm3997_vm11 = vmmov (!%p3068_p1), 0   ;;  %v3069_v19 = vld [vmem:[%s4912_s5 + $0x8] sm:$0xf] (!%p3068_p1)  ;;  %s3999_s8 = smov (!%p3068_p1), 64   ;;  %s4000_s9 = smov (!%p3068_p1), 32  }
 0x428   :  { %490 = sbr.rel (%p3068_p1) target bundleno = 1784 (0x6f8), region = 29  ;;  %3590 = vmatprep.subr.bf16.mxu0 (!%p3068_p1), %v3996_v53  ;;  %v3998_v57 = vmov (!%p3068_p1), 0.0   ;;  %v497_v59 = vld [vmem:[%s4912_s5] sm:$0xf] (!%p3068_p1)  ;;  %v584_v21 = vrot.slane (!%p3068_p1), %v3069_v19, 4  ;;  %vm491_vm12 = vcmp.gt.s32.totalorder (!%p3068_p1), %v4300_v51, 1 }
 0x429   :  { %3592 = vmatpush3.bf16.msra.mxu0 (!%p3068_p1), %v3591_v52  ;;  %3355 = vmatprep.mubr.msk.f32.mxu0 (!%p3068_p1), %vm3997_vm11, %v3998_v57  ;;  %s4002_s10 = smov (!%p3068_p1), 96  }
 0x42a   :  { %3593 = vmatprep.subr.bf16.mxu0 (!%p3068_p1), %v3996_v53 }
 0x42d   :  { %3595 = vmatpush3.bf16.msra.mxu0 (!%p3068_p1), %v3594_v55 }
 0x430   :  { %3356 = vmatmul.mubr.msk.f32.vlgmr.msra.gmra.mrb[0].mxu0 %vm114_vm3, %v497_v59 }
 0x503   :  { %v568_v61 = vpop.f32.mrb[0].mxu0 }
 0x504   :  { %v573_v62 = vrot.slane %v568_v61, 4  ;;  %v3357_v1 = vpop.f32.mrb[1].mxu0 }
 0x506   :  { %v575_v5 = vadd.f32 %v573_v62, %v4307_v56  ;;  %v4001_v56 = vmov 0  }
 0x507   :  { %3842 = vset.pattern.permute.xlu0 %v4001_v56  ;;  %v492_v28 = vsel %vm491_vm12, 1, %v4001_v56 }
 0x508   :  { %3843 = vtanh.f32 %v575_v5  ;;  %v3071_v22 = vmul.f32 -1.442695, %v575_v5 }
 0x50a   :  { %3845 = vpow2.f32 %v3071_v22 }
 0x512   :  { %v3844_v20 = vpop.eup %3843 }
 0x513   :  { %590 = vrot.lane.b32.xlu0 %v3844_v20, %s3999_s8 }
 0x514   :  { %v3846_v23 = vpop.eup %3845 }
 0x515   :  { %v579_v24 = vadd.f32 1.0, %v3846_v23 }
 0x517   :  { %585 = vrot.lane.b32.xlu0 %v584_v21, %s4000_s9  ;;  %3847 = vrcp.f32 %v579_v24 }
 0x51b   :  { %494 = vperm.xlu0 %3842, %v492_v28  }
 0x521   :  { %v3848_v25 = vpop.eup %3847 }
 0x585   :  { %v591_v26 = vpop.permute.xlu0 %590 }
 0x586   :  { %v593_v27 = vmul.f32 %v3848_v25, %v591_v26 }
 0x588   :  { %595 = vrot.lane.b32.xlu1 %v593_v27, %s4000_s9 }
 0x589   :  { %v586_v29 = vpop.permute.xlu0 %585 }
 0x58a   :  { %v588_v30 = vmul.f32 %v3848_v25, %v586_v29 }
 0x59a   :  { %v495_v38 = vpop.permute.xlu0 %494 }
 0x59b   :  { %vm496_vm13 = vcmp.eq.s32.totalorder %v495_v38, 1 }
 0x5fa   :  { %v596_v31 = vpop.permute.xlu1 %595 }
 0x5fb   :  { %v598_v32 = vadd.f32 %v596_v31, %v588_v30 }
 0x5fd   :  { %3849 = vtanh.f32 %v598_v32  ;;  %v613_v37 = vrot.slane %v598_v32, 4 }
 0x607   :  { %v3850_v33 = vpop.eup %3849 }
 0x608   :  { %601 = vrot.lane.b32.xlu1 %v3850_v33, %s3999_s8 }
 0x67a   :  { %v602_v34 = vpop.permute.xlu1 %601 }
 0x67b   :  { %v604_v35 = vmul.f32 %v3848_v25, %v602_v34 }
 0x67d   :  { %v606_v36 = vrot.slane %v604_v35, 4 }
 0x67f   :  { %607 = vrot.lane.b32.xlu1 %v606_v36, %s4000_s9 }
 0x683   :  { %614 = vrot.lane.b32.xlu1 %v613_v37, %s4002_s10 }
 0x6f1   :  { %v608_v39 = vpop.permute.xlu1 %607 }
 0x6f2   :  { %v610_v40 = vsel %vm496_vm13, %v608_v39, %v497_v59  ;;  %v619_v41 = vsel %vm496_vm13, %v608_v39, 0.0 }
 0x6f3   :  { %611 = vst.msk [vmem:[%s4912_s5] sm:$0xf] %vm339_vm0, %v610_v40  ;;  %620 = vst.msk [vmem:[#allocation2 + $0x4] sm:$0xf] %vm339_vm0, %v619_v41 }
 0x6f5   :  { %v615_v42 = vpop.permute.xlu1 %614 }
 0x6f6   :  { %v617_v43 = vsel %vm496_vm13, %v615_v42, %v3069_v19 }
 0x6f7   :  { %3072 = vst.msk [vmem:[%s4912_s5 + $0x8] sm:$0xf] %vm339_vm0, %v617_v43 }
 0x6f8 PF:  { %p3073_p2 = scmp.le.s32.totalorder %s4910_s3, 2 }
 0x6f9   :  { %v3597_v44 = vpack.c.bf16 (!%p3073_p2), %v4174_v6, %v4145_v3  ;;  %v4003_v45 = vmov (!%p3073_p2), 0.0|0.0   ;;  %v3600_v46 = vpack.c.bf16 (!%p3073_p2), %v4184_v8, %v4179_v7  ;;  %vm4004_vm14 = vmmov (!%p3073_p2), 0   ;;  %s4007_s19 = smov (!%p3073_p2), 64   ;;  %s4008_s22 = smov (!%p3073_p2), 32  }
 0x6fa   :  { %624 = sbr.rel (%p3073_p2) target bundleno = 2502 (0x9c6), region = 33  ;;  %3596 = vmatprep.subr.bf16.mxu0 (!%p3073_p2), %v4003_v45  ;;  %v4005_v47 = vmov (!%p3073_p2), 0.0   ;;  %v631_v48 = vld [vmem:[%s4912_s5] sm:$0xf] (!%p3073_p2)  ;;  %v4006_v53 = vmov (!%p3073_p2), 0   ;;  %vm625_vm15 = vcmp.gt.s32.totalorder (!%p3073_p2), %v4300_v51, 2 }
 0x6fb   :  { %3598 = vmatpush3.bf16.msra.mxu0 (!%p3073_p2), %v3597_v44  ;;  %3366 = vmatprep.mubr.msk.f32.mxu0 (!%p3073_p2), %vm4004_vm14, %v4005_v47  ;;  %v626_v20 = vsel (!%p3073_p2), %vm625_vm15, 1, %v4006_v53  ;;  %s4009_s1 = smov (!%p3073_p2), 96  }
 0x6fc   :  { %3599 = vmatprep.subr.bf16.mxu0 (!%p3073_p2), %v4003_v45  ;;  %3851 = vset.pattern.permute.xlu1 (!%p3073_p2), %v4006_v53 }
 0x6fd   :  { %3852 = vset.pattern.permute.xlu0 (!%p3073_p2), %v4006_v53 }
 0x6fe   :  { %v3074_v57 = vld [vmem:[%s4912_s5 + $0x8] sm:$0xf] (!%p3073_p2) }
 0x6ff   :  { %3601 = vmatpush3.bf16.msra.mxu0 (!%p3073_p2), %v3600_v46 }
 0x702   :  { %3367 = vmatmul.mubr.msk.f32.vlgmr.msra.gmra.mrb[0].mxu0 %vm114_vm3, %v631_v48 }
 0x7d5   :  { %v702_v49 = vpop.f32.mrb[0].mxu0 }
 0x7d6   :  { %v706_v50 = vadd.f32 %v702_v49, %v4305_v54  ;;  %v3368_v52 = vpop.f32.mrb[1].mxu0 }
 0x7d8   :  { %3853 = vtanh.f32 %v706_v50  ;;  %v3076_v59 = vmul.f32 -1.442695, %v706_v50 }
 0x7da   :  { %3855 = vpow2.f32 %v3076_v59 }
 0x7e2   :  { %v3854_v55 = vpop.eup %3853 }
 0x7e3   :  { %720 = vrot.lane.b32.xlu0 %v3854_v55, %s4007_s19 }
 0x7e4   :  { %v3856_v61 = vpop.eup %3855 }
 0x7e5   :  { %v710_v62 = vadd.f32 1.0, %v3856_v61 }
 0x7e7   :  { %715 = vrot.lane.b32.xlu0 %v3074_v57, %s4008_s22  ;;  %3857 = vrcp.f32 %v710_v62 }
 0x7f1   :  { %v3858_v1 = vpop.eup %3857 }
 0x855   :  { %v721_v5 = vpop.permute.xlu0 %720 }
 0x856   :  { %v723_v19 = vmul.f32 %v3858_v1, %v721_v5 }
 0x858   :  { %725 = vrot.lane.b32.xlu1 %v723_v19, %s4008_s22 }
 0x859   :  { %v716_v21 = vpop.permute.xlu0 %715 }
 0x85a   :  { %v718_v22 = vmul.f32 %v3858_v1, %v716_v21 }
 0x85c   :  { %628 = vperm.xlu1 %3851, %v626_v20  }
 0x860   :  { %735 = vrot.lane.b32.xlu1 %v631_v48, %s4009_s1 }
 0x8ca   :  { %v726_v23 = vpop.permute.xlu1 %725 }
 0x8cb   :  { %v728_v24 = vadd.f32 %v726_v23, %v718_v22 }
 0x8cd   :  { %3859 = vtanh.f32 %v728_v24 }
 0x8d7   :  { %v3860_v25 = vpop.eup %3859 }
 0x8d8   :  { %731 = vrot.lane.b32.xlu0 %v3860_v25, %s4007_s19 }
 0x8db   :  { %v629_v26 = vpop.permute.xlu1 %628 }
 0x8dc   :  { %vm630_vm4 = vcmp.eq.s32.totalorder %v629_v26, 1 }
 0x8dd   :  { %v744_v27 = vsel %vm630_vm4, %v728_v24, %v716_v21 }
 0x8de   :  { %746 = vrot.lane.b32.xlu1 %v744_v27, %s4009_s1 }
 0x8df   :  { %v736_v28 = vpop.permute.xlu1 %735 }
 0x94a   :  { %v732_v56 = vpop.permute.xlu0 %731 }
 0x94b   :  { %v734_v29 = vmul.f32 %v3858_v1, %v732_v56 }
 0x94d   :  { %v738_v30 = vsel %vm630_vm4, %v734_v29, %v736_v28  ;;  %v750_v32 = vsel %vm630_vm4, %v734_v29, 0.0 }
 0x94e   :  { %740 = vrot.lane.b32.xlu0 %v738_v30, %s4008_s22 }
 0x950   :  { %v747_v31 = vpop.permute.xlu1 %746 }
 0x951   :  { %3077 = vst.msk [vmem:[%s4912_s5 + $0x8] sm:$0xf] %vm339_vm0, %v747_v31 }
 0x952   :  { %752 = vrot.lane.b32.xlu0 %v750_v32, %s4008_s22 }
 0x9c0   :  { %v741_v33 = vpop.permute.xlu0 %740 }
 0x9c1   :  { %743 = vst.msk [vmem:[%s4912_s5] sm:$0xf] %vm339_vm0, %v741_v33 }
 0x9c4   :  { %v753_v34 = vpop.permute.xlu0 %752 }
 0x9c5   :  { %755 = vst.msk [vmem:[#allocation2 + $0x8] sm:$0xf] %vm339_vm0, %v753_v34 }
 0x9c6 PF:  { %p3078_p3 = scmp.le.s32.totalorder %s4910_s3, 3 }
 0x9c7   :  { %v3603_v35 = vpack.c.bf16 (!%p3078_p3), %v4174_v6, %v4145_v3  ;;  %v4010_v36 = vmov (!%p3078_p3), 0.0|0.0   ;;  %v3606_v37 = vpack.c.bf16 (!%p3078_p3), %v4184_v8, %v4179_v7  ;;  %vm4011_vm5 = vmmov (!%p3078_p3), 0   ;;  %v3079_v44 = vld [vmem:[%s4912_s5 + $0x8] sm:$0xf] (!%p3078_p3)  ;;  %s4013_s10 = smov (!%p3078_p3), 64   ;;  %s4014_s11 = smov (!%p3078_p3), 32  }
 0x9c8   :  { %759 = sbr.rel (%p3078_p3) target bundleno = 3224 (0xc98), region = 37  ;;  %3602 = vmatprep.subr.bf16.mxu0 (!%p3078_p3), %v4010_v36  ;;  %v4012_v38 = vmov (!%p3078_p3), 0.0   ;;  %v766_v39 = vld [vmem:[%s4912_s5] sm:$0xf] (!%p3078_p3)  ;;  %v853_v46 = vrot.slane (!%p3078_p3), %v3079_v44, 4  ;;  %vm760_vm6 = vcmp.gt.s32.totalorder (!%p3078_p3), %v4300_v51, 3 }
 0x9c9   :  { %3604 = vmatpush3.bf16.msra.mxu0 (!%p3078_p3), %v3603_v35  ;;  %3377 = vmatprep.mubr.msk.f32.mxu0 (!%p3078_p3), %vm4011_vm5, %v4012_v38  ;;  %s4016_s12 = smov (!%p3078_p3), 96  }
 0x9ca   :  { %3605 = vmatprep.subr.bf16.mxu0 (!%p3078_p3), %v4010_v36 }
 0x9cd   :  { %3607 = vmatpush3.bf16.msra.mxu0 (!%p3078_p3), %v3606_v37 }
 0x9d0   :  { %3378 = vmatmul.mubr.msk.f32.vlgmr.msra.gmra.mrb[0].mxu0 %vm114_vm3, %v766_v39 }
 0xaa3   :  { %v837_v40 = vpop.f32.mrb[0].mxu0 }
 0xaa4   :  { %v842_v41 = vrot.slane %v837_v40, 4  ;;  %v3379_v42 = vpop.f32.mrb[1].mxu0 }
 0xaa6   :  { %v844_v43 = vadd.f32 %v842_v41, %v4305_v54  ;;  %v4015_v54 = vmov 0  }
 0xaa7   :  { %3861 = vset.pattern.permute.xlu0 %v4015_v54  ;;  %v761_v55 = vsel %vm760_vm6, 1, %v4015_v54 }
 0xaa8   :  { %3862 = vtanh.f32 %v844_v43  ;;  %v3081_v47 = vmul.f32 -1.442695, %v844_v43 }
 0xaaa   :  { %3864 = vpow2.f32 %v3081_v47 }
 0xab2   :  { %v3863_v45 = vpop.eup %3862 }
 0xab3   :  { %859 = vrot.lane.b32.xlu0 %v3863_v45, %s4013_s10 }
 0xab4   :  { %v3865_v48 = vpop.eup %3864 }
 0xab5   :  { %v848_v49 = vadd.f32 1.0, %v3865_v48 }
 0xab7   :  { %854 = vrot.lane.b32.xlu0 %v853_v46, %s4014_s11  ;;  %3866 = vrcp.f32 %v848_v49 }
 0xabb   :  { %763 = vperm.xlu0 %3861, %v761_v55  }
 0xac1   :  { %v3867_v50 = vpop.eup %3866 }
 0xb25   :  { %v860_v52 = vpop.permute.xlu0 %859 }
 0xb26   :  { %v862_v53 = vmul.f32 %v3867_v50, %v860_v52 }
 0xb28   :  { %864 = vrot.lane.b32.xlu1 %v862_v53, %s4014_s11 }
 0xb29   :  { %v855_v57 = vpop.permute.xlu0 %854 }
 0xb2a   :  { %v857_v59 = vmul.f32 %v3867_v50, %v855_v57 }
 0xb3a   :  { %v764_v22 = vpop.permute.xlu0 %763 }
 0xb3b   :  { %vm765_vm7 = vcmp.eq.s32.totalorder %v764_v22, 1 }
 0xb9a   :  { %v865_v61 = vpop.permute.xlu1 %864 }
 0xb9b   :  { %v867_v62 = vadd.f32 %v865_v61, %v857_v59 }
 0xb9d   :  { %3868 = vtanh.f32 %v867_v62  ;;  %v882_v21 = vrot.slane %v867_v62, 4 }
 0xba7   :  { %v3869_v1 = vpop.eup %3868 }
 0xba8   :  { %870 = vrot.lane.b32.xlu1 %v3869_v1, %s4013_s10 }
 0xc1a   :  { %v871_v5 = vpop.permute.xlu1 %870 }
 0xc1b   :  { %v873_v19 = vmul.f32 %v3867_v50, %v871_v5 }
 0xc1d   :  { %v875_v20 = vrot.slane %v873_v19, 4 }
 0xc1f   :  { %876 = vrot.lane.b32.xlu1 %v875_v20, %s4014_s11 }
 0xc23   :  { %883 = vrot.lane.b32.xlu1 %v882_v21, %s4016_s12 }
 0xc91   :  { %v877_v23 = vpop.permute.xlu1 %876 }
 0xc92   :  { %v879_v24 = vsel %vm765_vm7, %v877_v23, %v766_v39  ;;  %v888_v25 = vsel %vm765_vm7, %v877_v23, 0.0 }
 0xc93   :  { %880 = vst.msk [vmem:[%s4912_s5] sm:$0xf] %vm339_vm0, %v879_v24  ;;  %889 = vst.msk [vmem:[#allocation2 + $0xc] sm:$0xf] %vm339_vm0, %v888_v25 }
 0xc95   :  { %v884_v26 = vpop.permute.xlu1 %883 }
 0xc96   :  { %v886_v27 = vsel %vm765_vm7, %v884_v26, %v3079_v44 }
 0xc97   :  { %3082 = vst.msk [vmem:[%s4912_s5 + $0x8] sm:$0xf] %vm339_vm0, %v886_v27 }
 0xc98 PF:  { %p3083_p4 = scmp.le.s32.totalorder %s4910_s3, 4 }
 0xc99   :  { %v3609_v56 = vpack.c.bf16 (!%p3083_p4), %v4174_v6, %v4145_v3  ;;  %v4017_v28 = vmov (!%p3083_p4), 0.0|0.0   ;;  %v3612_v29 = vpack.c.bf16 (!%p3083_p4), %v4184_v8, %v4179_v7  ;;  %vm4018_vm8 = vmmov (!%p3083_p4), 0   ;;  %s4021_s21 = smov (!%p3083_p4), 64   ;;  %s4022_s23 = smov (!%p3083_p4), 32  }
 0xc9a   :  { %893 = sbr.rel (%p3083_p4) target bundleno = 3942 (0xf66), region = 41  ;;  %3608 = vmatprep.subr.bf16.mxu0 (!%p3083_p4), %v4017_v28  ;;  %v4019_v30 = vmov (!%p3083_p4), 0.0   ;;  %v900_v31 = vld [vmem:[%s4912_s5] sm:$0xf] (!%p3083_p4)  ;;  %v4020_v35 = vmov (!%p3083_p4), 0   ;;  %vm894_vm9 = vcmp.gt.s32.totalorder (!%p3083_p4), %v4300_v51, 4 }
 0xc9b   :  { %3610 = vmatpush3.bf16.msra.mxu0 (!%p3083_p4), %v3609_v56  ;;  %3388 = vmatprep.mubr.msk.f32.mxu0 (!%p3083_p4), %vm4018_vm8, %v4019_v30  ;;  %v895_v44 = vsel (!%p3083_p4), %vm894_vm9, 1, %v4020_v35  ;;  %s4023_s24 = smov (!%p3083_p4), 96  }
 0xc9c   :  { %3611 = vmatprep.subr.bf16.mxu0 (!%p3083_p4), %v4017_v28  ;;  %3870 = vset.pattern.permute.xlu1 (!%p3083_p4), %v4020_v35 }
 0xc9d   :  { %3871 = vset.pattern.permute.xlu0 (!%p3083_p4), %v4020_v35 }
 0xc9e   :  { %v3084_v37 = vld [vmem:[%s4912_s5 + $0x8] sm:$0xf] (!%p3083_p4) }
 0xc9f   :  { %3613 = vmatpush3.bf16.msra.mxu0 (!%p3083_p4), %v3612_v29 }
 0xca2   :  { %3389 = vmatmul.mubr.msk.f32.vlgmr.msra.gmra.mrb[0].mxu0 %vm114_vm3, %v900_v31 }
 0xd75   :  { %v971_v32 = vpop.f32.mrb[0].mxu0 }
 0xd76   :  { %v975_v33 = vadd.f32 %v971_v32, %v4311_v60  ;;  %v3390_v34 = vpop.f32.mrb[1].mxu0 }
 0xd78   :  { %3872 = vtanh.f32 %v975_v33  ;;  %v3086_v38 = vmul.f32 -1.442695, %v975_v33 }
 0xd7a   :  { %3874 = vpow2.f32 %v3086_v38 }
 0xd82   :  { %v3873_v36 = vpop.eup %3872 }
 0xd83   :  { %989 = vrot.lane.b32.xlu0 %v3873_v36, %s4021_s21 }
 0xd84   :  { %v3875_v39 = vpop.eup %3874 }
 0xd85   :  { %v979_v40 = vadd.f32 1.0, %v3875_v39 }
 0xd87   :  { %984 = vrot.lane.b32.xlu0 %v3084_v37, %s4022_s23  ;;  %3876 = vrcp.f32 %v979_v40 }
 0xd91   :  { %v3877_v41 = vpop.eup %3876 }
 0xdf5   :  { %v990_v42 = vpop.permute.xlu0 %989 }
 0xdf6   :  { %v992_v43 = vmul.f32 %v3877_v41, %v990_v42 }
 0xdf8   :  { %994 = vrot.lane.b32.xlu1 %v992_v43, %s4022_s23 }
 0xdf9   :  { %v985_v45 = vpop.permute.xlu0 %984 }
 0xdfa   :  { %v987_v46 = vmul.f32 %v3877_v41, %v985_v45 }
 0xdfc   :  { %897 = vperm.xlu1 %3870, %v895_v44  }
 0xe00   :  { %1004 = vrot.lane.b32.xlu1 %v900_v31, %s4023_s24 }
 0xe6a   :  { %v995_v47 = vpop.permute.xlu1 %994 }
 0xe6b   :  { %v997_v48 = vadd.f32 %v995_v47, %v987_v46 }
 0xe6d   :  { %3878 = vtanh.f32 %v997_v48 }
 0xe77   :  { %v3879_v49 = vpop.eup %3878 }
 0xe78   :  { %1000 = vrot.lane.b32.xlu0 %v3879_v49, %s4021_s21 }
 0xe7b   :  { %v898_v50 = vpop.permute.xlu1 %897 }
 0xe7c   :  { %vm899_vm10 = vcmp.eq.s32.totalorder %v898_v50, 1 }
 0xe7d   :  { %v1013_v52 = vsel %vm899_vm10, %v997_v48, %v985_v45 }
 0xe7e   :  { %1015 = vrot.lane.b32.xlu1 %v1013_v52, %s4023_s24 }
 0xe7f   :  { %v1005_v54 = vpop.permute.xlu1 %1004 }
 0xeea   :  { %v1001_v53 = vpop.permute.xlu0 %1000 }
 0xeeb   :  { %v1003_v55 = vmul.f32 %v3877_v41, %v1001_v53 }
 0xeed   :  { %v1007_v57 = vsel %vm899_vm10, %v1003_v55, %v1005_v54  ;;  %v1019_v61 = vsel %vm899_vm10, %v1003_v55, 0.0 }
 0xeee   :  { %1009 = vrot.lane.b32.xlu0 %v1007_v57, %s4022_s23 }
 0xef0   :  { %v1016_v59 = vpop.permute.xlu1 %1015 }
 0xef1   :  { %3087 = vst.msk [vmem:[%s4912_s5 + $0x8] sm:$0xf] %vm339_vm0, %v1016_v59 }
 0xef2   :  { %1021 = vrot.lane.b32.xlu0 %v1019_v61, %s4022_s23 }
 0xf60   :  { %v1010_v62 = vpop.permute.xlu0 %1009 }
 0xf61   :  { %1012 = vst.msk [vmem:[%s4912_s5] sm:$0xf] %vm339_vm0, %v1010_v62 }
 0xf64   :  { %v1022_v1 = vpop.permute.xlu0 %1021 }
 0xf65   :  { %1024 = vst.msk [vmem:[#allocation2 + $0x10] sm:$0xf] %vm339_vm0, %v1022_v1 }
 0xf66 PF:  { %p3088_p5 = scmp.le.s32.totalorder %s4910_s3, 5 }
 0xf67   :  { %v3615_v5 = vpack.c.bf16 (!%p3088_p5), %v4174_v6, %v4145_v3  ;;  %v4024_v19 = vmov (!%p3088_p5), 0.0|0.0   ;;  %v3618_v20 = vpack.c.bf16 (!%p3088_p5), %v4184_v8, %v4179_v7  ;;  %vm4025_vm11 = vmmov (!%p3088_p5), 0   ;;  %v3089_v27 = vld [vmem:[%s4912_s5 + $0x8] sm:$0xf] (!%p3088_p5)  ;;  %s4027_s12 = smov (!%p3088_p5), 64   ;;  %s4028_s2 = smov (!%p3088_p5), 32  }
 0xf68   :  { %1028 = sbr.rel (%p3088_p5) target bundleno = 4664 (0x1238), region = 45  ;;  %3614 = vmatprep.subr.bf16.mxu0 (!%p3088_p5), %v4024_v19  ;;  %v4026_v21 = vmov (!%p3088_p5), 0.0   ;;  %v1035_v22 = vld [vmem:[%s4912_s5] sm:$0xf] (!%p3088_p5)  ;;  %v1122_v28 = vrot.slane (!%p3088_p5), %v3089_v27, 4  ;;  %vm1029_vm12 = vcmp.gt.s32.totalorder (!%p3088_p5), %v4300_v51, 5 }
 0xf69   :  { %3616 = vmatpush3.bf16.msra.mxu0 (!%p3088_p5), %v3615_v5  ;;  %3399 = vmatprep.mubr.msk.f32.mxu0 (!%p3088_p5), %vm4025_vm11, %v4026_v21  ;;  %s4030_s13 = smov (!%p3088_p5), 96  }
 0xf6a   :  { %3617 = vmatprep.subr.bf16.mxu0 (!%p3088_p5), %v4024_v19 }
 0xf6d   :  { %3619 = vmatpush3.bf16.msra.mxu0 (!%p3088_p5), %v3618_v20 }
 0xf70   :  { %3400 = vmatmul.mubr.msk.f32.vlgmr.msra.gmra.mrb[0].mxu0 %vm114_vm3, %v1035_v22 }
0x1043   :  { %v1106_v23 = vpop.f32.mrb[0].mxu0 }
0x1044   :  { %v1111_v24 = vrot.slane %v1106_v23, 4  ;;  %v3401_v25 = vpop.f32.mrb[1].mxu0 }
0x1046   :  { %v1113_v26 = vadd.f32 %v1111_v24, %v4311_v60  ;;  %v4029_v60 = vmov 0  }
0x1047   :  { %3880 = vset.pattern.permute.xlu0 %v4029_v60  ;;  %v1030_v35 = vsel %vm1029_vm12, 1, %v4029_v60 }
0x1048   :  { %3881 = vtanh.f32 %v1113_v26  ;;  %v3091_v29 = vmul.f32 -1.442695, %v1113_v26 }
0x104a   :  { %3883 = vpow2.f32 %v3091_v29 }
0x1052   :  { %v3882_v56 = vpop.eup %3881 }
0x1053   :  { %1128 = vrot.lane.b32.xlu0 %v3882_v56, %s4027_s12 }
0x1054   :  { %v3884_v30 = vpop.eup %3883 }
0x1055   :  { %v1117_v31 = vadd.f32 1.0, %v3884_v30 }
0x1057   :  { %1123 = vrot.lane.b32.xlu0 %v1122_v28, %s4028_s2  ;;  %3885 = vrcp.f32 %v1117_v31 }
0x105b   :  { %1032 = vperm.xlu0 %3880, %v1030_v35  }
0x1061   :  { %v3886_v32 = vpop.eup %3885 }
0x10c5   :  { %v1129_v33 = vpop.permute.xlu0 %1128 }
0x10c6   :  { %v1131_v34 = vmul.f32 %v3886_v32, %v1129_v33 }
0x10c8   :  { %1133 = vrot.lane.b32.xlu1 %v1131_v34, %s4028_s2 }
0x10c9   :  { %v1124_v36 = vpop.permute.xlu0 %1123 }
0x10ca   :  { %v1126_v37 = vmul.f32 %v3886_v32, %v1124_v36 }
0x10da   :  { %v1033_v45 = vpop.permute.xlu0 %1032 }
0x10db   :  { %vm1034_vm13 = vcmp.eq.s32.totalorder %v1033_v45, 1 }
0x113a   :  { %v1134_v38 = vpop.permute.xlu1 %1133 }
0x113b   :  { %v1136_v39 = vadd.f32 %v1134_v38, %v1126_v37 }
0x113d   :  { %3887 = vtanh.f32 %v1136_v39  ;;  %v1151_v44 = vrot.slane %v1136_v39, 4 }
0x1147   :  { %v3888_v40 = vpop.eup %3887 }
0x1148   :  { %1139 = vrot.lane.b32.xlu1 %v3888_v40, %s4027_s12 }
0x11ba   :  { %v1140_v41 = vpop.permute.xlu1 %1139 }
0x11bb   :  { %v1142_v42 = vmul.f32 %v3886_v32, %v1140_v41 }
0x11bd   :  { %v1144_v43 = vrot.slane %v1142_v42, 4 }
0x11bf   :  { %1145 = vrot.lane.b32.xlu1 %v1144_v43, %s4028_s2 }
0x11c3   :  { %1152 = vrot.lane.b32.xlu1 %v1151_v44, %s4030_s13 }
0x1231   :  { %v1146_v46 = vpop.permute.xlu1 %1145 }
0x1232   :  { %v1148_v47 = vsel %vm1034_vm13, %v1146_v46, %v1035_v22  ;;  %v1157_v48 = vsel %vm1034_vm13, %v1146_v46, 0.0 }
0x1233   :  { %1149 = vst.msk [vmem:[%s4912_s5] sm:$0xf] %vm339_vm0, %v1148_v47  ;;  %1158 = vst.msk [vmem:[#allocation2 + $0x14] sm:$0xf] %vm339_vm0, %v1157_v48 }
0x1235   :  { %v1153_v49 = vpop.permute.xlu1 %1152 }
0x1236   :  { %v1155_v50 = vsel %vm1034_vm13, %v1153_v49, %v3089_v27 }
0x1237   :  { %3092 = vst.msk [vmem:[%s4912_s5 + $0x8] sm:$0xf] %vm339_vm0, %v1155_v50 }
0x1238 PF:  { %p3093_p6 = scmp.le.s32.totalorder %s4910_s3, 6 }
0x1239   :  { %v3621_v52 = vpack.c.bf16 (!%p3093_p6), %v4174_v6, %v4145_v3  ;;  %v4031_v53 = vmov (!%p3093_p6), 0.0|0.0   ;;  %v3624_v54 = vpack.c.bf16 (!%p3093_p6), %v4184_v8, %v4179_v7  ;;  %vm4032_vm14 = vmmov (!%p3093_p6), 0   ;;  %s4035_s1 = smov (!%p3093_p6), 64   ;;  %s4036_s25 = smov (!%p3093_p6), 32  }
0x123a   :  { %1162 = sbr.rel (%p3093_p6) target bundleno = 5382 (0x1506), region = 49  ;;  %3620 = vmatprep.subr.bf16.mxu0 (!%p3093_p6), %v4031_v53  ;;  %v4033_v55 = vmov (!%p3093_p6), 0.0   ;;  %v1169_v57 = vld [vmem:[%s4912_s5] sm:$0xf] (!%p3093_p6)  ;;  %v4034_v1 = vmov (!%p3093_p6), 0   ;;  %vm1163_vm15 = vcmp.gt.s32.totalorder (!%p3093_p6), %v4300_v51, 6 }
0x123b   :  { %3622 = vmatpush3.bf16.msra.mxu0 (!%p3093_p6), %v3621_v52  ;;  %3410 = vmatprep.mubr.msk.f32.mxu0 (!%p3093_p6), %vm4032_vm14, %v4033_v55  ;;  %v1164_v26 = vsel (!%p3093_p6), %vm1163_vm15, 1, %v4034_v1  ;;  %s4037_s26 = smov (!%p3093_p6), 96  }
0x123c   :  { %3623 = vmatprep.subr.bf16.mxu0 (!%p3093_p6), %v4031_v53  ;;  %3889 = vset.pattern.permute.xlu1 (!%p3093_p6), %v4034_v1 }
0x123d   :  { %3890 = vset.pattern.permute.xlu0 (!%p3093_p6), %v4034_v1 }
0x123e   :  { %v3094_v19 = vld [vmem:[%s4912_s5 + $0x8] sm:$0xf] (!%p3093_p6) }
0x123f   :  { %3625 = vmatpush3.bf16.msra.mxu0 (!%p3093_p6), %v3624_v54 }
0x1242   :  { %3411 = vmatmul.mubr.msk.f32.vlgmr.msra.gmra.mrb[0].mxu0 %vm114_vm3, %v1169_v57 }
0x1315   :  { %v1240_v59 = vpop.f32.mrb[0].mxu0 }
0x1316   :  { %v1244_v61 = vadd.f32 %v1240_v59, %v4309_v58  ;;  %v3412_v62 = vpop.f32.mrb[1].mxu0 }
0x1318   :  { %3891 = vtanh.f32 %v1244_v61  ;;  %v3096_v20 = vmul.f32 -1.442695, %v1244_v61 }
0x131a   :  { %3893 = vpow2.f32 %v3096_v20 }
0x1322   :  { %v3892_v5 = vpop.eup %3891 }
0x1323   :  { %1258 = vrot.lane.b32.xlu0 %v3892_v5, %s4035_s1 }
0x1324   :  { %v3894_v21 = vpop.eup %3893 }
0x1325   :  { %v1248_v22 = vadd.f32 1.0, %v3894_v21 }
0x1327   :  { %1253 = vrot.lane.b32.xlu0 %v3094_v19, %s4036_s25  ;;  %3895 = vrcp.f32 %v1248_v22 }
0x1331   :  { %v3896_v23 = vpop.eup %3895 }
0x1395   :  { %v1259_v24 = vpop.permute.xlu0 %1258 }
0x1396   :  { %v1261_v25 = vmul.f32 %v3896_v23, %v1259_v24 }
0x1398   :  { %1263 = vrot.lane.b32.xlu1 %v1261_v25, %s4036_s25 }
0x1399   :  { %v1254_v27 = vpop.permute.xlu0 %1253 }
0x139a   :  { %v1256_v56 = vmul.f32 %v3896_v23, %v1254_v27 }
0x139c   :  { %1166 = vperm.xlu1 %3889, %v1164_v26  }
0x13a0   :  { %1273 = vrot.lane.b32.xlu1 %v1169_v57, %s4037_s26 }
0x140a   :  { %v1264_v28 = vpop.permute.xlu1 %1263 }
0x140b   :  { %v1266_v29 = vadd.f32 %v1264_v28, %v1256_v56 }
0x140d   :  { %3897 = vtanh.f32 %v1266_v29 }
0x1417   :  { %v3898_v30 = vpop.eup %3897 }
0x1418   :  { %1269 = vrot.lane.b32.xlu0 %v3898_v30, %s4035_s1 }
0x141b   :  { %v1167_v31 = vpop.permute.xlu1 %1166 }
0x141c   :  { %vm1168_vm4 = vcmp.eq.s32.totalorder %v1167_v31, 1 }
0x141d   :  { %v1282_v32 = vsel %vm1168_vm4, %v1266_v29, %v1254_v27 }
0x141e   :  { %1284 = vrot.lane.b32.xlu1 %v1282_v32, %s4037_s26 }
0x141f   :  { %v1274_v34 = vpop.permute.xlu1 %1273 }
0x148a   :  { %v1270_v33 = vpop.permute.xlu0 %1269 }
0x148b   :  { %v1272_v60 = vmul.f32 %v3896_v23, %v1270_v33 }
0x148d   :  { %v1276_v35 = vsel %vm1168_vm4, %v1272_v60, %v1274_v34  ;;  %v1288_v37 = vsel %vm1168_vm4, %v1272_v60, 0.0 }
0x148e   :  { %1278 = vrot.lane.b32.xlu0 %v1276_v35, %s4036_s25 }
0x1490   :  { %v1285_v36 = vpop.permute.xlu1 %1284 }
0x1491   :  { %3097 = vst.msk [vmem:[%s4912_s5 + $0x8] sm:$0xf] %vm339_vm0, %v1285_v36 }
0x1492   :  { %1290 = vrot.lane.b32.xlu0 %v1288_v37, %s4036_s25 }
0x1500   :  { %v1279_v38 = vpop.permute.xlu0 %1278 }
0x1501   :  { %1281 = vst.msk [vmem:[%s4912_s5] sm:$0xf] %vm339_vm0, %v1279_v38 }
0x1504   :  { %v1291_v39 = vpop.permute.xlu0 %1290 }
0x1505   :  { %1293 = vst.msk [vmem:[#allocation2 + $0x18] sm:$0xf] %vm339_vm0, %v1291_v39 }
0x1506 PF:  { %p3098_p7 = scmp.le.s32.totalorder %s4910_s3, 7 }
0x1507   :  { %v3627_v40 = vpack.c.bf16 (!%p3098_p7), %v4174_v6, %v4145_v3  ;;  %v4038_v41 = vmov (!%p3098_p7), 0.0|0.0   ;;  %v3630_v42 = vpack.c.bf16 (!%p3098_p7), %v4184_v8, %v4179_v7  ;;  %vm4039_vm5 = vmmov (!%p3098_p7), 0   ;;  %v3099_v7 = vld [vmem:[%s4912_s5 + $0x8] sm:$0xf] (!%p3098_p7)  ;;  %s4041_s13 = smov (!%p3098_p7), 64   ;;  %s4042_s14 = smov (!%p3098_p7), 32  }
0x1508   :  { %1297 = sbr.rel (%p3098_p7) target bundleno = 6104 (0x17d8), region = 53  ;;  %3626 = vmatprep.subr.bf16.mxu0 (!%p3098_p7), %v4038_v41  ;;  %v4040_v43 = vmov (!%p3098_p7), 0.0   ;;  %v1304_v44 = vld [vmem:[%s4912_s5] sm:$0xf] (!%p3098_p7)  ;;  %v1391_v47 = vrot.slane (!%p3098_p7), %v3099_v7, 4  ;;  %vm1298_vm6 = vcmp.gt.s32.totalorder (!%p3098_p7), %v4300_v51, 7 }
0x1509   :  { %3628 = vmatpush3.bf16.msra.mxu0 (!%p3098_p7), %v3627_v40  ;;  %3421 = vmatprep.mubr.msk.f32.mxu0 (!%p3098_p7), %vm4039_vm5, %v4040_v43  ;;  %s4044_s15 = smov (!%p3098_p7), 96  }
0x150a   :  { %3629 = vmatprep.subr.bf16.mxu0 (!%p3098_p7), %v4038_v41 }
0x150d   :  { %3631 = vmatpush3.bf16.msra.mxu0 (!%p3098_p7), %v3630_v42 }
0x1510   :  { %3422 = vmatmul.mubr.msk.f32.vlgmr.msra.gmra.mrb[0].mxu0 %vm114_vm3, %v1304_v44 }
0x15e3   :  { %v1375_v45 = vpop.f32.mrb[0].mxu0 }
0x15e4   :  { %v1380_v46 = vrot.slane %v1375_v45, 4  ;;  %v3423_v3 = vpop.f32.mrb[1].mxu0 }
0x15e6   :  { %v1382_v6 = vadd.f32 %v1380_v46, %v4309_v58  ;;  %v4043_v58 = vmov 0  }
0x15e7   :  { %3899 = vset.pattern.permute.xlu0 %v4043_v58  ;;  %v1299_v55 = vsel %vm1298_vm6, 1, %v4043_v58 }
0x15e8   :  { %3900 = vtanh.f32 %v1382_v6  ;;  %v3101_v48 = vmul.f32 -1.442695, %v1382_v6 }
0x15ea   :  { %3902 = vpow2.f32 %v3101_v48 }
0x15f2   :  { %v3901_v8 = vpop.eup %3900 }
0x15f3   :  { %1397 = vrot.lane.b32.xlu0 %v3901_v8, %s4041_s13 }
0x15f4   :  { %v3903_v49 = vpop.eup %3902 }
0x15f5   :  { %v1386_v50 = vadd.f32 1.0, %v3903_v49 }
0x15f7   :  { %1392 = vrot.lane.b32.xlu0 %v1391_v47, %s4042_s14  ;;  %3904 = vrcp.f32 %v1386_v50 }
0x15fb   :  { %1301 = vperm.xlu0 %3899, %v1299_v55  }
0x1601   :  { %v3905_v52 = vpop.eup %3904 }
0x1665   :  { %v1398_v53 = vpop.permute.xlu0 %1397 }
0x1666   :  { %v1400_v54 = vmul.f32 %v3905_v52, %v1398_v53 }
0x1668   :  { %1402 = vrot.lane.b32.xlu1 %v1400_v54, %s4042_s14 }
0x1669   :  { %v1393_v57 = vpop.permute.xlu0 %1392 }
0x166a   :  { %v1395_v59 = vmul.f32 %v3905_v52, %v1393_v57 }
0x167a   :  { %v1302_v22 = vpop.permute.xlu0 %1301 }
0x167b   :  { %vm1303_vm7 = vcmp.eq.s32.totalorder %v1302_v22, 1 }
0x16da   :  { %v1403_v61 = vpop.permute.xlu1 %1402 }
0x16db   :  { %v1405_v62 = vadd.f32 %v1403_v61, %v1395_v59 }
0x16dd   :  { %3906 = vtanh.f32 %v1405_v62  ;;  %v1420_v21 = vrot.slane %v1405_v62, 4 }
0x16e7   :  { %v3907_v1 = vpop.eup %3906 }
0x16e8   :  { %1408 = vrot.lane.b32.xlu1 %v3907_v1, %s4041_s13 }
0x175a   :  { %v1409_v5 = vpop.permute.xlu1 %1408 }
0x175b   :  { %v1411_v19 = vmul.f32 %v3905_v52, %v1409_v5 }
0x175d   :  { %v1413_v20 = vrot.slane %v1411_v19, 4 }
0x175f   :  { %1414 = vrot.lane.b32.xlu1 %v1413_v20, %s4042_s14 }
0x1763   :  { %1421 = vrot.lane.b32.xlu1 %v1420_v21, %s4044_s15 }
0x17d1   :  { %v1415_v23 = vpop.permute.xlu1 %1414 }
0x17d2   :  { %v1417_v24 = vsel %vm1303_vm7, %v1415_v23, %v1304_v44  ;;  %v1426_v25 = vsel %vm1303_vm7, %v1415_v23, 0.0 }
0x17d3   :  { %1418 = vst.msk [vmem:[%s4912_s5] sm:$0xf] %vm339_vm0, %v1417_v24  ;;  %1427 = vst.msk [vmem:[#allocation2 + $0x1c] sm:$0xf] %vm339_vm0, %v1426_v25 }
0x17d5   :  { %v1422_v26 = vpop.permute.xlu1 %1421 }
0x17d6   :  { %v1424_v27 = vsel %vm1303_vm7, %v1422_v26, %v3099_v7 }
0x17d7   :  { %3102 = vst.msk [vmem:[%s4912_s5 + $0x8] sm:$0xf] %vm339_vm0, %v1424_v27 }
0x17d8 PF:  { %v3632_v56 = vpack.c.bf16 %v4196_v11, %v4191_v10  ;;  %v3636_v28 = vpack.c.bf16 %v4206_v13, %v4201_v12  ;;  %v1428_v29 = vld [vmem:[#allocation2] sm:$0xff]  ;;  %v1430_v30 = vld [vmem:[#allocation2 + $0x10] sm:$0xff]  ;;  %v1429_v31 = vld [vmem:[#allocation2 + $0x8] sm:$0xff]  ;;  %v3641_v36 = vpack.c.bf16 (!%p3063_p0), %v4216_v15, %v4211_v14  ;;  %v4045_v37 = vmov (!%p3063_p0), 0.0|0.0   ;;  %s4049_s1 = smov (!%p3063_p0), 64   ;;  %s4050_s25 = smov (!%p3063_p0), 32  }
0x17d9   :  { %3432 = vmatprep.mubr.msk.f32.mxu0 %vm114_vm3, %v1428_v29  ;;  %3435 = vmatprep.mubr.msk.f32.mxu1 %vm114_vm3, %v1430_v30  ;;  %v3644_v38 = vpack.c.bf16 (!%p3063_p0), %v4226_v17, %v4221_v16  ;;  %vm4046_vm8 = vmmov (!%p3063_p0), 0   ;;  %v4047_v39 = vmov (!%p3063_p0), 0.0   ;;  %v4048_v43 = vmov (!%p3063_p0), 0   ;;  %v3110_v45 = vld [vmem:[%s4912_s5 + $0xc] sm:$0xf] (!%p3063_p0)  ;;  %s4051_s26 = smov (!%p3063_p0), 96  }
0x17da   :  { %3633 = vmatprep.subr.bf16.mxu0 %v3632_v56  ;;  %3706 = vmatprep.subr.bf16.mxu1 %v3632_v56  ;;  %v1431_v32 = vld [vmem:[#allocation2 + $0x18] sm:$0xff]  ;;  %vm1536_vm9 = vcmp.gt.s32.totalorder (!%p3063_p0), %v4300_v51, 0  ;;  %p3115_p8 = scmp.ne.s32.totalorder (!%p3063_p0), %s4910_s3, 1 }
0x17db   :  { %3635 = vmatpush3.bf16.msra.mxu0 %v3632_v56  ;;  %3708 = vmatpush3.bf16.msra.mxu1 %v3632_v56  ;;  %v1537_v48 = vsel (!%p3063_p0), %vm1536_vm9, 1, %v4048_v43 }
0x17dc   :  { %3637 = vmatprep.subr.bf16.mxu0 %v3636_v28  ;;  %3707 = vmatprep.subr.bf16.mxu1 %v3636_v28 }
0x17dd   :  { %3908 = vset.pattern.permute.xlu1 (!%p3063_p0), %v4048_v43  ;;  %3909 = vset.pattern.permute.xlu0 (!%p3063_p0), %v4048_v43 }
0x17df   :  { %3639 = vmatpush3.bf16.msra.mxu0 %v3636_v28  ;;  %3709 = vmatpush3.bf16.msra.mxu1 %v3636_v28 }
0x17e0   :  { %3640 = vmatprep.subr.bf16.mxu0 (!%p3063_p0), %v4045_v37 }
0x17e2   :  { %3433 = vmatmul.mubr.msk.f32.vlgmr.msra.gmra.mrb[0].mxu0 %vm114_vm3, %v1429_v31  ;;  %3436 = vmatmul.mubr.msk.f32.vlgmr.msra.gmra.mrb[0].mxu1 %vm114_vm3, %v1431_v32 }
0x17e3   :  { %3642 = vmatpush3.bf16.msra.mxu0 (!%p3063_p0), %v3641_v36  ;;  %3446 = vmatprep.mubr.msk.f32.mxu0 (!%p3063_p0), %vm4046_vm8, %v4047_v39 }
0x17e4   :  { %3643 = vmatprep.subr.bf16.mxu0 (!%p3063_p0), %v4045_v37 }
0x17e7   :  { %3645 = vmatpush3.bf16.msra.mxu0 (!%p3063_p0), %v3644_v38 }
0x18b1   :  { %1535 = sbr.rel (%p3063_p0) target bundleno = 7036 (0x1b7c), region = 57 }
0x18b5   :  { %v3434_v10 = vpop.f32.mrb[0].mxu0  ;;  %v3437_v11 = vpop.f32.mrb[0].mxu1 }
0x18b6   :  { %v4576_v12 = vadd.f32 %v3434_v10, %v4231_v18  ;;  %v4579_v13 = vadd.f32 %v3437_v11, %v4231_v18  ;;  %v1514_v33 = vpop.f32.mrb[1].mxu0  ;;  %v1524_v34 = vpop.f32.mrb[1].mxu1 }
0x18b7   :  { %v4582_v60 = vadd.f32 %v4231_v18, %v1514_v33  ;;  %v4585_v35 = vadd.f32 %v4231_v18, %v1524_v34  ;;  %v3109_v18 = vld [vmem:[%s4912_s5 + $0x4] sm:$0xf] (!%p3063_p0) }
0x18b8   :  { %3447 = vmatmul.mubr.msk.f32.vlgmr.msra.gmra.mrb[0].mxu0 %vm114_vm3, %v3109_v18  ;;  %s4052_s8 = smov (!%p3115_p8), 32  }
0x198b   :  { %v1613_v40 = vpop.f32.mrb[0].mxu0 }
0x198c   :  { %v1617_v41 = vadd.f32 %v1613_v40, %v4582_v60  ;;  %v3448_v42 = vpop.f32.mrb[1].mxu0 }
0x198e   :  { %3910 = vtanh.f32 %v1617_v41  ;;  %v3112_v46 = vmul.f32 -1.442695, %v1617_v41 }
0x1990   :  { %3912 = vpow2.f32 %v3112_v46 }
0x1998   :  { %v3911_v44 = vpop.eup %3910 }
0x1999   :  { %1631 = vrot.lane.b32.xlu0 %v3911_v44, %s4049_s1 }
0x199a   :  { %v3913_v3 = vpop.eup %3912 }
0x199b   :  { %v1621_v6 = vadd.f32 1.0, %v3913_v3 }
0x199d   :  { %1626 = vrot.lane.b32.xlu0 %v3110_v45, %s4050_s25  ;;  %3914 = vrcp.f32 %v1621_v6 }
0x19a7   :  { %v3915_v7 = vpop.eup %3914 }
0x1a0b   :  { %v1632_v8 = vpop.permute.xlu0 %1631 }
0x1a0c   :  { %v1634_v47 = vmul.f32 %v3915_v7, %v1632_v8 }
0x1a0e   :  { %1636 = vrot.lane.b32.xlu1 %v1634_v47, %s4050_s25 }
0x1a0f   :  { %v1627_v49 = vpop.permute.xlu0 %1626 }
0x1a10   :  { %v1629_v50 = vmul.f32 %v3915_v7, %v1627_v49 }
0x1a12   :  { %1539 = vperm.xlu1 %3908, %v1537_v48  }
0x1a16   :  { %1646 = vrot.lane.b32.xlu1 %v3109_v18, %s4051_s26 }
0x1a80   :  { %v1637_v52 = vpop.permute.xlu1 %1636 }
0x1a81   :  { %v1639_v53 = vadd.f32 %v1637_v52, %v1629_v50 }
0x1a83   :  { %3916 = vtanh.f32 %v1639_v53 }
0x1a8d   :  { %v3917_v54 = vpop.eup %3916 }
0x1a8e   :  { %1642 = vrot.lane.b32.xlu0 %v3917_v54, %s4049_s1 }
0x1a91   :  { %v1540_v58 = vpop.permute.xlu1 %1539 }
0x1a92   :  { %vm1541_vm10 = vcmp.eq.s32.totalorder %v1540_v58, 1 }
0x1a93   :  { %v1655_v55 = vsel %vm1541_vm10, %v1639_v53, %v1627_v49 }
0x1a94   :  { %1657 = vrot.lane.b32.xlu1 %v1655_v55, %s4051_s26 }
0x1a95   :  { %v1647_v59 = vpop.permute.xlu1 %1646 }
0x1b00   :  { %v1643_v57 = vpop.permute.xlu0 %1642 }
0x1b01   :  { %v1645_v61 = vmul.f32 %v3915_v7, %v1643_v57 }
0x1b03   :  { %v1649_v62 = vsel %vm1541_vm10, %v1645_v61, %v1647_v59  ;;  %v1665_v19 = vsel (!%p3115_p8), %vm1541_vm10, %v1645_v61, 0.0 }
0x1b04   :  { %1651 = vrot.lane.b32.xlu0 %v1649_v62, %s4050_s25 }
0x1b06   :  { %v1658_v1 = vpop.permute.xlu1 %1657 }
0x1b07   :  { %3114 = vst.msk [vmem:[%s4912_s5 + $0xc] sm:$0xf] %vm339_vm0, %v1658_v1 }
0x1b08   :  { %1667 = vrot.lane.b32.xlu0 (!%p3115_p8), %v1665_v19, %s4052_s8 }
0x1b71   :  { %1664 = sbr.rel (%p3115_p8) target bundleno = 7036 (0x1b7c), region = 61 }
0x1b76   :  { %v1652_v5 = vpop.permute.xlu0 %1651 }
0x1b77   :  { %3113 = vst.msk [vmem:[%s4912_s5 + $0x4] sm:$0xf] %vm339_vm0, %v1652_v5 }
0x1b7a   :  { %v1668_v20 = vpop.permute.xlu0 %1667 }
0x1b7b   :  { %1670 = vst.msk [vmem:[#allocation3] sm:$0xf] %vm339_vm0, %v1668_v20 }
0x1b7c PF:  { %1673 = sbr.rel (%p3068_p1) target bundleno = 7757 (0x1e4d), region = 65  ;;  %v3647_v21 = vpack.c.bf16 (!%p3068_p1), %v4216_v15, %v4211_v14  ;;  %v4053_v22 = vmov (!%p3068_p1), 0.0|0.0   ;;  %v3650_v23 = vpack.c.bf16 (!%p3068_p1), %v4226_v17, %v4221_v16  ;;  %vm4054_vm11 = vmmov (!%p3068_p1), 0   ;;  %v3118_v29 = vld [vmem:[%s4912_s5 + $0xc] sm:$0xf] (!%p3068_p1)  ;;  %s4056_s14 = smov (!%p3068_p1), 64  }
0x1b7d   :  { %3646 = vmatprep.subr.bf16.mxu0 (!%p3068_p1), %v4053_v22  ;;  %v4055_v24 = vmov (!%p3068_p1), 0.0   ;;  %v1767_v31 = vrot.slane (!%p3068_p1), %v3118_v29, 4  ;;  %s4057_s15 = smov (!%p3068_p1), 32   ;;  %vm1674_vm12 = vcmp.gt.s32.totalorder (!%p3068_p1), %v4300_v51, 1  ;;  %s4059_s0 = smov (!%p3068_p1), 96  }
0x1b7e   :  { %3648 = vmatpush3.bf16.msra.mxu0 (!%p3068_p1), %v3647_v21  ;;  %3457 = vmatprep.mubr.msk.f32.mxu0 (!%p3068_p1), %vm4054_vm11, %v4055_v24  ;;  %p3123_p9 = scmp.ne.s32.totalorder (!%p3068_p1), %s4910_s3, 2 }
0x1b7f   :  { %3649 = vmatprep.subr.bf16.mxu0 (!%p3068_p1), %v4053_v22 }
0x1b82   :  { %3651 = vmatpush3.bf16.msra.mxu0 (!%p3068_p1), %v3650_v23  ;;  %v3117_v25 = vld [vmem:[%s4912_s5 + $0x4] sm:$0xf] (!%p3068_p1) }
0x1b85   :  { %3458 = vmatmul.mubr.msk.f32.vlgmr.msra.gmra.mrb[0].mxu0 %vm114_vm3, %v3117_v25 }
0x1c58   :  { %v1751_v26 = vpop.f32.mrb[0].mxu0 }
0x1c59   :  { %v1756_v27 = vrot.slane %v1751_v26, 4  ;;  %v3459_v56 = vpop.f32.mrb[1].mxu0 }
0x1c5b   :  { %v1758_v28 = vadd.f32 %v1756_v27, %v4582_v60  ;;  %v4058_v60 = vmov 0  }
0x1c5c   :  { %3918 = vset.pattern.permute.xlu0 %v4058_v60  ;;  %v1675_v37 = vsel %vm1674_vm12, 1, %v4058_v60 }
0x1c5d   :  { %3919 = vtanh.f32 %v1758_v28  ;;  %v3120_v32 = vmul.f32 -1.442695, %v1758_v28 }
0x1c5f   :  { %3921 = vpow2.f32 %v3120_v32 }
0x1c67   :  { %v3920_v30 = vpop.eup %3919 }
0x1c68   :  { %1773 = vrot.lane.b32.xlu0 %v3920_v30, %s4056_s14 }
0x1c69   :  { %v3922_v10 = vpop.eup %3921 }
0x1c6a   :  { %v1762_v11 = vadd.f32 1.0, %v3922_v10 }
0x1c6c   :  { %1768 = vrot.lane.b32.xlu0 %v1767_v31, %s4057_s15  ;;  %3923 = vrcp.f32 %v1762_v11 }
0x1c70   :  { %1677 = vperm.xlu0 %3918, %v1675_v37  }
0x1c76   :  { %v3924_v33 = vpop.eup %3923 }
0x1cda   :  { %v1774_v34 = vpop.permute.xlu0 %1773 }
0x1cdb   :  { %v1776_v36 = vmul.f32 %v3924_v33, %v1774_v34 }
0x1cdd   :  { %1778 = vrot.lane.b32.xlu1 %v1776_v36, %s4057_s15 }
0x1cde   :  { %v1769_v38 = vpop.permute.xlu0 %1768 }
0x1cdf   :  { %v1771_v39 = vmul.f32 %v3924_v33, %v1769_v38 }
0x1cef   :  { %v1678_v46 = vpop.permute.xlu0 %1677 }
0x1cf0   :  { %vm1679_vm13 = vcmp.eq.s32.totalorder %v1678_v46, 1 }
0x1d4f   :  { %v1779_v18 = vpop.permute.xlu1 %1778 }
0x1d50   :  { %v1781_v40 = vadd.f32 %v1779_v18, %v1771_v39 }
0x1d52   :  { %3925 = vtanh.f32 %v1781_v40  ;;  %v1796_v45 = vrot.slane %v1781_v40, 4 }
0x1d5c   :  { %v3926_v41 = vpop.eup %3925 }
0x1d5d   :  { %1784 = vrot.lane.b32.xlu1 %v3926_v41, %s4056_s14 }
0x1dcf   :  { %v1785_v42 = vpop.permute.xlu1 %1784 }
0x1dd0   :  { %v1787_v43 = vmul.f32 %v3924_v33, %v1785_v42 }
0x1dd2   :  { %v1789_v44 = vrot.slane %v1787_v43, 4 }
0x1dd4   :  { %1790 = vrot.lane.b32.xlu1 %v1789_v44, %s4057_s15 }
0x1dd8   :  { %1797 = vrot.lane.b32.xlu1 %v1796_v45, %s4059_s0 }
0x1e46   :  { %v1791_v3 = vpop.permute.xlu1 %1790  ;;  %1805 = sbr.rel (%p3123_p9) target bundleno = 7757 (0x1e4d), region = 69 }
0x1e47   :  { %v1793_v6 = vsel %vm1679_vm13, %v1791_v3, %v3117_v25  ;;  %v1806_v47 = vsel (!%p3123_p9), %vm1679_vm13, %v1791_v3, 0.0 }
0x1e48   :  { %3121 = vst.msk [vmem:[%s4912_s5 + $0x4] sm:$0xf] %vm339_vm0, %v1793_v6  ;;  %1807 = vst.msk [vmem:[#allocation3] sm:$0xf] (!%p3123_p9), %vm339_vm0, %v1806_v47 }
0x1e4a   :  { %v1798_v7 = vpop.permute.xlu1 %1797 }
0x1e4b   :  { %v1800_v8 = vsel %vm1679_vm13, %v1798_v7, %v3118_v29 }
0x1e4c   :  { %3122 = vst.msk [vmem:[%s4912_s5 + $0xc] sm:$0xf] %vm339_vm0, %v1800_v8 }
0x1e4d PF:  { %1810 = sbr.rel (%p3073_p2) target bundleno = 8474 (0x211a), region = 73  ;;  %v3653_v48 = vpack.c.bf16 (!%p3073_p2), %v4216_v15, %v4211_v14  ;;  %v4060_v49 = vmov (!%p3073_p2), 0.0|0.0   ;;  %v3656_v50 = vpack.c.bf16 (!%p3073_p2), %v4226_v17, %v4221_v16  ;;  %vm4061_vm14 = vmmov (!%p3073_p2), 0   ;;  %s4064_s25 = smov (!%p3073_p2), 64  }
0x1e4e   :  { %3652 = vmatprep.subr.bf16.mxu0 (!%p3073_p2), %v4060_v49  ;;  %v4062_v52 = vmov (!%p3073_p2), 0.0   ;;  %v4063_v57 = vmov (!%p3073_p2), 0   ;;  %s4065_s28 = smov (!%p3073_p2), 32   ;;  %vm1811_vm15 = vcmp.gt.s32.totalorder (!%p3073_p2), %v4300_v51, 2  ;;  %s4066_s29 = smov (!%p3073_p2), 96  }
0x1e4f   :  { %3654 = vmatpush3.bf16.msra.mxu0 (!%p3073_p2), %v3653_v48  ;;  %3468 = vmatprep.mubr.msk.f32.mxu0 (!%p3073_p2), %vm4061_vm14, %v4062_v52  ;;  %v3125_v53 = vld [vmem:[%s4912_s5 + $0x4] sm:$0xf] (!%p3073_p2)  ;;  %v1812_v22 = vsel (!%p3073_p2), %vm1811_vm15, 1, %v4063_v57  ;;  %p3131_p10 = scmp.ne.s32.totalorder (!%p3073_p2), %s4910_s3, 3 }
0x1e50   :  { %3655 = vmatprep.subr.bf16.mxu0 (!%p3073_p2), %v4060_v49  ;;  %3927 = vset.pattern.permute.xlu1 (!%p3073_p2), %v4063_v57 }
0x1e51   :  { %3928 = vset.pattern.permute.xlu0 (!%p3073_p2), %v4063_v57 }
0x1e53   :  { %3657 = vmatpush3.bf16.msra.mxu0 (!%p3073_p2), %v3656_v50  ;;  %v3126_v61 = vld [vmem:[%s4912_s5 + $0xc] sm:$0xf] (!%p3073_p2) }
0x1e54   :  { %s4067_s11 = smov (!%p3131_p10), 32  }
0x1e56   :  { %3469 = vmatmul.mubr.msk.f32.vlgmr.msra.gmra.mrb[0].mxu0 %vm114_vm3, %v3125_v53 }
0x1f29   :  { %v1888_v54 = vpop.f32.mrb[0].mxu0 }
0x1f2a   :  { %v1892_v58 = vadd.f32 %v1888_v54, %v4576_v12  ;;  %v3470_v55 = vpop.f32.mrb[1].mxu0 }
0x1f2c   :  { %3929 = vtanh.f32 %v1892_v58  ;;  %v3128_v62 = vmul.f32 -1.442695, %v1892_v58 }
0x1f2e   :  { %3931 = vpow2.f32 %v3128_v62 }
0x1f36   :  { %v3930_v59 = vpop.eup %3929 }
0x1f37   :  { %1906 = vrot.lane.b32.xlu0 %v3930_v59, %s4064_s25 }
0x1f38   :  { %v3932_v1 = vpop.eup %3931 }
0x1f39   :  { %v1896_v5 = vadd.f32 1.0, %v3932_v1 }
0x1f3b   :  { %1901 = vrot.lane.b32.xlu0 %v3126_v61, %s4065_s28  ;;  %3933 = vrcp.f32 %v1896_v5 }
0x1f45   :  { %v3934_v19 = vpop.eup %3933 }
0x1fa9   :  { %v1907_v20 = vpop.permute.xlu0 %1906 }
0x1faa   :  { %v1909_v21 = vmul.f32 %v3934_v19, %v1907_v20 }
0x1fac   :  { %1911 = vrot.lane.b32.xlu1 %v1909_v21, %s4065_s28 }
0x1fad   :  { %v1902_v23 = vpop.permute.xlu0 %1901 }
0x1fae   :  { %v1904_v24 = vmul.f32 %v3934_v19, %v1902_v23 }
0x1fb0   :  { %1814 = vperm.xlu1 %3927, %v1812_v22  }
0x1fb4   :  { %1921 = vrot.lane.b32.xlu1 %v3125_v53, %s4066_s29 }
0x201e   :  { %v1912_v25 = vpop.permute.xlu1 %1911 }
0x201f   :  { %v1914_v26 = vadd.f32 %v1912_v25, %v1904_v24 }
0x2021   :  { %3935 = vtanh.f32 %v1914_v26 }
0x202b   :  { %v3936_v27 = vpop.eup %3935 }
0x202c   :  { %1917 = vrot.lane.b32.xlu0 %v3936_v27, %s4064_s25 }
0x202f   :  { %v1815_v56 = vpop.permute.xlu1 %1814 }
0x2030   :  { %vm1816_vm4 = vcmp.eq.s32.totalorder %v1815_v56, 1 }
0x2031   :  { %v1930_v28 = vsel %vm1816_vm4, %v1914_v26, %v1902_v23 }
0x2032   :  { %1932 = vrot.lane.b32.xlu1 %v1930_v28, %s4066_s29 }
0x2033   :  { %v1922_v30 = vpop.permute.xlu1 %1921 }
0x209e   :  { %v1918_v29 = vpop.permute.xlu0 %1917 }
0x209f   :  { %v1920_v31 = vmul.f32 %v3934_v19, %v1918_v29 }
0x20a1   :  { %v1924_v32 = vsel %vm1816_vm4, %v1920_v31, %v1922_v30  ;;  %v1940_v33 = vsel (!%p3131_p10), %vm1816_vm4, %v1920_v31, 0.0 }
0x20a2   :  { %1926 = vrot.lane.b32.xlu0 %v1924_v32, %s4065_s28 }
0x20a4   :  { %v1933_v10 = vpop.permute.xlu1 %1932 }
0x20a5   :  { %3130 = vst.msk [vmem:[%s4912_s5 + $0xc] sm:$0xf] %vm339_vm0, %v1933_v10 }
0x20a6   :  { %1942 = vrot.lane.b32.xlu0 (!%p3131_p10), %v1940_v33, %s4067_s11 }
0x210f   :  { %1939 = sbr.rel (%p3131_p10) target bundleno = 8474 (0x211a), region = 77 }
0x2114   :  { %v1927_v11 = vpop.permute.xlu0 %1926 }
0x2115   :  { %3129 = vst.msk [vmem:[%s4912_s5 + $0x4] sm:$0xf] %vm339_vm0, %v1927_v11 }
0x2118   :  { %v1943_v34 = vpop.permute.xlu0 %1942 }
0x2119   :  { %1945 = vst.msk [vmem:[#allocation3] sm:$0xf] %vm339_vm0, %v1943_v34 }
0x211a PF:  { %1948 = sbr.rel (%p3078_p3) target bundleno = 9195 (0x23eb), region = 81  ;;  %v3659_v36 = vpack.c.bf16 (!%p3078_p3), %v4216_v15, %v4211_v14  ;;  %v4068_v60 = vmov (!%p3078_p3), 0.0|0.0   ;;  %v3662_v37 = vpack.c.bf16 (!%p3078_p3), %v4226_v17, %v4221_v16  ;;  %vm4069_vm5 = vmmov (!%p3078_p3), 0   ;;  %v3134_v43 = vld [vmem:[%s4912_s5 + $0xc] sm:$0xf] (!%p3078_p3)  ;;  %s4071_s16 = smov (!%p3078_p3), 64  }
0x211b   :  { %3658 = vmatprep.subr.bf16.mxu0 (!%p3078_p3), %v4068_v60  ;;  %v4070_v38 = vmov (!%p3078_p3), 0.0   ;;  %v2042_v45 = vrot.slane (!%p3078_p3), %v3134_v43, 4  ;;  %s4072_s17 = smov (!%p3078_p3), 32   ;;  %vm1949_vm6 = vcmp.gt.s32.totalorder (!%p3078_p3), %v4300_v51, 3  ;;  %s4074_s18 = smov (!%p3078_p3), 96  }
0x211c   :  { %3660 = vmatpush3.bf16.msra.mxu0 (!%p3078_p3), %v3659_v36  ;;  %3479 = vmatprep.mubr.msk.f32.mxu0 (!%p3078_p3), %vm4069_vm5, %v4070_v38  ;;  %p3139_p11 = scmp.ne.s32.totalorder (!%p3078_p3), %s4910_s3, 4 }
0x211d   :  { %3661 = vmatprep.subr.bf16.mxu0 (!%p3078_p3), %v4068_v60 }
0x2120   :  { %3663 = vmatpush3.bf16.msra.mxu0 (!%p3078_p3), %v3662_v37  ;;  %v3133_v39 = vld [vmem:[%s4912_s5 + $0x4] sm:$0xf] (!%p3078_p3) }
0x2123   :  { %3480 = vmatmul.mubr.msk.f32.vlgmr.msra.gmra.mrb[0].mxu0 %vm114_vm3, %v3133_v39 }
0x21f6   :  { %v2026_v18 = vpop.f32.mrb[0].mxu0 }
0x21f7   :  { %v2031_v40 = vrot.slane %v2026_v18, 4  ;;  %v3481_v41 = vpop.f32.mrb[1].mxu0 }
0x21f9   :  { %v2033_v42 = vadd.f32 %v2031_v40, %v4576_v12  ;;  %v4073_v12 = vmov 0  }
0x21fa   :  { %3937 = vset.pattern.permute.xlu0 %v4073_v12  ;;  %v1950_v48 = vsel %vm1949_vm6, 1, %v4073_v12 }
0x21fb   :  { %3938 = vtanh.f32 %v2033_v42  ;;  %v3136_v46 = vmul.f32 -1.442695, %v2033_v42 }
0x21fd   :  { %3940 = vpow2.f32 %v3136_v46 }
0x2205   :  { %v3939_v44 = vpop.eup %3938 }
0x2206   :  { %2048 = vrot.lane.b32.xlu0 %v3939_v44, %s4071_s16 }
0x2207   :  { %v3941_v3 = vpop.eup %3940 }
0x2208   :  { %v2037_v6 = vadd.f32 1.0, %v3941_v3 }
0x220a   :  { %2043 = vrot.lane.b32.xlu0 %v2042_v45, %s4072_s17  ;;  %3942 = vrcp.f32 %v2037_v6 }
0x220e   :  { %1952 = vperm.xlu0 %3937, %v1950_v48  }
0x2214   :  { %v3943_v7 = vpop.eup %3942 }
0x2278   :  { %v2049_v8 = vpop.permute.xlu0 %2048 }
0x2279   :  { %v2051_v47 = vmul.f32 %v3943_v7, %v2049_v8 }
0x227b   :  { %2053 = vrot.lane.b32.xlu1 %v2051_v47, %s4072_s17 }
0x227c   :  { %v2044_v49 = vpop.permute.xlu0 %2043 }
0x227d   :  { %v2046_v50 = vmul.f32 %v3943_v7, %v2044_v49 }
0x228d   :  { %v1953_v61 = vpop.permute.xlu0 %1952 }
0x228e   :  { %vm1954_vm7 = vcmp.eq.s32.totalorder %v1953_v61, 1 }
0x22ed   :  { %v2054_v52 = vpop.permute.xlu1 %2053 }
0x22ee   :  { %v2056_v53 = vadd.f32 %v2054_v52, %v2046_v50 }
0x22f0   :  { %3944 = vtanh.f32 %v2056_v53  ;;  %v2071_v59 = vrot.slane %v2056_v53, 4 }
0x22fa   :  { %v3945_v54 = vpop.eup %3944 }
0x22fb   :  { %2059 = vrot.lane.b32.xlu1 %v3945_v54, %s4071_s16 }
0x236d   :  { %v2060_v58 = vpop.permute.xlu1 %2059 }
0x236e   :  { %v2062_v55 = vmul.f32 %v3943_v7, %v2060_v58 }
0x2370   :  { %v2064_v57 = vrot.slane %v2062_v55, 4 }
0x2372   :  { %2065 = vrot.lane.b32.xlu1 %v2064_v57, %s4072_s17 }
0x2376   :  { %2072 = vrot.lane.b32.xlu1 %v2071_v59, %s4074_s18 }
0x23e4   :  { %v2066_v62 = vpop.permute.xlu1 %2065  ;;  %2080 = sbr.rel (%p3139_p11) target bundleno = 9195 (0x23eb), region = 85 }
0x23e5   :  { %v2068_v1 = vsel %vm1954_vm7, %v2066_v62, %v3133_v39  ;;  %v2081_v20 = vsel (!%p3139_p11), %vm1954_vm7, %v2066_v62, 0.0 }
0x23e6   :  { %3137 = vst.msk [vmem:[%s4912_s5 + $0x4] sm:$0xf] %vm339_vm0, %v2068_v1  ;;  %2082 = vst.msk [vmem:[#allocation3] sm:$0xf] (!%p3139_p11), %vm339_vm0, %v2081_v20 }
0x23e8   :  { %v2073_v5 = vpop.permute.xlu1 %2072 }
0x23e9   :  { %v2075_v19 = vsel %vm1954_vm7, %v2073_v5, %v3134_v43 }
0x23ea   :  { %3138 = vst.msk [vmem:[%s4912_s5 + $0xc] sm:$0xf] %vm339_vm0, %v2075_v19 }
0x23eb PF:  { %2085 = sbr.rel (%p3083_p4) target bundleno = 9912 (0x26b8), region = 89  ;;  %v3665_v21 = vpack.c.bf16 (!%p3083_p4), %v4216_v15, %v4211_v14  ;;  %v4075_v22 = vmov (!%p3083_p4), 0.0|0.0   ;;  %v3668_v23 = vpack.c.bf16 (!%p3083_p4), %v4226_v17, %v4221_v16  ;;  %vm4076_vm8 = vmmov (!%p3083_p4), 0   ;;  %s4079_s28 = smov (!%p3083_p4), 64  }
0x23ec   :  { %3664 = vmatprep.subr.bf16.mxu0 (!%p3083_p4), %v4075_v22  ;;  %v4077_v24 = vmov (!%p3083_p4), 0.0   ;;  %v4078_v28 = vmov (!%p3083_p4), 0   ;;  %s4080_s6 = smov (!%p3083_p4), 32   ;;  %vm2086_vm9 = vcmp.gt.s32.totalorder (!%p3083_p4), %v4300_v51, 4  ;;  %s4081_s7 = smov (!%p3083_p4), 96  }
0x23ed   :  { %3666 = vmatpush3.bf16.msra.mxu0 (!%p3083_p4), %v3665_v21  ;;  %3490 = vmatprep.mubr.msk.f32.mxu0 (!%p3083_p4), %vm4076_vm8, %v4077_v24  ;;  %v3141_v25 = vld [vmem:[%s4912_s5 + $0x4] sm:$0xf] (!%p3083_p4)  ;;  %v2087_v36 = vsel (!%p3083_p4), %vm2086_vm9, 1, %v4078_v28  ;;  %p3147_p12 = scmp.ne.s32.totalorder (!%p3083_p4), %s4910_s3, 5 }
0x23ee   :  { %3667 = vmatprep.subr.bf16.mxu0 (!%p3083_p4), %v4075_v22  ;;  %3946 = vset.pattern.permute.xlu1 (!%p3083_p4), %v4078_v28 }
0x23ef   :  { %3947 = vset.pattern.permute.xlu0 (!%p3083_p4), %v4078_v28 }
0x23f1   :  { %3669 = vmatpush3.bf16.msra.mxu0 (!%p3083_p4), %v3668_v23  ;;  %v3142_v30 = vld [vmem:[%s4912_s5 + $0xc] sm:$0xf] (!%p3083_p4) }
0x23f2   :  { %s4082_s13 = smov (!%p3147_p12), 32  }
0x23f4   :  { %3491 = vmatmul.mubr.msk.f32.vlgmr.msra.gmra.mrb[0].mxu0 %vm114_vm3, %v3141_v25 }
0x24c7   :  { %v2163_v26 = vpop.f32.mrb[0].mxu0 }
0x24c8   :  { %v2167_v27 = vadd.f32 %v2163_v26, %v4585_v35  ;;  %v3492_v56 = vpop.f32.mrb[1].mxu0 }
0x24ca   :  { %3948 = vtanh.f32 %v2167_v27  ;;  %v3144_v31 = vmul.f32 -1.442695, %v2167_v27 }
0x24cc   :  { %3950 = vpow2.f32 %v3144_v31 }
0x24d4   :  { %v3949_v29 = vpop.eup %3948 }
0x24d5   :  { %2181 = vrot.lane.b32.xlu0 %v3949_v29, %s4079_s28 }
0x24d6   :  { %v3951_v32 = vpop.eup %3950 }
0x24d7   :  { %v2171_v10 = vadd.f32 1.0, %v3951_v32 }
0x24d9   :  { %2176 = vrot.lane.b32.xlu0 %v3142_v30, %s4080_s6  ;;  %3952 = vrcp.f32 %v2171_v10 }
0x24e3   :  { %v3953_v11 = vpop.eup %3952 }
0x2547   :  { %v2182_v33 = vpop.permute.xlu0 %2181 }
0x2548   :  { %v2184_v34 = vmul.f32 %v3953_v11, %v2182_v33 }
0x254a   :  { %2186 = vrot.lane.b32.xlu1 %v2184_v34, %s4080_s6 }
0x254b   :  { %v2177_v60 = vpop.permute.xlu0 %2176 }
0x254c   :  { %v2179_v37 = vmul.f32 %v3953_v11, %v2177_v60 }
0x254e   :  { %2089 = vperm.xlu1 %3946, %v2087_v36  }
0x2552   :  { %2196 = vrot.lane.b32.xlu1 %v3141_v25, %s4081_s7 }
0x25bc   :  { %v2187_v38 = vpop.permute.xlu1 %2186 }
0x25bd   :  { %v2189_v39 = vadd.f32 %v2187_v38, %v2179_v37 }
0x25bf   :  { %3954 = vtanh.f32 %v2189_v39 }
0x25c9   :  { %v3955_v18 = vpop.eup %3954 }
0x25ca   :  { %2192 = vrot.lane.b32.xlu0 %v3955_v18, %s4079_s28 }
0x25cd   :  { %v2090_v40 = vpop.permute.xlu1 %2089 }
0x25ce   :  { %vm2091_vm10 = vcmp.eq.s32.totalorder %v2090_v40, 1 }
0x25cf   :  { %v2205_v41 = vsel %vm2091_vm10, %v2189_v39, %v2177_v60 }
0x25d0   :  { %2207 = vrot.lane.b32.xlu1 %v2205_v41, %s4081_s7 }
0x25d1   :  { %v2197_v43 = vpop.permute.xlu1 %2196 }
0x263c   :  { %v2193_v42 = vpop.permute.xlu0 %2192 }
0x263d   :  { %v2195_v44 = vmul.f32 %v3953_v11, %v2193_v42 }
0x263f   :  { %v2199_v45 = vsel %vm2091_vm10, %v2195_v44, %v2197_v43  ;;  %v2215_v6 = vsel (!%p3147_p12), %vm2091_vm10, %v2195_v44, 0.0 }
0x2640   :  { %2201 = vrot.lane.b32.xlu0 %v2199_v45, %s4080_s6 }
0x2642   :  { %v2208_v46 = vpop.permute.xlu1 %2207 }
0x2643   :  { %3146 = vst.msk [vmem:[%s4912_s5 + $0xc] sm:$0xf] %vm339_vm0, %v2208_v46 }
0x2644   :  { %2217 = vrot.lane.b32.xlu0 (!%p3147_p12), %v2215_v6, %s4082_s13 }
0x26ad   :  { %2214 = sbr.rel (%p3147_p12) target bundleno = 9912 (0x26b8), region = 93 }
0x26b2   :  { %v2202_v3 = vpop.permute.xlu0 %2201 }
0x26b3   :  { %3145 = vst.msk [vmem:[%s4912_s5 + $0x4] sm:$0xf] %vm339_vm0, %v2202_v3 }
0x26b6   :  { %v2218_v7 = vpop.permute.xlu0 %2217 }
0x26b7   :  { %2220 = vst.msk [vmem:[#allocation3] sm:$0xf] %vm339_vm0, %v2218_v7 }
0x26b8 PF:  { %2223 = sbr.rel (%p3088_p5) target bundleno = 10633 (0x2989), region = 97  ;;  %v3671_v8 = vpack.c.bf16 (!%p3088_p5), %v4216_v15, %v4211_v14  ;;  %v4083_v47 = vmov (!%p3088_p5), 0.0|0.0   ;;  %v3674_v12 = vpack.c.bf16 (!%p3088_p5), %v4226_v17, %v4221_v16  ;;  %vm4084_vm11 = vmmov (!%p3088_p5), 0   ;;  %v3150_v58 = vld [vmem:[%s4912_s5 + $0xc] sm:$0xf] (!%p3088_p5)  ;;  %s4086_s19 = smov (!%p3088_p5), 64  }
0x26b9   :  { %3670 = vmatprep.subr.bf16.mxu0 (!%p3088_p5), %v4083_v47  ;;  %v4085_v48 = vmov (!%p3088_p5), 0.0   ;;  %v2317_v57 = vrot.slane (!%p3088_p5), %v3150_v58, 4  ;;  %s4087_s20 = smov (!%p3088_p5), 32   ;;  %vm2224_vm12 = vcmp.gt.s32.totalorder (!%p3088_p5), %v4300_v51, 5  ;;  %s4089_s21 = smov (!%p3088_p5), 96  }
0x26ba   :  { %3672 = vmatpush3.bf16.msra.mxu0 (!%p3088_p5), %v3671_v8  ;;  %3501 = vmatprep.mubr.msk.f32.mxu0 (!%p3088_p5), %vm4084_vm11, %v4085_v48  ;;  %p3155_p13 = scmp.ne.s32.totalorder (!%p3088_p5), %s4910_s3, 6 }
0x26bb   :  { %3673 = vmatprep.subr.bf16.mxu0 (!%p3088_p5), %v4083_v47 }
0x26be   :  { %3675 = vmatpush3.bf16.msra.mxu0 (!%p3088_p5), %v3674_v12  ;;  %v3149_v49 = vld [vmem:[%s4912_s5 + $0x4] sm:$0xf] (!%p3088_p5) }
0x26c1   :  { %3502 = vmatmul.mubr.msk.f32.vlgmr.msra.gmra.mrb[0].mxu0 %vm114_vm3, %v3149_v49 }
0x2794   :  { %v2301_v50 = vpop.f32.mrb[0].mxu0 }
0x2795   :  { %v2306_v52 = vrot.slane %v2301_v50, 4  ;;  %v3503_v53 = vpop.f32.mrb[1].mxu0 }
0x2797   :  { %v2308_v54 = vadd.f32 %v2306_v52, %v4585_v35  ;;  %v4088_v35 = vmov 0  }
0x2798   :  { %3956 = vset.pattern.permute.xlu0 %v4088_v35  ;;  %v2225_v20 = vsel %vm2224_vm12, 1, %v4088_v35 }
0x2799   :  { %3957 = vtanh.f32 %v2308_v54  ;;  %v3152_v59 = vmul.f32 -1.442695, %v2308_v54 }
0x279b   :  { %3959 = vpow2.f32 %v3152_v59 }
0x27a3   :  { %v3958_v55 = vpop.eup %3957 }
0x27a4   :  { %2323 = vrot.lane.b32.xlu0 %v3958_v55, %s4086_s19 }
0x27a5   :  { %v3960_v61 = vpop.eup %3959 }
0x27a6   :  { %v2312_v62 = vadd.f32 1.0, %v3960_v61 }
0x27a8   :  { %2318 = vrot.lane.b32.xlu0 %v2317_v57, %s4087_s20  ;;  %3961 = vrcp.f32 %v2312_v62 }
0x27ac   :  { %2227 = vperm.xlu0 %3956, %v2225_v20  }
0x27b2   :  { %v3962_v1 = vpop.eup %3961 }
0x2816   :  { %v2324_v5 = vpop.permute.xlu0 %2323 }
0x2817   :  { %v2326_v19 = vmul.f32 %v3962_v1, %v2324_v5 }
0x2819   :  { %2328 = vrot.lane.b32.xlu1 %v2326_v19, %s4087_s20 }
0x281a   :  { %v2319_v21 = vpop.permute.xlu0 %2318 }
0x281b   :  { %v2321_v22 = vmul.f32 %v3962_v1, %v2319_v21 }
0x282b   :  { %v2228_v29 = vpop.permute.xlu0 %2227 }
0x282c   :  { %vm2229_vm13 = vcmp.eq.s32.totalorder %v2228_v29, 1 }
0x288b   :  { %v2329_v23 = vpop.permute.xlu1 %2328 }
0x288c   :  { %v2331_v24 = vadd.f32 %v2329_v23, %v2321_v22 }
0x288e   :  { %3963 = vtanh.f32 %v2331_v24  ;;  %v2346_v28 = vrot.slane %v2331_v24, 4 }
0x2898   :  { %v3964_v25 = vpop.eup %3963 }
0x2899   :  { %2334 = vrot.lane.b32.xlu1 %v3964_v25, %s4086_s19 }
0x290b   :  { %v2335_v26 = vpop.permute.xlu1 %2334 }
0x290c   :  { %v2337_v27 = vmul.f32 %v3962_v1, %v2335_v26 }
0x290e   :  { %v2339_v56 = vrot.slane %v2337_v27, 4 }
0x2910   :  { %2340 = vrot.lane.b32.xlu1 %v2339_v56, %s4087_s20 }
0x2914   :  { %2347 = vrot.lane.b32.xlu1 %v2346_v28, %s4089_s21 }
0x2982   :  { %v2341_v30 = vpop.permute.xlu1 %2340  ;;  %2355 = sbr.rel (%p3155_p13) target bundleno = 10633 (0x2989), region = 101 }
0x2983   :  { %v2343_v31 = vsel %vm2229_vm13, %v2341_v30, %v3149_v49  ;;  %v2356_v11 = vsel (!%p3155_p13), %vm2229_vm13, %v2341_v30, 0.0 }
0x2984   :  { %3153 = vst.msk [vmem:[%s4912_s5 + $0x4] sm:$0xf] %vm339_vm0, %v2343_v31  ;;  %2357 = vst.msk [vmem:[#allocation3] sm:$0xf] (!%p3155_p13), %vm339_vm0, %v2356_v11 }
0x2986   :  { %v2348_v32 = vpop.permute.xlu1 %2347 }
0x2987   :  { %v2350_v10 = vsel %vm2229_vm13, %v2348_v32, %v3150_v58 }
0x2988   :  { %3154 = vst.msk [vmem:[%s4912_s5 + $0xc] sm:$0xf] %vm339_vm0, %v2350_v10 }
0x2989 PF:  { %2360 = sbr.rel (%p3093_p6) target bundleno = 11350 (0x2c56), region = 105  ;;  %v3677_v33 = vpack.c.bf16 (!%p3093_p6), %v4216_v15, %v4211_v14  ;;  %v4090_v34 = vmov (!%p3093_p6), 0.0|0.0   ;;  %v3680_v36 = vpack.c.bf16 (!%p3093_p6), %v4226_v17, %v4221_v16  ;;  %vm4091_vm14 = vmmov (!%p3093_p6), 0   ;;  %s4094_s6 = smov (!%p3093_p6), 64  }
0x298a   :  { %3676 = vmatprep.subr.bf16.mxu0 (!%p3093_p6), %v4090_v34  ;;  %v4092_v60 = vmov (!%p3093_p6), 0.0   ;;  %v4093_v40 = vmov (!%p3093_p6), 0   ;;  %s4095_s9 = smov (!%p3093_p6), 32   ;;  %vm2361_vm15 = vcmp.gt.s32.totalorder (!%p3093_p6), %v4300_v51, 6  ;;  %s4096_s10 = smov (!%p3093_p6), 96  }
0x298b   :  { %3678 = vmatpush3.bf16.msra.mxu0 (!%p3093_p6), %v3677_v33  ;;  %3512 = vmatprep.mubr.msk.f32.mxu0 (!%p3093_p6), %vm4091_vm14, %v4092_v60  ;;  %v3157_v37 = vld [vmem:[%s4912_s5 + $0x4] sm:$0xf] (!%p3093_p6)  ;;  %v2362_v7 = vsel (!%p3093_p6), %vm2361_vm15, 1, %v4093_v40  ;;  %p3163_p0 = scmp.ne.s32.totalorder (!%p3093_p6), %s4910_s3, 7 }
0x298c   :  { %3679 = vmatprep.subr.bf16.mxu0 (!%p3093_p6), %v4090_v34  ;;  %3965 = vset.pattern.permute.xlu1 (!%p3093_p6), %v4093_v40 }
0x298d   :  { %3966 = vset.pattern.permute.xlu0 (!%p3093_p6), %v4093_v40 }
0x298f   :  { %3681 = vmatpush3.bf16.msra.mxu0 (!%p3093_p6), %v3680_v36  ;;  %v3158_v42 = vld [vmem:[%s4912_s5 + $0xc] sm:$0xf] (!%p3093_p6) }
0x2990   :  { %s4097_s0 = smov (!%p3163_p0), 32  }
0x2992   :  { %3513 = vmatmul.mubr.msk.f32.vlgmr.msra.gmra.mrb[0].mxu0 %vm114_vm3, %v3157_v37 }
0x2a65   :  { %v2438_v38 = vpop.f32.mrb[0].mxu0 }
0x2a66   :  { %v2442_v39 = vadd.f32 %v2438_v38, %v4579_v13  ;;  %v3514_v18 = vpop.f32.mrb[1].mxu0 }
0x2a68   :  { %3967 = vtanh.f32 %v2442_v39  ;;  %v3160_v43 = vmul.f32 -1.442695, %v2442_v39 }
0x2a6a   :  { %3969 = vpow2.f32 %v3160_v43 }
0x2a72   :  { %v3968_v41 = vpop.eup %3967 }
0x2a73   :  { %2456 = vrot.lane.b32.xlu0 %v3968_v41, %s4094_s6 }
0x2a74   :  { %v3970_v44 = vpop.eup %3969 }
0x2a75   :  { %v2446_v45 = vadd.f32 1.0, %v3970_v44 }
0x2a77   :  { %2451 = vrot.lane.b32.xlu0 %v3158_v42, %s4095_s9  ;;  %3971 = vrcp.f32 %v2446_v45 }
0x2a81   :  { %v3972_v46 = vpop.eup %3971 }
0x2ae5   :  { %v2457_v3 = vpop.permute.xlu0 %2456 }
0x2ae6   :  { %v2459_v6 = vmul.f32 %v3972_v46, %v2457_v3 }
0x2ae8   :  { %2461 = vrot.lane.b32.xlu1 %v2459_v6, %s4095_s9 }
0x2ae9   :  { %v2452_v8 = vpop.permute.xlu0 %2451 }
0x2aea   :  { %v2454_v47 = vmul.f32 %v3972_v46, %v2452_v8 }
0x2aec   :  { %2364 = vperm.xlu1 %3965, %v2362_v7  }
0x2af0   :  { %2471 = vrot.lane.b32.xlu1 %v3157_v37, %s4096_s10 }
0x2b5a   :  { %v2462_v12 = vpop.permute.xlu1 %2461 }
0x2b5b   :  { %v2464_v48 = vadd.f32 %v2462_v12, %v2454_v47 }
0x2b5d   :  { %3973 = vtanh.f32 %v2464_v48 }
0x2b67   :  { %v3974_v49 = vpop.eup %3973 }
0x2b68   :  { %2467 = vrot.lane.b32.xlu0 %v3974_v49, %s4094_s6 }
0x2b6b   :  { %v2365_v50 = vpop.permute.xlu1 %2364 }
0x2b6c   :  { %vm2366_vm4 = vcmp.eq.s32.totalorder %v2365_v50, 1 }
0x2b6d   :  { %v2480_v52 = vsel %vm2366_vm4, %v2464_v48, %v2452_v8 }
0x2b6e   :  { %2482 = vrot.lane.b32.xlu1 %v2480_v52, %s4096_s10 }
0x2b6f   :  { %v2472_v54 = vpop.permute.xlu1 %2471 }
0x2bda   :  { %v2468_v53 = vpop.permute.xlu0 %2467 }
0x2bdb   :  { %v2470_v58 = vmul.f32 %v3972_v46, %v2468_v53 }
0x2bdd   :  { %v2474_v55 = vsel %vm2366_vm4, %v2470_v58, %v2472_v54  ;;  %v2490_v61 = vsel (!%p3163_p0), %vm2366_vm4, %v2470_v58, 0.0 }
0x2bde   :  { %2476 = vrot.lane.b32.xlu0 %v2474_v55, %s4095_s9 }
0x2be0   :  { %v2483_v57 = vpop.permute.xlu1 %2482 }
0x2be1   :  { %3162 = vst.msk [vmem:[%s4912_s5 + $0xc] sm:$0xf] %vm339_vm0, %v2483_v57 }
0x2be2   :  { %2492 = vrot.lane.b32.xlu0 (!%p3163_p0), %v2490_v61, %s4097_s0 }
0x2c4b   :  { %2489 = sbr.rel (%p3163_p0) target bundleno = 11350 (0x2c56), region = 109 }
0x2c50   :  { %v2477_v59 = vpop.permute.xlu0 %2476 }
0x2c51   :  { %3161 = vst.msk [vmem:[%s4912_s5 + $0x4] sm:$0xf] %vm339_vm0, %v2477_v59 }
0x2c54   :  { %v2493_v62 = vpop.permute.xlu0 %2492 }
0x2c55   :  { %2495 = vst.msk [vmem:[#allocation3] sm:$0xf] %vm339_vm0, %v2493_v62 }
0x2c56 PF:  { %2498 = sbr.rel (%p3098_p7) target bundleno = 12071 (0x2f27), region = 113  ;;  %v3683_v1 = vpack.c.bf16 (!%p3098_p7), %v4216_v15, %v4211_v14  ;;  %v4098_v5 = vmov (!%p3098_p7), 0.0|0.0   ;;  %v3686_v19 = vpack.c.bf16 (!%p3098_p7), %v4226_v17, %v4221_v16  ;;  %vm4099_vm5 = vmmov (!%p3098_p7), 0   ;;  %v3166_v16 = vld [vmem:[%s4912_s5 + $0xc] sm:$0xf] (!%p3098_p7)  ;;  %s4101_s22 = smov (!%p3098_p7), 64  }
0x2c57   :  { %3682 = vmatprep.subr.bf16.mxu0 (!%p3098_p7), %v4098_v5  ;;  %v4100_v35 = vmov (!%p3098_p7), 0.0   ;;  %v2592_v23 = vrot.slane (!%p3098_p7), %v3166_v16, 4  ;;  %s4102_s1 = smov (!%p3098_p7), 32   ;;  %vm2499_vm6 = vcmp.gt.s32.totalorder (!%p3098_p7), %v4300_v51, 7  ;;  %s4104_s23 = smov (!%p3098_p7), 96  }
0x2c58   :  { %3684 = vmatpush3.bf16.msra.mxu0 (!%p3098_p7), %v3683_v1  ;;  %3523 = vmatprep.mubr.msk.f32.mxu0 (!%p3098_p7), %vm4099_vm5, %v4100_v35  ;;  %p3171_p1 = scmp.ne.s32.totalorder (!%p3098_p7), %s4910_s3, 8 }
0x2c59   :  { %3685 = vmatprep.subr.bf16.mxu0 (!%p3098_p7), %v4098_v5 }
0x2c5c   :  { %3687 = vmatpush3.bf16.msra.mxu0 (!%p3098_p7), %v3686_v19  ;;  %v3165_v20 = vld [vmem:[%s4912_s5 + $0x4] sm:$0xf] (!%p3098_p7) }
0x2c5f   :  { %3524 = vmatmul.mubr.msk.f32.vlgmr.msra.gmra.mrb[0].mxu0 %vm114_vm3, %v3165_v20 }
0x2d32   :  { %v2576_v21 = vpop.f32.mrb[0].mxu0 }
0x2d33   :  { %v2581_v22 = vrot.slane %v2576_v21, 4  ;;  %v3525_v14 = vpop.f32.mrb[1].mxu0 }
0x2d35   :  { %v2583_v15 = vadd.f32 %v2581_v22, %v4579_v13  ;;  %v4103_v13 = vmov 0  }
0x2d36   :  { %3975 = vset.pattern.permute.xlu0 %v4103_v13  ;;  %v2500_v29 = vsel %vm2499_vm6, 1, %v4103_v13 }
0x2d37   :  { %3976 = vtanh.f32 %v2583_v15  ;;  %v3168_v24 = vmul.f32 -1.442695, %v2583_v15 }
0x2d39   :  { %3978 = vpow2.f32 %v3168_v24 }
0x2d41   :  { %v3977_v17 = vpop.eup %3976 }
0x2d42   :  { %2598 = vrot.lane.b32.xlu0 %v3977_v17, %s4101_s22 }
0x2d43   :  { %v3979_v25 = vpop.eup %3978 }
0x2d44   :  { %v2587_v26 = vadd.f32 1.0, %v3979_v25 }
0x2d46   :  { %2593 = vrot.lane.b32.xlu0 %v2592_v23, %s4102_s1  ;;  %3980 = vrcp.f32 %v2587_v26 }
0x2d4a   :  { %2502 = vperm.xlu0 %3975, %v2500_v29  }
0x2d50   :  { %v3981_v27 = vpop.eup %3980 }
0x2db4   :  { %v2599_v56 = vpop.permute.xlu0 %2598 }
0x2db5   :  { %v2601_v28 = vmul.f32 %v3981_v27, %v2599_v56 }
0x2db7   :  { %2603 = vrot.lane.b32.xlu1 %v2601_v28, %s4102_s1 }
0x2db8   :  { %v2594_v30 = vpop.permute.xlu0 %2593 }
0x2db9   :  { %v2596_v31 = vmul.f32 %v3981_v27, %v2594_v30 }
0x2dc9   :  { %v2503_v37 = vpop.permute.xlu0 %2502 }
0x2dca   :  { %vm2504_vm7 = vcmp.eq.s32.totalorder %v2503_v37, 1 }
0x2e29   :  { %v2604_v32 = vpop.permute.xlu1 %2603 }
0x2e2a   :  { %v2606_v10 = vadd.f32 %v2604_v32, %v2596_v31 }
0x2e2c   :  { %3982 = vtanh.f32 %v2606_v10  ;;  %v2621_v60 = vrot.slane %v2606_v10, 4 }
0x2e36   :  { %v3983_v11 = vpop.eup %3982 }
0x2e37   :  { %2609 = vrot.lane.b32.xlu1 %v3983_v11, %s4101_s22 }
0x2ea9   :  { %v2610_v33 = vpop.permute.xlu1 %2609 }
0x2eaa   :  { %v2612_v34 = vmul.f32 %v3981_v27, %v2610_v33 }
0x2eac   :  { %v2614_v36 = vrot.slane %v2612_v34, 4 }
0x2eae   :  { %2615 = vrot.lane.b32.xlu1 %v2614_v36, %s4102_s1 }
0x2eb2   :  { %2622 = vrot.lane.b32.xlu1 %v2621_v60, %s4104_s23 }
0x2f20   :  { %v2616_v51 = vpop.permute.xlu1 %2615  ;;  %2630 = sbr.rel (%p3171_p1) target bundleno = 12071 (0x2f27), region = 117 }
0x2f21   :  { %v2618_v38 = vsel %vm2504_vm7, %v2616_v51, %v3165_v20  ;;  %v2631_v40 = vsel (!%p3171_p1), %vm2504_vm7, %v2616_v51, 0.0 }
0x2f22   :  { %3169 = vst.msk [vmem:[%s4912_s5 + $0x4] sm:$0xf] %vm339_vm0, %v2618_v38  ;;  %2632 = vst.msk [vmem:[#allocation3] sm:$0xf] (!%p3171_p1), %vm339_vm0, %v2631_v40 }
0x2f24   :  { %v2623_v39 = vpop.permute.xlu1 %2622 }
0x2f25   :  { %v2625_v18 = vsel %vm2504_vm7, %v2623_v39, %v3166_v16 }
0x2f26   :  { %3170 = vst.msk [vmem:[%s4912_s5 + $0xc] sm:$0xf] %vm339_vm0, %v2625_v18 }
0x2f27 PF:  { %3688 = vmatprep.subr.bf16.mxu0 %v3985_v0  ;;  %v2634_v41 = vld [vmem:[%s4911_s4 + $0xd0] sm:$0xff]  ;;  %v2635_v42 = vld [vmem:[%s4911_s4 + $0xd8] sm:$0xff]  ;;  %v2636_v43 = vld [vmem:[%s4911_s4 + $0xe0] sm:$0xff]  ;;  %3534 = vmatprep.mubr.msk.f32.mxu0 %vm3986_vm1, %v3987_v4  ;;  %vm2719_vm8 = vcmask 64512  }
0x2f28   :  { %v3689_v44 = vpack.c.bf16 %v2635_v42, %v2634_v41  ;;  %v2637_v45 = vld [vmem:[%s4911_s4 + $0xe8] sm:$0xff]  ;;  %3537 = vmatprep.subr.mxu1 %v3987_v4  ;;  %3539 = vmatprep.mubr.msk.f32.mxu1 %vm3986_vm1, %v3987_v4  ;;  %v2717_v7 = vld [vmem:[%s4911_s4 + $0x100] sm:$0xff]  ;;  %v3172_v8 = vld [vmem:[%s4911_s4 + $0xf0] ss:$0 sm:$0xff] }
0x2f29   :  { %3984 = vset.pattern.permute.xlu0 %v3988_v9  ;;  %v3692_v46 = vpack.c.bf16 %v2637_v45, %v2636_v43  ;;  %v2633_v3 = vld [vmem:[#allocation3] sm:$0xf]  ;;  %v2718_v6 = vld [vmem:[%s4911_s4 + $0x108] sm:$0xff]  ;;  %v2716_v9 = vld [vmem:[%s4911_s4 + $0xf8] sm:$0xff] }
0x2f2a   :  { %3690 = vmatpush3.bf16.msra.mxu0 %v3689_v44  ;;  %3538 = vmatpush3.msra.mxu1 %v2718_v6  ;;  %v3695_v12 = vpack.c.bf16 %v2717_v7, %v2716_v9  ;;  %v2873_v50 = vld [vmem:[%s4911_s4 + $0x118] sm:$0xff]  ;;  %v2874_v52 = vld [vmem:[%s4911_s4 + $0x120] sm:$0xff]  ;;  %v2875_v63 = vld [vmem:[%s4911_s4 + $0x128] sm:$0xff] }
0x2f2b   :  { %3691 = vmatprep.subr.bf16.mxu0 %v3985_v0  ;;  %3694 = vmatprep.subr.bf16.mxu1 %v3985_v0  ;;  %v3698_v53 = vpack.c.bf16 %v2874_v52, %v2873_v50  ;;  %v3176_v57 = vld [vmem:[%s4911_s4 + $0x110] ss:$0 sm:$0xff]  ;;  %v2956_v1 = vld [vmem:[%s4911_s4 + $0x140] sm:$0xff]  ;;  %v2957_v5 = vld [vmem:[%s4911_s4 + $0x148] sm:$0xff] }
0x2f2c   :  { %v3704_v19 = vpack.c.bf16 %v2957_v5, %v2956_v1  ;;  %v3177_v35 = vld [vmem:[%s4911_s4 + $0x138] ss:$0 sm:$0xff]  ;;  %v3179_v15 = vld [vmem:[%s4911_s4 + $0x150] ss:$0 sm:$0xff] }
0x2f2e   :  { %3693 = vmatpush3.bf16.msra.mxu0 %v3692_v46 }
0x2f2f   :  { %3703 = vmatprep.subr.bf16.mxu0 %v3985_v0 }
0x2f31   :  { %3535 = vmatmul.mubr.msk.f32.vlgmr.msra.gmra.mrb[0].mxu0 %vm114_vm3, %v2633_v3 }
0x2f32   :  { %3564 = vmatprep.mubr.msk.f32.mxu0 %vm3986_vm1, %v3987_v4  ;;  %3705 = vmatpush3.bf16.msra.mxu0 %v3704_v19 }
0x3004   :  { %v2712_v47 = vpop.f32.mrb[0].mxu0 }
0x3005   :  { %v2713_v48 = vadd.f32 %v3172_v8, %v2712_v47  ;;  %v3536_v49 = vpop.f32.mrb[1].mxu0 }
0x3007   :  { %3540 = vmatmul.mubr.msk.f32.vlgmr.msra.gmra.mrb[0].mxu1 %vm2719_vm8, %v2713_v48 }
0x3008   :  { %3696 = vmatpush3.bf16.msra.mxu1 %v3695_v12  ;;  %3546 = vmatprep.mubr.msk.f32.mxu1 %vm3986_vm1, %v3987_v4 }
0x3009   :  { %3697 = vmatprep.subr.bf16.mxu1 %v3985_v0 }
0x300b   :  { %3547 = vmatmul.mubr.msk.f32.vlgmr.msra.gmra.mrb[2].mxu1 %vm30_vm2, %v188_v2 }
0x300c   :  { %3557 = vmatprep.mubr.msk.f32.mxu1 %vm3986_vm1, %v3987_v4  ;;  %3699 = vmatpush3.bf16.msra.mxu1 %v3698_v53  ;;  %v2876_v4 = vld [vmem:[%s4911_s4 + $0x130] sm:$0xff] }
0x300d   :  { %3700 = vmatprep.subr.bf16.mxu1 %v3985_v0  ;;  %v3701_v2 = vpack.c.bf16 %v2876_v4, %v2875_v63 }
0x3010   :  { %3702 = vmatpush3.bf16.msra.mxu1 %v3701_v2 }
0x30da   :  { %v2789_v54 = vpop.f32.mrb[0].mxu1 }
0x30db   :  { %v3541_v58 = vpop.f32.mrb[1].mxu1 }
0x30de   :  { %v2862_v55 = vpop.f32.mrb[2].mxu1 }
0x30df   :  { %v2863_v59 = vadd.f32 %v2862_v55, %v2789_v54  ;;  %v3548_v61 = vpop.f32.mrb[3].mxu1 }
0x30e1   :  { %v2871_v0 = vadd.f32 %v3176_v57, %v2863_v59 }
0x30e3   :  { %v2872_v62 = vmax.f32 %v2871_v0, 0.0 }
0x30e5   :  { %3558 = vmatmul.mubr.msk.f32.vlgmr.msra.gmra.mrb[4].mxu1 %vm114_vm3, %v2872_v62 }
0x31b8   :  { %v2951_v20 = vpop.f32.mrb[4].mxu1 }
0x31b9   :  { %v2952_v21 = vadd.f32 %v3177_v35, %v2951_v20  ;;  %v3559_v22 = vpop.f32.mrb[5].mxu1 }
0x31bb   :  { %v2955_v14 = vmax.f32 %v2952_v21, 0.0 }
0x31bd   :  { %3565 = vmatmul.mubr.msk.f32.vlgmr.msra.gmra.mrb[2].mxu0 %vm30_vm2, %v2955_v14 }
0x3290   :  { %v3032_v16 = vpop.f32.mrb[2].mxu0 }
0x3291   :  { %v3033_v17 = vadd.f32 %v3179_v15, %v3032_v16  ;;  %v3566_v23 = vpop.f32.mrb[3].mxu0 }
0x3293   :  { %3038 = vperm.xlu0 %3984, %v3033_v17  }
0x3312   :  { %v3039_v24 = vpop.permute.xlu0 %3038 }
0x3313   :  { %3181 = vst.msk [vmem:[%s4912_s5 + $0x10] sm:$0xf] %vm339_vm0, %v3039_v24 }

</bundles_post_ra>
